<compile_context>
chip_gen: v7x
topology: tpu7x:2x2x1
jax: 0.10.0
libtpu: 0.0.40
codegen_flags: <defaults>
</compile_context>

<pallas_src>
import numpy as np

import jax
import jax.numpy as jnp
from jax.experimental import pallas as pl
from jax.experimental.pallas import tpu as pltpu

VMEM_SPEC = pl.BlockSpec(memory_space=pltpu.MemorySpace.VMEM)

HIDDEN = 512           # LSTM hidden size
HEAD_DIMS = (5, 1, 1)  # policy, value, feature
HEAD_PAD = 128         # lane-dense head output width


# ----------------------------------------------------------------------------
# Fused whole-network kernel
# ----------------------------------------------------------------------------
def _fused_kernel(
    x_ref, goal_ref,
    w1_ref, b1_ref, p1_ref,
    g2_ref, w2_ref, b2_ref, p2_ref,
    g3_ref, w3_ref, b3_ref, p3_ref,
    inL_w_ref, inG_w_ref, in_b_ref,
    fc2_w_ref, fc2_b_ref,
    lstm_w_ref, lstm_b_ref,
    head_w_ref, head_b_ref,
    out_ref,
):
    f32 = jnp.float32
    bf16 = jnp.bfloat16

    def relu(v):
        return jnp.maximum(v, 0.0)

    def pool(y, p_ref):
        # 2x2 max-pool as 4 one-hot selection matmuls + elementwise max.
        out = jnp.dot(p_ref[0], y, preferred_element_type=f32)
        for k in range(1, 4):
            out = jnp.maximum(out, jnp.dot(p_ref[k], y, preferred_element_type=f32))
        return out

    def conv_relu_pool(x, g_ref, w_ref, b_ref, p_ref):
        # Conv2d(k=3, pad=1) as 9 per-tap matmuls + 0/1 shift matrices (zero padding exact),
        # then bias + ReLU, then 2x2 max-pool.
        acc = jnp.dot(g_ref[0],
                      jnp.dot(x, w_ref[0], preferred_element_type=f32),
                      preferred_element_type=f32)
        for t in range(1, 9):
            acc = acc + jnp.dot(g_ref[t],
                                jnp.dot(x, w_ref[t], preferred_element_type=f32),
                                preferred_element_type=f32)
        return pool(relu(acc + b_ref[...]), p_ref)

    # --- conv stage 1: im2col'd input (B*64, 36) -> single matmul -> pool ---
    y1 = relu(jnp.dot(x_ref[...], w1_ref[...], preferred_element_type=f32) + b1_ref[...])
    x2 = pool(y1, p1_ref)                                                # (B*16, 16)

    # --- conv stages 2 & 3 ---
    x3 = conv_relu_pool(x2, g2_ref, w2_ref, b2_ref, p2_ref)              # (B*4, 32)
    local = conv_relu_pool(x3, g3_ref, w3_ref, b3_ref, p3_ref)           # (B, 64)

    # --- fused fc_goal + concat_layer + fc1 (linear-linear folding, done at prepare time) ---
    h = (jnp.dot(local.astype(bf16), inL_w_ref[...], preferred_element_type=f32)
         + jnp.dot(goal_ref[...], inG_w_ref[...], preferred_element_type=f32)
         + in_b_ref[...])                                                # (B, 256)
    h = relu(h).astype(bf16)

    # --- fc2 ---
    h = relu(jnp.dot(h, fc2_w_ref[...], preferred_element_type=f32) + fc2_b_ref[...])
    h = h.astype(bf16)                                                   # (B, 512)

    # --- LSTM single step, zero initial (h, c): h@W_hh == 0, f-gate inert (c0 == 0).
    # lstm_w holds only the i/g/o gate columns: (512, 3*512).
    gates = jnp.dot(h, lstm_w_ref[...], preferred_element_type=f32) + lstm_b_ref[...]
    i_g = jax.nn.sigmoid(gates[:, 0:HIDDEN])
    g_g = jnp.tanh(gates[:, HIDDEN:2 * HIDDEN])
    o_g = jax.nn.sigmoid(gates[:, 2 * HIDDEN:3 * HIDDEN])
    lstm_h = (o_g * jnp.tanh(i_g * g_g)).astype(bf16)                    # (B, 512)

    # --- merged policy/value/feature heads, lane-dense (B, 128) output ---
    out_ref[...] = (jnp.dot(lstm_h, head_w_ref[...], preferred_element_type=f32)
                    + head_b_ref[...]).astype(out_ref.dtype)


# ----------------------------------------------------------------------------
# One-time constant construction (all transposes / folds hoisted out of forward)
# ----------------------------------------------------------------------------
def _shift_selectors(batch, h, w):
    """(9, B*h*w, B*h*w) 0/1 matrices implementing the 3x3/pad=1 spatial gather."""
    r = batch * h * w
    g = np.zeros((9, r, r), np.float32)
    taps = [(a, b) for a in range(3) for b in range(3)]
    for t, (dh, dw) in enumerate(taps):
        for bb in range(batch):
            for hh in range(h):
                for ww in range(w):
                    hs, ws = hh + dh - 1, ww + dw - 1
                    if 0 <= hs < h and 0 <= ws < w:
                        g[t, (bb * h + hh) * w + ww, (bb * h + hs) * w + ws] = 1.0
    return g


def _pool_selectors(batch, h, w):
    """(4, B*(h/2)*(w/2), B*h*w) 0/1 matrices selecting the 4 positions of each 2x2 window."""
    ho, wo = h // 2, w // 2
    p = np.zeros((4, batch * ho * wo, batch * h * w), np.float32)
    wins = [(a, b) for a in range(2) for b in range(2)]
    for k, (dh, dw) in enumerate(wins):
        for bb in range(batch):
            for yo in range(ho):
                for xo in range(wo):
                    p[k, (bb * ho + yo) * wo + xo,
                      (bb * h + (2 * yo + dh)) * w + (2 * xo + dw)] = 1.0
    return p


def init_params():
    """Deterministic synthetic parameters with the exact PyTorch shapes."""
    base = jax.random.PRNGKey(42)

    def make(shape, k):
        return 0.05 * jax.random.normal(jax.random.fold_in(base, k), shape, jnp.float32)

    p = {}
    p["conv1_w"] = make((16, 4, 3, 3), 0);   p["conv1_b"] = make((16,), 1)
    p["conv2_w"] = make((32, 16, 3, 3), 2);  p["conv2_b"] = make((32,), 3)
    p["conv3_w"] = make((64, 32, 3, 3), 4);  p["conv3_b"] = make((64,), 5)
    p["goal_w"] = make((64, 3), 6);          p["goal_b"] = make((64,), 7)
    p["cat_w"] = make((128, 128), 8);        p["cat_b"] = make((128,), 9)
    p["fc1_w"] = make((256, 128), 10);       p["fc1_b"] = make((256,), 11)
    p["fc2_w"] = make((512, 256), 12);       p["fc2_b"] = make((512,), 13)
    p["lstm_w_ih"] = make((2048, 512), 14);  p["lstm_b_ih"] = make((2048,), 15)
    p["lstm_w_hh"] = make((2048, 512), 16);  p["lstm_b_hh"] = make((2048,), 17)
    p["pol_w"] = make((5, 512), 18);         p["pol_b"] = make((5,), 19)
    p["val_w"] = make((1, 512), 20);         p["val_b"] = make((1,), 21)
    p["feat_w"] = make((1, 512), 22);        p["feat_b"] = make((1,), 23)
    return p


def prepare_network(p, batch, spatial=8):
    """Convert PyTorch-shaped params to kernel-ready layout ONCE (not per forward)."""
    f32, bf16 = jnp.float32, jnp.bfloat16
    H = HIDDEN

    def conv_w_taps(w_pt):  # (Cout, Cin, 3, 3) -> (9, Cin, Cout), tap order dh*3+dw
        cout, cin = w_pt.shape[0], w_pt.shape[1]
        return jnp.transpose(w_pt, (2, 3, 1, 0)).reshape(9, cin, cout)

    # Conv1 weight in flat im2col layout (9*Cin, Cout), rows ordered (tap, cin).
    c1out, c1in = p["conv1_w"].shape[0], p["conv1_w"].shape[1]
    w1_flat = jnp.transpose(p["conv1_w"], (2, 3, 1, 0)).reshape(9 * c1in, c1out)

    # Fold fc_goal -> concat_layer -> fc1 (three consecutive Linears, no activation between).
    M = p["cat_w"].T @ p["fc1_w"].T                       # (128, 256)
    inL_w = M[:64]                                        # (64, 256) local-feature path
    inG_w = p["goal_w"].T @ M[64:]                        # (3, 256)  raw-goal path
    in_b = (p["goal_b"] @ M[64:] + p["cat_b"] @ p["fc1_w"].T + p["fc1_b"]).reshape(1, -1)

    # LSTM: keep i/g/o gate rows, drop the inert f-gate; fold both biases.
    w_ih = p["lstm_w_ih"]
    b_all = p["lstm_b_ih"] + p["lstm_b_hh"]
    lstm_w = jnp.concatenate(
        [w_ih[0:H], w_ih[2 * H:3 * H], w_ih[3 * H:4 * H]], axis=0).T      # (512, 1536)
    lstm_b = jnp.concatenate(
        [b_all[0:H], b_all[2 * H:3 * H], b_all[3 * H:4 * H]]).reshape(1, 3 * H)

    # Merge the 3 heads into one lane-dense (512, 128) weight.
    head_w = jnp.concatenate([p["pol_w"], p["val_w"], p["feat_w"]], axis=0).T  # (512, 7)
    head_b = jnp.concatenate([p["pol_b"], p["val_b"], p["feat_b"]]).reshape(1, -1)
    head_w = jnp.pad(head_w, ((0, 0), (0, HEAD_PAD - head_w.shape[1])))
    head_b = jnp.pad(head_b, ((0, 0), (0, HEAD_PAD - head_b.shape[1])))

    s = spatial
    net = dict(
        # conv stage 1 (im2col) + fixed 0/1 pool selectors
        w1=w1_flat.astype(f32), b1=p["conv1_b"].reshape(1, -1).astype(f32),
        p1=jnp.asarray(_pool_selectors(batch, s, s), f32),
        # conv stage 2
        g2=jnp.asarray(_shift_selectors(batch, s // 2, s // 2), f32),
        w2=conv_w_taps(p["conv2_w"]).astype(f32),
        b2=p["conv2_b"].reshape(1, -1).astype(f32),
        p2=jnp.asarray(_pool_selectors(batch, s // 2, s // 2), f32),
        # conv stage 3
        g3=jnp.asarray(_shift_selectors(batch, s // 4, s // 4), f32),
        w3=conv_w_taps(p["conv3_w"]).astype(f32),
        b3=p["conv3_b"].reshape(1, -1).astype(f32),
        p3=jnp.asarray(_pool_selectors(batch, s // 4, s // 4), f32),
        # dense path: big weights stored bf16 (f32 accumulation), biases f32
        inL_w=inL_w.astype(bf16), inG_w=inG_w.astype(f32), in_b=in_b.astype(f32),
        fc2_w=p["fc2_w"].T.astype(bf16), fc2_b=p["fc2_b"].reshape(1, -1).astype(f32),
        lstm_w=lstm_w.astype(bf16), lstm_b=lstm_b.astype(f32),
        head_w=head_w.astype(bf16), head_b=head_b.astype(f32),
    )
    return net


# ----------------------------------------------------------------------------
# Forward
# ----------------------------------------------------------------------------
def custom_network_forward(net, local_observation_nchw, goal_direction):
    B, C, H, W = local_observation_nchw.shape
    # NCHW -> NHWC, zero-pad by 1, im2col to (B*H*W, 9*C); row index (b*H+h)*W + w
    # matches the pool/shift selector matrices.
    x = jnp.transpose(local_observation_nchw, (0, 2, 3, 1))
    xp = jnp.pad(x, ((0, 0), (1, 1), (1, 1), (0, 0)))
    x_im2col = jnp.concatenate(
        [xp[:, dh:dh + H, dw:dw + W, :] for dh in range(3) for dw in range(3)],
        axis=-1).reshape(B * H * W, 9 * C)

    args = (
        x_im2col, goal_direction,
        net["w1"], net["b1"], net["p1"],
        net["g2"], net["w2"], net["b2"], net["p2"],
        net["g3"], net["w3"], net["b3"], net["p3"],
        net["inL_w"], net["inG_w"], net["in_b"],
        net["fc2_w"], net["fc2_b"],
        net["lstm_w"], net["lstm_b"],
        net["head_w"], net["head_b"],
    )
    out = pl.pallas_call(
        _fused_kernel,
        out_shape=jax.ShapeDtypeStruct((B, HEAD_PAD), jnp.float32),
        in_specs=[VMEM_SPEC] * len(args),
        out_specs=VMEM_SPEC,
    )(*args)

    pd, vd, fd = HEAD_DIMS
    policy_output = out[:, 0:pd]
    value_output = out[:, pd:pd + vd]
    feature_output = out[:, pd + vd:pd + vd + fd]
    # TODO(synk): the reference forward() also print()s intermediates; omitted (no effect on outputs).
    return policy_output, value_output, feature_output


# ----------------------------------------------------------------------------
# Pure-JAX f32 reference (for correctness check only)
# ----------------------------------------------------------------------------
def _reference_forward(p, obs_nchw, goal):
    x = jnp.transpose(obs_nchw, (0, 2, 3, 1))

    def conv_block(x, w_pt, b):
        w = jnp.transpose(w_pt, (2, 3, 1, 0))  # HWIO
        y = jax.lax.conv_general_dilated(
            x, w, window_strides=(1, 1), padding="SAME",
            dimension_numbers=("NHWC", "HWIO", "NHWC"))
        y = jax.nn.relu(y + b)
        B, H, W, C = y.shape
        return y.reshape(B, H // 2, 2, W // 2, 2, C).max(axis=(2, 4))

    x = conv_block(x, p["conv1_w"], p["conv1_b"])
    x = conv_block(x, p["conv2_w"], p["conv2_b"])
    x = conv_block(x, p["conv3_w"], p["conv3_b"])
    local = x.reshape(x.shape[0], -1)
    goal_f = goal @ p["goal_w"].T + p["goal_b"]
    comb = jnp.concatenate([local, goal_f], axis=1)
    h = comb @ p["cat_w"].T + p["cat_b"]
    h = jax.nn.relu(h @ p["fc1_w"].T + p["fc1_b"])
    h = jax.nn.relu(h @ p["fc2_w"].T + p["fc2_b"])
    gates = h @ p["lstm_w_ih"].T + p["lstm_b_ih"] + p["lstm_b_hh"]
    Hs = HIDDEN
    i = jax.nn.sigmoid(gates[:, :Hs])
    f = jax.nn.sigmoid(gates[:, Hs:2 * Hs])          # inert: c0 == 0
    g = jnp.tanh(gates[:, 2 * Hs:3 * Hs])
    o = jax.nn.sigmoid(gates[:, 3 * Hs:4 * Hs])
    c = f * 0.0 + i * g
    hh = o * jnp.tanh(c)
    return (hh @ p["pol_w"].T + p["pol_b"],
            hh @ p["val_w"].T + p["val_b"],
            hh @ p["feat_w"].T + p["feat_b"])


if __name__ == "__main__":
    params = init_params()

    key = jax.random.PRNGKey(0)
    k1, k2 = jax.random.split(key)
    # Spatial must be 8x8: three 2x2 pools -> 1x1 so flattened conv features == 64,
    # matching concat_layer == Linear(64 + 64, 128).
    local_observation = jax.random.normal(k1, (2, 4, 8, 8), jnp.float32)  # NCHW like PyTorch
    goal_direction = jax.random.normal(k2, (2, 3), jnp.float32)

    net = prepare_network(params, batch=local_observation.shape[0], spatial=8)

    fwd = jax.jit(custom_network_forward)
    policy, value, feature = fwd(net, local_observation, goal_direction)
    jax.block_until_ready((policy, value, feature))

    assert policy.shape == (2, 5)
    assert value.shape == (2, 1)
    assert feature.shape == (2, 1)

    # Numerical check against a pure-JAX f32 reference of the PyTorch module.
    rp, rv, rf = _reference_forward(params, local_observation, goal_direction)
    assert jnp.allclose(policy, rp, atol=1e-2, rtol=1e-2)
    assert jnp.allclose(value, rv, atol=1e-2, rtol=1e-2)
    assert jnp.allclose(feature, rf, atol=1e-2, rtol=1e-2)

    print("KERNEL_OK")
</pallas_src>

<mosaic_0001>
module attributes {stable_mosaic.version = 11 : i64} {
  func.func @_fused_kernel(%arg0: memref<128x36xf32, #tpu.memory_space<vmem>>, %arg1: memref<2x3xf32, #tpu.memory_space<vmem>>, %arg2: memref<36x16xf32, #tpu.memory_space<vmem>>, %arg3: memref<1x16xf32, #tpu.memory_space<vmem>>, %arg4: memref<4x32x128xf32, #tpu.memory_space<vmem>>, %arg5: memref<9x32x32xf32, #tpu.memory_space<vmem>>, %arg6: memref<9x16x32xf32, #tpu.memory_space<vmem>>, %arg7: memref<1x32xf32, #tpu.memory_space<vmem>>, %arg8: memref<4x8x32xf32, #tpu.memory_space<vmem>>, %arg9: memref<9x8x8xf32, #tpu.memory_space<vmem>>, %arg10: memref<9x32x64xf32, #tpu.memory_space<vmem>>, %arg11: memref<1x64xf32, #tpu.memory_space<vmem>>, %arg12: memref<4x2x8xf32, #tpu.memory_space<vmem>>, %arg13: memref<64x256xbf16, #tpu.memory_space<vmem>>, %arg14: memref<3x256xf32, #tpu.memory_space<vmem>>, %arg15: memref<1x256xf32, #tpu.memory_space<vmem>>, %arg16: memref<256x512xbf16, #tpu.memory_space<vmem>>, %arg17: memref<1x512xf32, #tpu.memory_space<vmem>>, %arg18: memref<512x1536xbf16, #tpu.memory_space<vmem>>, %arg19: memref<1x1536xf32, #tpu.memory_space<vmem>>, %arg20: memref<512x128xbf16, #tpu.memory_space<vmem>>, %arg21: memref<1x128xf32, #tpu.memory_space<vmem>>, %arg22: memref<2x128xf32, #tpu.memory_space<vmem>>) attributes {dimension_semantics = [], scalar_prefetch = 0 : i64, scratch_operands = 0 : i64, tpu.core_type = #tpu.core_type<tc>} {
    %c0 = arith.constant 0 : index
    %c0_0 = arith.constant 0 : index
    %0 = vector.load %arg0[%c0, %c0_0] : memref<128x36xf32, #tpu.memory_space<vmem>>, vector<128x36xf32>
    %c0_1 = arith.constant 0 : index
    %c0_2 = arith.constant 0 : index
    %1 = vector.load %arg2[%c0_1, %c0_2] : memref<36x16xf32, #tpu.memory_space<vmem>>, vector<36x16xf32>
    %cst = arith.constant dense<0.000000e+00> : vector<128x16xf32>
    %2 = tpu.matmul %0, %1, %cst {dimension_numbers = #tpu.dot_dimension_numbers<[1], [0], [0], [1], [0, 0, 1, 1], [], []>} : vector<128x36xf32>, vector<36x16xf32>, vector<128x16xf32> -> vector<128x16xf32>
    %c0_3 = arith.constant 0 : index
    %c0_4 = arith.constant 0 : index
    %3 = vector.load %arg3[%c0_3, %c0_4] : memref<1x16xf32, #tpu.memory_space<vmem>>, vector<1x16xf32>
    %4 = vector.broadcast %3 : vector<1x16xf32> to vector<128x16xf32>
    %5 = arith.addf %2, %4 : vector<128x16xf32>
    %cst_5 = arith.constant 0.000000e+00 : f32
    %6 = vector.broadcast %cst_5 : f32 to vector<128x16xf32>
    %7 = arith.maximumf %5, %6 : vector<128x16xf32>
    %c0_6 = arith.constant 0 : index
    %c0_7 = arith.constant 0 : index
    %c0_8 = arith.constant 0 : index
    %8 = vector.load %arg4[%c0_6, %c0_7, %c0_8] : memref<4x32x128xf32, #tpu.memory_space<vmem>>, vector<1x32x128xf32>
    %9 = vector.shape_cast %8 : vector<1x32x128xf32> to vector<32x128xf32>
    %cst_9 = arith.constant dense<0.000000e+00> : vector<32x16xf32>
    %10 = tpu.matmul %9, %7, %cst_9 {dimension_numbers = #tpu.dot_dimension_numbers<[1], [0], [0], [1], [0, 0, 1, 1], [], []>} : vector<32x128xf32>, vector<128x16xf32>, vector<32x16xf32> -> vector<32x16xf32>
    %c1 = arith.constant 1 : index
    %c0_10 = arith.constant 0 : index
    %c0_11 = arith.constant 0 : index
    %11 = vector.load %arg4[%c1, %c0_10, %c0_11] : memref<4x32x128xf32, #tpu.memory_space<vmem>>, vector<1x32x128xf32>
    %12 = vector.shape_cast %11 : vector<1x32x128xf32> to vector<32x128xf32>
    %cst_12 = arith.constant dense<0.000000e+00> : vector<32x16xf32>
    %13 = tpu.matmul %12, %7, %cst_12 {dimension_numbers = #tpu.dot_dimension_numbers<[1], [0], [0], [1], [0, 0, 1, 1], [], []>} : vector<32x128xf32>, vector<128x16xf32>, vector<32x16xf32> -> vector<32x16xf32>
    %14 = arith.maximumf %10, %13 : vector<32x16xf32>
    %c2 = arith.constant 2 : index
    %c0_13 = arith.constant 0 : index
    %c0_14 = arith.constant 0 : index
    %15 = vector.load %arg4[%c2, %c0_13, %c0_14] : memref<4x32x128xf32, #tpu.memory_space<vmem>>, vector<1x32x128xf32>
    %16 = vector.shape_cast %15 : vector<1x32x128xf32> to vector<32x128xf32>
    %cst_15 = arith.constant dense<0.000000e+00> : vector<32x16xf32>
    %17 = tpu.matmul %16, %7, %cst_15 {dimension_numbers = #tpu.dot_dimension_numbers<[1], [0], [0], [1], [0, 0, 1, 1], [], []>} : vector<32x128xf32>, vector<128x16xf32>, vector<32x16xf32> -> vector<32x16xf32>
    %18 = arith.maximumf %14, %17 : vector<32x16xf32>
    %c3 = arith.constant 3 : index
    %c0_16 = arith.constant 0 : index
    %c0_17 = arith.constant 0 : index
    %19 = vector.load %arg4[%c3, %c0_16, %c0_17] : memref<4x32x128xf32, #tpu.memory_space<vmem>>, vector<1x32x128xf32>
    %20 = vector.shape_cast %19 : vector<1x32x128xf32> to vector<32x128xf32>
    %cst_18 = arith.constant dense<0.000000e+00> : vector<32x16xf32>
    %21 = tpu.matmul %20, %7, %cst_18 {dimension_numbers = #tpu.dot_dimension_numbers<[1], [0], [0], [1], [0, 0, 1, 1], [], []>} : vector<32x128xf32>, vector<128x16xf32>, vector<32x16xf32> -> vector<32x16xf32>
    %22 = arith.maximumf %18, %21 : vector<32x16xf32>
    %c0_19 = arith.constant 0 : index
    %c0_20 = arith.constant 0 : index
    %c0_21 = arith.constant 0 : index
    %23 = vector.load %arg5[%c0_19, %c0_20, %c0_21] : memref<9x32x32xf32, #tpu.memory_space<vmem>>, vector<1x32x32xf32>
    %24 = vector.shape_cast %23 : vector<1x32x32xf32> to vector<32x32xf32>
    %c0_22 = arith.constant 0 : index
    %c0_23 = arith.constant 0 : index
    %c0_24 = arith.constant 0 : index
    %25 = vector.load %arg6[%c0_22, %c0_23, %c0_24] : memref<9x16x32xf32, #tpu.memory_space<vmem>>, vector<1x16x32xf32>
    %26 = vector.shape_cast %25 : vector<1x16x32xf32> to vector<16x32xf32>
    %cst_25 = arith.constant dense<0.000000e+00> : vector<32x32xf32>
    %27 = tpu.matmul %22, %26, %cst_25 {dimension_numbers = #tpu.dot_dimension_numbers<[1], [0], [0], [1], [0, 0, 1, 1], [], []>} : vector<32x16xf32>, vector<16x32xf32>, vector<32x32xf32> -> vector<32x32xf32>
    %cst_26 = arith.constant dense<0.000000e+00> : vector<32x32xf32>
    %28 = tpu.matmul %24, %27, %cst_26 {dimension_numbers = #tpu.dot_dimension_numbers<[1], [0], [0], [1], [0, 0, 1, 1], [], []>} : vector<32x32xf32>, vector<32x32xf32>, vector<32x32xf32> -> vector<32x32xf32>
    %c1_27 = arith.constant 1 : index
    %c0_28 = arith.constant 0 : index
    %c0_29 = arith.constant 0 : index
    %29 = vector.load %arg5[%c1_27, %c0_28, %c0_29] : memref<9x32x32xf32, #tpu.memory_space<vmem>>, vector<1x32x32xf32>
    %30 = vector.shape_cast %29 : vector<1x32x32xf32> to vector<32x32xf32>
    %c1_30 = arith.constant 1 : index
    %c0_31 = arith.constant 0 : index
    %c0_32 = arith.constant 0 : index
    %31 = vector.load %arg6[%c1_30, %c0_31, %c0_32] : memref<9x16x32xf32, #tpu.memory_space<vmem>>, vector<1x16x32xf32>
    %32 = vector.shape_cast %31 : vector<1x16x32xf32> to vector<16x32xf32>
    %cst_33 = arith.constant dense<0.000000e+00> : vector<32x32xf32>
    %33 = tpu.matmul %22, %32, %cst_33 {dimension_numbers = #tpu.dot_dimension_numbers<[1], [0], [0], [1], [0, 0, 1, 1], [], []>} : vector<32x16xf32>, vector<16x32xf32>, vector<32x32xf32> -> vector<32x32xf32>
    %cst_34 = arith.constant dense<0.000000e+00> : vector<32x32xf32>
    %34 = tpu.matmul %30, %33, %cst_34 {dimension_numbers = #tpu.dot_dimension_numbers<[1], [0], [0], [1], [0, 0, 1, 1], [], []>} : vector<32x32xf32>, vector<32x32xf32>, vector<32x32xf32> -> vector<32x32xf32>
    %35 = arith.addf %28, %34 : vector<32x32xf32>
    %c2_35 = arith.constant 2 : index
    %c0_36 = arith.constant 0 : index
    %c0_37 = arith.constant 0 : index
    %36 = vector.load %arg5[%c2_35, %c0_36, %c0_37] : memref<9x32x32xf32, #tpu.memory_space<vmem>>, vector<1x32x32xf32>
    %37 = vector.shape_cast %36 : vector<1x32x32xf32> to vector<32x32xf32>
    %c2_38 = arith.constant 2 : index
    %c0_39 = arith.constant 0 : index
    %c0_40 = arith.constant 0 : index
    %38 = vector.load %arg6[%c2_38, %c0_39, %c0_40] : memref<9x16x32xf32, #tpu.memory_space<vmem>>, vector<1x16x32xf32>
    %39 = vector.shape_cast %38 : vector<1x16x32xf32> to vector<16x32xf32>
    %cst_41 = arith.constant dense<0.000000e+00> : vector<32x32xf32>
    %40 = tpu.matmul %22, %39, %cst_41 {dimension_numbers = #tpu.dot_dimension_numbers<[1], [0], [0], [1], [0, 0, 1, 1], [], []>} : vector<32x16xf32>, vector<16x32xf32>, vector<32x32xf32> -> vector<32x32xf32>
    %cst_42 = arith.constant dense<0.000000e+00> : vector<32x32xf32>
    %41 = tpu.matmul %37, %40, %cst_42 {dimension_numbers = #tpu.dot_dimension_numbers<[1], [0], [0], [1], [0, 0, 1, 1], [], []>} : vector<32x32xf32>, vector<32x32xf32>, vector<32x32xf32> -> vector<32x32xf32>
    %42 = arith.addf %35, %41 : vector<32x32xf32>
    %c3_43 = arith.constant 3 : index
    %c0_44 = arith.constant 0 : index
    %c0_45 = arith.constant 0 : index
    %43 = vector.load %arg5[%c3_43, %c0_44, %c0_45] : memref<9x32x32xf32, #tpu.memory_space<vmem>>, vector<1x32x32xf32>
    %44 = vector.shape_cast %43 : vector<1x32x32xf32> to vector<32x32xf32>
    %c3_46 = arith.constant 3 : index
    %c0_47 = arith.constant 0 : index
    %c0_48 = arith.constant 0 : index
    %45 = vector.load %arg6[%c3_46, %c0_47, %c0_48] : memref<9x16x32xf32, #tpu.memory_space<vmem>>, vector<1x16x32xf32>
    %46 = vector.shape_cast %45 : vector<1x16x32xf32> to vector<16x32xf32>
    %cst_49 = arith.constant dense<0.000000e+00> : vector<32x32xf32>
    %47 = tpu.matmul %22, %46, %cst_49 {dimension_numbers = #tpu.dot_dimension_numbers<[1], [0], [0], [1], [0, 0, 1, 1], [], []>} : vector<32x16xf32>, vector<16x32xf32>, vector<32x32xf32> -> vector<32x32xf32>
    %cst_50 = arith.constant dense<0.000000e+00> : vector<32x32xf32>
    %48 = tpu.matmul %44, %47, %cst_50 {dimension_numbers = #tpu.dot_dimension_numbers<[1], [0], [0], [1], [0, 0, 1, 1], [], []>} : vector<32x32xf32>, vector<32x32xf32>, vector<32x32xf32> -> vector<32x32xf32>
    %49 = arith.addf %42, %48 : vector<32x32xf32>
    %c4 = arith.constant 4 : index
    %c0_51 = arith.constant 0 : index
    %c0_52 = arith.constant 0 : index
    %50 = vector.load %arg5[%c4, %c0_51, %c0_52] : memref<9x32x32xf32, #tpu.memory_space<vmem>>, vector<1x32x32xf32>
    %51 = vector.shape_cast %50 : vector<1x32x32xf32> to vector<32x32xf32>
    %c4_53 = arith.constant 4 : index
    %c0_54 = arith.constant 0 : index
    %c0_55 = arith.constant 0 : index
    %52 = vector.load %arg6[%c4_53, %c0_54, %c0_55] : memref<9x16x32xf32, #tpu.memory_space<vmem>>, vector<1x16x32xf32>
    %53 = vector.shape_cast %52 : vector<1x16x32xf32> to vector<16x32xf32>
    %cst_56 = arith.constant dense<0.000000e+00> : vector<32x32xf32>
    %54 = tpu.matmul %22, %53, %cst_56 {dimension_numbers = #tpu.dot_dimension_numbers<[1], [0], [0], [1], [0, 0, 1, 1], [], []>} : vector<32x16xf32>, vector<16x32xf32>, vector<32x32xf32> -> vector<32x32xf32>
    %cst_57 = arith.constant dense<0.000000e+00> : vector<32x32xf32>
    %55 = tpu.matmul %51, %54, %cst_57 {dimension_numbers = #tpu.dot_dimension_numbers<[1], [0], [0], [1], [0, 0, 1, 1], [], []>} : vector<32x32xf32>, vector<32x32xf32>, vector<32x32xf32> -> vector<32x32xf32>
    %56 = arith.addf %49, %55 : vector<32x32xf32>
    %c5 = arith.constant 5 : index
    %c0_58 = arith.constant 0 : index
    %c0_59 = arith.constant 0 : index
    %57 = vector.load %arg5[%c5, %c0_58, %c0_59] : memref<9x32x32xf32, #tpu.memory_space<vmem>>, vector<1x32x32xf32>
    %58 = vector.shape_cast %57 : vector<1x32x32xf32> to vector<32x32xf32>
    %c5_60 = arith.constant 5 : index
    %c0_61 = arith.constant 0 : index
    %c0_62 = arith.constant 0 : index
    %59 = vector.load %arg6[%c5_60, %c0_61, %c0_62] : memref<9x16x32xf32, #tpu.memory_space<vmem>>, vector<1x16x32xf32>
    %60 = vector.shape_cast %59 : vector<1x16x32xf32> to vector<16x32xf32>
    %cst_63 = arith.constant dense<0.000000e+00> : vector<32x32xf32>
    %61 = tpu.matmul %22, %60, %cst_63 {dimension_numbers = #tpu.dot_dimension_numbers<[1], [0], [0], [1], [0, 0, 1, 1], [], []>} : vector<32x16xf32>, vector<16x32xf32>, vector<32x32xf32> -> vector<32x32xf32>
    %cst_64 = arith.constant dense<0.000000e+00> : vector<32x32xf32>
    %62 = tpu.matmul %58, %61, %cst_64 {dimension_numbers = #tpu.dot_dimension_numbers<[1], [0], [0], [1], [0, 0, 1, 1], [], []>} : vector<32x32xf32>, vector<32x32xf32>, vector<32x32xf32> -> vector<32x32xf32>
    %63 = arith.addf %56, %62 : vector<32x32xf32>
    %c6 = arith.constant 6 : index
    %c0_65 = arith.constant 0 : index
    %c0_66 = arith.constant 0 : index
    %64 = vector.load %arg5[%c6, %c0_65, %c0_66] : memref<9x32x32xf32, #tpu.memory_space<vmem>>, vector<1x32x32xf32>
    %65 = vector.shape_cast %64 : vector<1x32x32xf32> to vector<32x32xf32>
    %c6_67 = arith.constant 6 : index
    %c0_68 = arith.constant 0 : index
    %c0_69 = arith.constant 0 : index
    %66 = vector.load %arg6[%c6_67, %c0_68, %c0_69] : memref<9x16x32xf32, #tpu.memory_space<vmem>>, vector<1x16x32xf32>
    %67 = vector.shape_cast %66 : vector<1x16x32xf32> to vector<16x32xf32>
    %cst_70 = arith.constant dense<0.000000e+00> : vector<32x32xf32>
    %68 = tpu.matmul %22, %67, %cst_70 {dimension_numbers = #tpu.dot_dimension_numbers<[1], [0], [0], [1], [0, 0, 1, 1], [], []>} : vector<32x16xf32>, vector<16x32xf32>, vector<32x32xf32> -> vector<32x32xf32>
    %cst_71 = arith.constant dense<0.000000e+00> : vector<32x32xf32>
    %69 = tpu.matmul %65, %68, %cst_71 {dimension_numbers = #tpu.dot_dimension_numbers<[1], [0], [0], [1], [0, 0, 1, 1], [], []>} : vector<32x32xf32>, vector<32x32xf32>, vector<32x32xf32> -> vector<32x32xf32>
    %70 = arith.addf %63, %69 : vector<32x32xf32>
    %c7 = arith.constant 7 : index
    %c0_72 = arith.constant 0 : index
    %c0_73 = arith.constant 0 : index
    %71 = vector.load %arg5[%c7, %c0_72, %c0_73] : memref<9x32x32xf32, #tpu.memory_space<vmem>>, vector<1x32x32xf32>
    %72 = vector.shape_cast %71 : vector<1x32x32xf32> to vector<32x32xf32>
    %c7_74 = arith.constant 7 : index
    %c0_75 = arith.constant 0 : index
    %c0_76 = arith.constant 0 : index
    %73 = vector.load %arg6[%c7_74, %c0_75, %c0_76] : memref<9x16x32xf32, #tpu.memory_space<vmem>>, vector<1x16x32xf32>
    %74 = vector.shape_cast %73 : vector<1x16x32xf32> to vector<16x32xf32>
    %cst_77 = arith.constant dense<0.000000e+00> : vector<32x32xf32>
    %75 = tpu.matmul %22, %74, %cst_77 {dimension_numbers = #tpu.dot_dimension_numbers<[1], [0], [0], [1], [0, 0, 1, 1], [], []>} : vector<32x16xf32>, vector<16x32xf32>, vector<32x32xf32> -> vector<32x32xf32>
    %cst_78 = arith.constant dense<0.000000e+00> : vector<32x32xf32>
    %76 = tpu.matmul %72, %75, %cst_78 {dimension_numbers = #tpu.dot_dimension_numbers<[1], [0], [0], [1], [0, 0, 1, 1], [], []>} : vector<32x32xf32>, vector<32x32xf32>, vector<32x32xf32> -> vector<32x32xf32>
    %77 = arith.addf %70, %76 : vector<32x32xf32>
    %c8 = arith.constant 8 : index
    %c0_79 = arith.constant 0 : index
    %c0_80 = arith.constant 0 : index
    %78 = vector.load %arg5[%c8, %c0_79, %c0_80] : memref<9x32x32xf32, #tpu.memory_space<vmem>>, vector<1x32x32xf32>
    %79 = vector.shape_cast %78 : vector<1x32x32xf32> to vector<32x32xf32>
    %c8_81 = arith.constant 8 : index
    %c0_82 = arith.constant 0 : index
    %c0_83 = arith.constant 0 : index
    %80 = vector.load %arg6[%c8_81, %c0_82, %c0_83] : memref<9x16x32xf32, #tpu.memory_space<vmem>>, vector<1x16x32xf32>
    %81 = vector.shape_cast %80 : vector<1x16x32xf32> to vector<16x32xf32>
    %cst_84 = arith.constant dense<0.000000e+00> : vector<32x32xf32>
    %82 = tpu.matmul %22, %81, %cst_84 {dimension_numbers = #tpu.dot_dimension_numbers<[1], [0], [0], [1], [0, 0, 1, 1], [], []>} : vector<32x16xf32>, vector<16x32xf32>, vector<32x32xf32> -> vector<32x32xf32>
    %cst_85 = arith.constant dense<0.000000e+00> : vector<32x32xf32>
    %83 = tpu.matmul %79, %82, %cst_85 {dimension_numbers = #tpu.dot_dimension_numbers<[1], [0], [0], [1], [0, 0, 1, 1], [], []>} : vector<32x32xf32>, vector<32x32xf32>, vector<32x32xf32> -> vector<32x32xf32>
    %84 = arith.addf %77, %83 : vector<32x32xf32>
    %c0_86 = arith.constant 0 : index
    %c0_87 = arith.constant 0 : index
    %85 = vector.load %arg7[%c0_86, %c0_87] : memref<1x32xf32, #tpu.memory_space<vmem>>, vector<1x32xf32>
    %86 = vector.broadcast %85 : vector<1x32xf32> to vector<32x32xf32>
    %87 = arith.addf %84, %86 : vector<32x32xf32>
    %cst_88 = arith.constant 0.000000e+00 : f32
    %88 = vector.broadcast %cst_88 : f32 to vector<32x32xf32>
    %89 = arith.maximumf %87, %88 : vector<32x32xf32>
    %c0_89 = arith.constant 0 : index
    %c0_90 = arith.constant 0 : index
    %c0_91 = arith.constant 0 : index
    %90 = vector.load %arg8[%c0_89, %c0_90, %c0_91] : memref<4x8x32xf32, #tpu.memory_space<vmem>>, vector<1x8x32xf32>
    %91 = vector.shape_cast %90 : vector<1x8x32xf32> to vector<8x32xf32>
    %cst_92 = arith.constant dense<0.000000e+00> : vector<8x32xf32>
    %92 = tpu.matmul %91, %89, %cst_92 {dimension_numbers = #tpu.dot_dimension_numbers<[1], [0], [0], [1], [0, 0, 1, 1], [], []>} : vector<8x32xf32>, vector<32x32xf32>, vector<8x32xf32> -> vector<8x32xf32>
    %c1_93 = arith.constant 1 : index
    %c0_94 = arith.constant 0 : index
    %c0_95 = arith.constant 0 : index
    %93 = vector.load %arg8[%c1_93, %c0_94, %c0_95] : memref<4x8x32xf32, #tpu.memory_space<vmem>>, vector<1x8x32xf32>
    %94 = vector.shape_cast %93 : vector<1x8x32xf32> to vector<8x32xf32>
    %cst_96 = arith.constant dense<0.000000e+00> : vector<8x32xf32>
    %95 = tpu.matmul %94, %89, %cst_96 {dimension_numbers = #tpu.dot_dimension_numbers<[1], [0], [0], [1], [0, 0, 1, 1], [], []>} : vector<8x32xf32>, vector<32x32xf32>, vector<8x32xf32> -> vector<8x32xf32>
    %96 = arith.maximumf %92, %95 : vector<8x32xf32>
    %c2_97 = arith.constant 2 : index
    %c0_98 = arith.constant 0 : index
    %c0_99 = arith.constant 0 : index
    %97 = vector.load %arg8[%c2_97, %c0_98, %c0_99] : memref<4x8x32xf32, #tpu.memory_space<vmem>>, vector<1x8x32xf32>
    %98 = vector.shape_cast %97 : vector<1x8x32xf32> to vector<8x32xf32>
    %cst_100 = arith.constant dense<0.000000e+00> : vector<8x32xf32>
    %99 = tpu.matmul %98, %89, %cst_100 {dimension_numbers = #tpu.dot_dimension_numbers<[1], [0], [0], [1], [0, 0, 1, 1], [], []>} : vector<8x32xf32>, vector<32x32xf32>, vector<8x32xf32> -> vector<8x32xf32>
    %100 = arith.maximumf %96, %99 : vector<8x32xf32>
    %c3_101 = arith.constant 3 : index
    %c0_102 = arith.constant 0 : index
    %c0_103 = arith.constant 0 : index
    %101 = vector.load %arg8[%c3_101, %c0_102, %c0_103] : memref<4x8x32xf32, #tpu.memory_space<vmem>>, vector<1x8x32xf32>
    %102 = vector.shape_cast %101 : vector<1x8x32xf32> to vector<8x32xf32>
    %cst_104 = arith.constant dense<0.000000e+00> : vector<8x32xf32>
    %103 = tpu.matmul %102, %89, %cst_104 {dimension_numbers = #tpu.dot_dimension_numbers<[1], [0], [0], [1], [0, 0, 1, 1], [], []>} : vector<8x32xf32>, vector<32x32xf32>, vector<8x32xf32> -> vector<8x32xf32>
    %104 = arith.maximumf %100, %103 : vector<8x32xf32>
    %c0_105 = arith.constant 0 : index
    %c0_106 = arith.constant 0 : index
    %c0_107 = arith.constant 0 : index
    %105 = vector.load %arg9[%c0_105, %c0_106, %c0_107] : memref<9x8x8xf32, #tpu.memory_space<vmem>>, vector<1x8x8xf32>
    %106 = vector.shape_cast %105 : vector<1x8x8xf32> to vector<8x8xf32>
    %c0_108 = arith.constant 0 : index
    %c0_109 = arith.constant 0 : index
    %c0_110 = arith.constant 0 : index
    %107 = vector.load %arg10[%c0_108, %c0_109, %c0_110] : memref<9x32x64xf32, #tpu.memory_space<vmem>>, vector<1x32x64xf32>
    %108 = vector.shape_cast %107 : vector<1x32x64xf32> to vector<32x64xf32>
    %cst_111 = arith.constant dense<0.000000e+00> : vector<8x64xf32>
    %109 = tpu.matmul %104, %108, %cst_111 {dimension_numbers = #tpu.dot_dimension_numbers<[1], [0], [0], [1], [0, 0, 1, 1], [], []>} : vector<8x32xf32>, vector<32x64xf32>, vector<8x64xf32> -> vector<8x64xf32>
    %cst_112 = arith.constant dense<0.000000e+00> : vector<8x64xf32>
    %110 = tpu.matmul %106, %109, %cst_112 {dimension_numbers = #tpu.dot_dimension_numbers<[1], [0], [0], [1], [0, 0, 1, 1], [], []>} : vector<8x8xf32>, vector<8x64xf32>, vector<8x64xf32> -> vector<8x64xf32>
    %c1_113 = arith.constant 1 : index
    %c0_114 = arith.constant 0 : index
    %c0_115 = arith.constant 0 : index
    %111 = vector.load %arg9[%c1_113, %c0_114, %c0_115] : memref<9x8x8xf32, #tpu.memory_space<vmem>>, vector<1x8x8xf32>
    %112 = vector.shape_cast %111 : vector<1x8x8xf32> to vector<8x8xf32>
    %c1_116 = arith.constant 1 : index
    %c0_117 = arith.constant 0 : index
    %c0_118 = arith.constant 0 : index
    %113 = vector.load %arg10[%c1_116, %c0_117, %c0_118] : memref<9x32x64xf32, #tpu.memory_space<vmem>>, vector<1x32x64xf32>
    %114 = vector.shape_cast %113 : vector<1x32x64xf32> to vector<32x64xf32>
    %cst_119 = arith.constant dense<0.000000e+00> : vector<8x64xf32>
    %115 = tpu.matmul %104, %114, %cst_119 {dimension_numbers = #tpu.dot_dimension_numbers<[1], [0], [0], [1], [0, 0, 1, 1], [], []>} : vector<8x32xf32>, vector<32x64xf32>, vector<8x64xf32> -> vector<8x64xf32>
    %cst_120 = arith.constant dense<0.000000e+00> : vector<8x64xf32>
    %116 = tpu.matmul %112, %115, %cst_120 {dimension_numbers = #tpu.dot_dimension_numbers<[1], [0], [0], [1], [0, 0, 1, 1], [], []>} : vector<8x8xf32>, vector<8x64xf32>, vector<8x64xf32> -> vector<8x64xf32>
    %117 = arith.addf %110, %116 : vector<8x64xf32>
    %c2_121 = arith.constant 2 : index
    %c0_122 = arith.constant 0 : index
    %c0_123 = arith.constant 0 : index
    %118 = vector.load %arg9[%c2_121, %c0_122, %c0_123] : memref<9x8x8xf32, #tpu.memory_space<vmem>>, vector<1x8x8xf32>
    %119 = vector.shape_cast %118 : vector<1x8x8xf32> to vector<8x8xf32>
    %c2_124 = arith.constant 2 : index
    %c0_125 = arith.constant 0 : index
    %c0_126 = arith.constant 0 : index
    %120 = vector.load %arg10[%c2_124, %c0_125, %c0_126] : memref<9x32x64xf32, #tpu.memory_space<vmem>>, vector<1x32x64xf32>
    %121 = vector.shape_cast %120 : vector<1x32x64xf32> to vector<32x64xf32>
    %cst_127 = arith.constant dense<0.000000e+00> : vector<8x64xf32>
    %122 = tpu.matmul %104, %121, %cst_127 {dimension_numbers = #tpu.dot_dimension_numbers<[1], [0], [0], [1], [0, 0, 1, 1], [], []>} : vector<8x32xf32>, vector<32x64xf32>, vector<8x64xf32> -> vector<8x64xf32>
    %cst_128 = arith.constant dense<0.000000e+00> : vector<8x64xf32>
    %123 = tpu.matmul %119, %122, %cst_128 {dimension_numbers = #tpu.dot_dimension_numbers<[1], [0], [0], [1], [0, 0, 1, 1], [], []>} : vector<8x8xf32>, vector<8x64xf32>, vector<8x64xf32> -> vector<8x64xf32>
    %124 = arith.addf %117, %123 : vector<8x64xf32>
    %c3_129 = arith.constant 3 : index
    %c0_130 = arith.constant 0 : index
    %c0_131 = arith.constant 0 : index
    %125 = vector.load %arg9[%c3_129, %c0_130, %c0_131] : memref<9x8x8xf32, #tpu.memory_space<vmem>>, vector<1x8x8xf32>
    %126 = vector.shape_cast %125 : vector<1x8x8xf32> to vector<8x8xf32>
    %c3_132 = arith.constant 3 : index
    %c0_133 = arith.constant 0 : index
    %c0_134 = arith.constant 0 : index
    %127 = vector.load %arg10[%c3_132, %c0_133, %c0_134] : memref<9x32x64xf32, #tpu.memory_space<vmem>>, vector<1x32x64xf32>
    %128 = vector.shape_cast %127 : vector<1x32x64xf32> to vector<32x64xf32>
    %cst_135 = arith.constant dense<0.000000e+00> : vector<8x64xf32>
    %129 = tpu.matmul %104, %128, %cst_135 {dimension_numbers = #tpu.dot_dimension_numbers<[1], [0], [0], [1], [0, 0, 1, 1], [], []>} : vector<8x32xf32>, vector<32x64xf32>, vector<8x64xf32> -> vector<8x64xf32>
    %cst_136 = arith.constant dense<0.000000e+00> : vector<8x64xf32>
    %130 = tpu.matmul %126, %129, %cst_136 {dimension_numbers = #tpu.dot_dimension_numbers<[1], [0], [0], [1], [0, 0, 1, 1], [], []>} : vector<8x8xf32>, vector<8x64xf32>, vector<8x64xf32> -> vector<8x64xf32>
    %131 = arith.addf %124, %130 : vector<8x64xf32>
    %c4_137 = arith.constant 4 : index
    %c0_138 = arith.constant 0 : index
    %c0_139 = arith.constant 0 : index
    %132 = vector.load %arg9[%c4_137, %c0_138, %c0_139] : memref<9x8x8xf32, #tpu.memory_space<vmem>>, vector<1x8x8xf32>
    %133 = vector.shape_cast %132 : vector<1x8x8xf32> to vector<8x8xf32>
    %c4_140 = arith.constant 4 : index
    %c0_141 = arith.constant 0 : index
    %c0_142 = arith.constant 0 : index
    %134 = vector.load %arg10[%c4_140, %c0_141, %c0_142] : memref<9x32x64xf32, #tpu.memory_space<vmem>>, vector<1x32x64xf32>
    %135 = vector.shape_cast %134 : vector<1x32x64xf32> to vector<32x64xf32>
    %cst_143 = arith.constant dense<0.000000e+00> : vector<8x64xf32>
    %136 = tpu.matmul %104, %135, %cst_143 {dimension_numbers = #tpu.dot_dimension_numbers<[1], [0], [0], [1], [0, 0, 1, 1], [], []>} : vector<8x32xf32>, vector<32x64xf32>, vector<8x64xf32> -> vector<8x64xf32>
    %cst_144 = arith.constant dense<0.000000e+00> : vector<8x64xf32>
    %137 = tpu.matmul %133, %136, %cst_144 {dimension_numbers = #tpu.dot_dimension_numbers<[1], [0], [0], [1], [0, 0, 1, 1], [], []>} : vector<8x8xf32>, vector<8x64xf32>, vector<8x64xf32> -> vector<8x64xf32>
    %138 = arith.addf %131, %137 : vector<8x64xf32>
    %c5_145 = arith.constant 5 : index
    %c0_146 = arith.constant 0 : index
    %c0_147 = arith.constant 0 : index
    %139 = vector.load %arg9[%c5_145, %c0_146, %c0_147] : memref<9x8x8xf32, #tpu.memory_space<vmem>>, vector<1x8x8xf32>
    %140 = vector.shape_cast %139 : vector<1x8x8xf32> to vector<8x8xf32>
    %c5_148 = arith.constant 5 : index
    %c0_149 = arith.constant 0 : index
    %c0_150 = arith.constant 0 : index
    %141 = vector.load %arg10[%c5_148, %c0_149, %c0_150] : memref<9x32x64xf32, #tpu.memory_space<vmem>>, vector<1x32x64xf32>
    %142 = vector.shape_cast %141 : vector<1x32x64xf32> to vector<32x64xf32>
    %cst_151 = arith.constant dense<0.000000e+00> : vector<8x64xf32>
    %143 = tpu.matmul %104, %142, %cst_151 {dimension_numbers = #tpu.dot_dimension_numbers<[1], [0], [0], [1], [0, 0, 1, 1], [], []>} : vector<8x32xf32>, vector<32x64xf32>, vector<8x64xf32> -> vector<8x64xf32>
    %cst_152 = arith.constant dense<0.000000e+00> : vector<8x64xf32>
    %144 = tpu.matmul %140, %143, %cst_152 {dimension_numbers = #tpu.dot_dimension_numbers<[1], [0], [0], [1], [0, 0, 1, 1], [], []>} : vector<8x8xf32>, vector<8x64xf32>, vector<8x64xf32> -> vector<8x64xf32>
    %145 = arith.addf %138, %144 : vector<8x64xf32>
    %c6_153 = arith.constant 6 : index
    %c0_154 = arith.constant 0 : index
    %c0_155 = arith.constant 0 : index
    %146 = vector.load %arg9[%c6_153, %c0_154, %c0_155] : memref<9x8x8xf32, #tpu.memory_space<vmem>>, vector<1x8x8xf32>
    %147 = vector.shape_cast %146 : vector<1x8x8xf32> to vector<8x8xf32>
    %c6_156 = arith.constant 6 : index
    %c0_157 = arith.constant 0 : index
    %c0_158 = arith.constant 0 : index
    %148 = vector.load %arg10[%c6_156, %c0_157, %c0_158] : memref<9x32x64xf32, #tpu.memory_space<vmem>>, vector<1x32x64xf32>
    %149 = vector.shape_cast %148 : vector<1x32x64xf32> to vector<32x64xf32>
    %cst_159 = arith.constant dense<0.000000e+00> : vector<8x64xf32>
    %150 = tpu.matmul %104, %149, %cst_159 {dimension_numbers = #tpu.dot_dimension_numbers<[1], [0], [0], [1], [0, 0, 1, 1], [], []>} : vector<8x32xf32>, vector<32x64xf32>, vector<8x64xf32> -> vector<8x64xf32>
    %cst_160 = arith.constant dense<0.000000e+00> : vector<8x64xf32>
    %151 = tpu.matmul %147, %150, %cst_160 {dimension_numbers = #tpu.dot_dimension_numbers<[1], [0], [0], [1], [0, 0, 1, 1], [], []>} : vector<8x8xf32>, vector<8x64xf32>, vector<8x64xf32> -> vector<8x64xf32>
    %152 = arith.addf %145, %151 : vector<8x64xf32>
    %c7_161 = arith.constant 7 : index
    %c0_162 = arith.constant 0 : index
    %c0_163 = arith.constant 0 : index
    %153 = vector.load %arg9[%c7_161, %c0_162, %c0_163] : memref<9x8x8xf32, #tpu.memory_space<vmem>>, vector<1x8x8xf32>
    %154 = vector.shape_cast %153 : vector<1x8x8xf32> to vector<8x8xf32>
    %c7_164 = arith.constant 7 : index
    %c0_165 = arith.constant 0 : index
    %c0_166 = arith.constant 0 : index
    %155 = vector.load %arg10[%c7_164, %c0_165, %c0_166] : memref<9x32x64xf32, #tpu.memory_space<vmem>>, vector<1x32x64xf32>
    %156 = vector.shape_cast %155 : vector<1x32x64xf32> to vector<32x64xf32>
    %cst_167 = arith.constant dense<0.000000e+00> : vector<8x64xf32>
    %157 = tpu.matmul %104, %156, %cst_167 {dimension_numbers = #tpu.dot_dimension_numbers<[1], [0], [0], [1], [0, 0, 1, 1], [], []>} : vector<8x32xf32>, vector<32x64xf32>, vector<8x64xf32> -> vector<8x64xf32>
    %cst_168 = arith.constant dense<0.000000e+00> : vector<8x64xf32>
    %158 = tpu.matmul %154, %157, %cst_168 {dimension_numbers = #tpu.dot_dimension_numbers<[1], [0], [0], [1], [0, 0, 1, 1], [], []>} : vector<8x8xf32>, vector<8x64xf32>, vector<8x64xf32> -> vector<8x64xf32>
    %159 = arith.addf %152, %158 : vector<8x64xf32>
    %c8_169 = arith.constant 8 : index
    %c0_170 = arith.constant 0 : index
    %c0_171 = arith.constant 0 : index
    %160 = vector.load %arg9[%c8_169, %c0_170, %c0_171] : memref<9x8x8xf32, #tpu.memory_space<vmem>>, vector<1x8x8xf32>
    %161 = vector.shape_cast %160 : vector<1x8x8xf32> to vector<8x8xf32>
    %c8_172 = arith.constant 8 : index
    %c0_173 = arith.constant 0 : index
    %c0_174 = arith.constant 0 : index
    %162 = vector.load %arg10[%c8_172, %c0_173, %c0_174] : memref<9x32x64xf32, #tpu.memory_space<vmem>>, vector<1x32x64xf32>
    %163 = vector.shape_cast %162 : vector<1x32x64xf32> to vector<32x64xf32>
    %cst_175 = arith.constant dense<0.000000e+00> : vector<8x64xf32>
    %164 = tpu.matmul %104, %163, %cst_175 {dimension_numbers = #tpu.dot_dimension_numbers<[1], [0], [0], [1], [0, 0, 1, 1], [], []>} : vector<8x32xf32>, vector<32x64xf32>, vector<8x64xf32> -> vector<8x64xf32>
    %cst_176 = arith.constant dense<0.000000e+00> : vector<8x64xf32>
    %165 = tpu.matmul %161, %164, %cst_176 {dimension_numbers = #tpu.dot_dimension_numbers<[1], [0], [0], [1], [0, 0, 1, 1], [], []>} : vector<8x8xf32>, vector<8x64xf32>, vector<8x64xf32> -> vector<8x64xf32>
    %166 = arith.addf %159, %165 : vector<8x64xf32>
    %c0_177 = arith.constant 0 : index
    %c0_178 = arith.constant 0 : index
    %167 = vector.load %arg11[%c0_177, %c0_178] : memref<1x64xf32, #tpu.memory_space<vmem>>, vector<1x64xf32>
    %168 = vector.broadcast %167 : vector<1x64xf32> to vector<8x64xf32>
    %169 = arith.addf %166, %168 : vector<8x64xf32>
    %cst_179 = arith.constant 0.000000e+00 : f32
    %170 = vector.broadcast %cst_179 : f32 to vector<8x64xf32>
    %171 = arith.maximumf %169, %170 : vector<8x64xf32>
    %c0_180 = arith.constant 0 : index
    %c0_181 = arith.constant 0 : index
    %c0_182 = arith.constant 0 : index
    %172 = vector.load %arg12[%c0_180, %c0_181, %c0_182] : memref<4x2x8xf32, #tpu.memory_space<vmem>>, vector<1x2x8xf32>
    %173 = vector.shape_cast %172 : vector<1x2x8xf32> to vector<2x8xf32>
    %cst_183 = arith.constant dense<0.000000e+00> : vector<2x64xf32>
    %174 = tpu.matmul %173, %171, %cst_183 {dimension_numbers = #tpu.dot_dimension_numbers<[1], [0], [0], [1], [0, 0, 1, 1], [], []>} : vector<2x8xf32>, vector<8x64xf32>, vector<2x64xf32> -> vector<2x64xf32>
    %c1_184 = arith.constant 1 : index
    %c0_185 = arith.constant 0 : index
    %c0_186 = arith.constant 0 : index
    %175 = vector.load %arg12[%c1_184, %c0_185, %c0_186] : memref<4x2x8xf32, #tpu.memory_space<vmem>>, vector<1x2x8xf32>
    %176 = vector.shape_cast %175 : vector<1x2x8xf32> to vector<2x8xf32>
    %cst_187 = arith.constant dense<0.000000e+00> : vector<2x64xf32>
    %177 = tpu.matmul %176, %171, %cst_187 {dimension_numbers = #tpu.dot_dimension_numbers<[1], [0], [0], [1], [0, 0, 1, 1], [], []>} : vector<2x8xf32>, vector<8x64xf32>, vector<2x64xf32> -> vector<2x64xf32>
    %178 = arith.maximumf %174, %177 : vector<2x64xf32>
    %c2_188 = arith.constant 2 : index
    %c0_189 = arith.constant 0 : index
    %c0_190 = arith.constant 0 : index
    %179 = vector.load %arg12[%c2_188, %c0_189, %c0_190] : memref<4x2x8xf32, #tpu.memory_space<vmem>>, vector<1x2x8xf32>
    %180 = vector.shape_cast %179 : vector<1x2x8xf32> to vector<2x8xf32>
    %cst_191 = arith.constant dense<0.000000e+00> : vector<2x64xf32>
    %181 = tpu.matmul %180, %171, %cst_191 {dimension_numbers = #tpu.dot_dimension_numbers<[1], [0], [0], [1], [0, 0, 1, 1], [], []>} : vector<2x8xf32>, vector<8x64xf32>, vector<2x64xf32> -> vector<2x64xf32>
    %182 = arith.maximumf %178, %181 : vector<2x64xf32>
    %c3_192 = arith.constant 3 : index
    %c0_193 = arith.constant 0 : index
    %c0_194 = arith.constant 0 : index
    %183 = vector.load %arg12[%c3_192, %c0_193, %c0_194] : memref<4x2x8xf32, #tpu.memory_space<vmem>>, vector<1x2x8xf32>
    %184 = vector.shape_cast %183 : vector<1x2x8xf32> to vector<2x8xf32>
    %cst_195 = arith.constant dense<0.000000e+00> : vector<2x64xf32>
    %185 = tpu.matmul %184, %171, %cst_195 {dimension_numbers = #tpu.dot_dimension_numbers<[1], [0], [0], [1], [0, 0, 1, 1], [], []>} : vector<2x8xf32>, vector<8x64xf32>, vector<2x64xf32> -> vector<2x64xf32>
    %186 = arith.maximumf %182, %185 : vector<2x64xf32>
    %187 = arith.truncf %186 : vector<2x64xf32> to vector<2x64xbf16>
    %c0_196 = arith.constant 0 : index
    %c0_197 = arith.constant 0 : index
    %188 = vector.load %arg13[%c0_196, %c0_197] : memref<64x256xbf16, #tpu.memory_space<vmem>>, vector<64x256xbf16>
    %cst_198 = arith.constant dense<0.000000e+00> : vector<2x256xf32>
    %189 = tpu.matmul %187, %188, %cst_198 {dimension_numbers = #tpu.dot_dimension_numbers<[1], [0], [0], [1], [0, 0, 1, 1], [], []>} : vector<2x64xbf16>, vector<64x256xbf16>, vector<2x256xf32> -> vector<2x256xf32>
    %c0_199 = arith.constant 0 : index
    %c0_200 = arith.constant 0 : index
    %190 = vector.load %arg1[%c0_199, %c0_200] : memref<2x3xf32, #tpu.memory_space<vmem>>, vector<2x3xf32>
    %c0_201 = arith.constant 0 : index
    %c0_202 = arith.constant 0 : index
    %191 = vector.load %arg14[%c0_201, %c0_202] : memref<3x256xf32, #tpu.memory_space<vmem>>, vector<3x256xf32>
    %cst_203 = arith.constant dense<0.000000e+00> : vector<2x256xf32>
    %192 = tpu.matmul %190, %191, %cst_203 {dimension_numbers = #tpu.dot_dimension_numbers<[1], [0], [0], [1], [0, 0, 1, 1], [], []>} : vector<2x3xf32>, vector<3x256xf32>, vector<2x256xf32> -> vector<2x256xf32>
    %193 = arith.addf %189, %192 : vector<2x256xf32>
    %c0_204 = arith.constant 0 : index
    %c0_205 = arith.constant 0 : index
    %194 = vector.load %arg15[%c0_204, %c0_205] : memref<1x256xf32, #tpu.memory_space<vmem>>, vector<1x256xf32>
    %195 = vector.broadcast %194 : vector<1x256xf32> to vector<2x256xf32>
    %196 = arith.addf %193, %195 : vector<2x256xf32>
    %cst_206 = arith.constant 0.000000e+00 : f32
    %197 = vector.broadcast %cst_206 : f32 to vector<2x256xf32>
    %198 = arith.maximumf %196, %197 : vector<2x256xf32>
    %199 = arith.truncf %198 : vector<2x256xf32> to vector<2x256xbf16>
    %c0_207 = arith.constant 0 : index
    %c0_208 = arith.constant 0 : index
    %200 = vector.load %arg16[%c0_207, %c0_208] : memref<256x512xbf16, #tpu.memory_space<vmem>>, vector<256x512xbf16>
    %cst_209 = arith.constant dense<0.000000e+00> : vector<2x512xf32>
    %201 = tpu.matmul %199, %200, %cst_209 {dimension_numbers = #tpu.dot_dimension_numbers<[1], [0], [0], [1], [0, 0, 1, 1], [], []>} : vector<2x256xbf16>, vector<256x512xbf16>, vector<2x512xf32> -> vector<2x512xf32>
    %c0_210 = arith.constant 0 : index
    %c0_211 = arith.constant 0 : index
    %202 = vector.load %arg17[%c0_210, %c0_211] : memref<1x512xf32, #tpu.memory_space<vmem>>, vector<1x512xf32>
    %203 = vector.broadcast %202 : vector<1x512xf32> to vector<2x512xf32>
    %204 = arith.addf %201, %203 : vector<2x512xf32>
    %cst_212 = arith.constant 0.000000e+00 : f32
    %205 = vector.broadcast %cst_212 : f32 to vector<2x512xf32>
    %206 = arith.maximumf %204, %205 : vector<2x512xf32>
    %207 = arith.truncf %206 : vector<2x512xf32> to vector<2x512xbf16>
    %c0_213 = arith.constant 0 : index
    %c0_214 = arith.constant 0 : index
    %208 = vector.load %arg18[%c0_213, %c0_214] : memref<512x1536xbf16, #tpu.memory_space<vmem>>, vector<512x1536xbf16>
    %cst_215 = arith.constant dense<0.000000e+00> : vector<2x1536xf32>
    %209 = tpu.matmul %207, %208, %cst_215 {dimension_numbers = #tpu.dot_dimension_numbers<[1], [0], [0], [1], [0, 0, 1, 1], [], []>} : vector<2x512xbf16>, vector<512x1536xbf16>, vector<2x1536xf32> -> vector<2x1536xf32>
    %c0_216 = arith.constant 0 : index
    %c0_217 = arith.constant 0 : index
    %210 = vector.load %arg19[%c0_216, %c0_217] : memref<1x1536xf32, #tpu.memory_space<vmem>>, vector<1x1536xf32>
    %211 = vector.broadcast %210 : vector<1x1536xf32> to vector<2x1536xf32>
    %212 = arith.addf %209, %211 : vector<2x1536xf32>
    %213 = vector.extract_strided_slice %212 {offsets = [0, 0], sizes = [2, 512], strides = [1, 1]} : vector<2x1536xf32> to vector<2x512xf32>
    %214 = arith.negf %213 : vector<2x512xf32>
    %215 = math.exp %214 : vector<2x512xf32>
    %cst_218 = arith.constant 1.000000e+00 : f32
    %216 = vector.broadcast %cst_218 : f32 to vector<2x512xf32>
    %217 = arith.addf %216, %215 : vector<2x512xf32>
    %218 = arith.divf %216, %217 : vector<2x512xf32>
    %219 = vector.extract_strided_slice %212 {offsets = [0, 512], sizes = [2, 512], strides = [1, 1]} : vector<2x1536xf32> to vector<2x512xf32>
    %220 = math.tanh %219 : vector<2x512xf32>
    %221 = vector.extract_strided_slice %212 {offsets = [0, 1024], sizes = [2, 512], strides = [1, 1]} : vector<2x1536xf32> to vector<2x512xf32>
    %222 = arith.negf %221 : vector<2x512xf32>
    %223 = math.exp %222 : vector<2x512xf32>
    %cst_219 = arith.constant 1.000000e+00 : f32
    %224 = vector.broadcast %cst_219 : f32 to vector<2x512xf32>
    %225 = arith.addf %224, %223 : vector<2x512xf32>
    %226 = arith.divf %224, %225 : vector<2x512xf32>
    %227 = arith.mulf %218, %220 : vector<2x512xf32>
    %228 = math.tanh %227 : vector<2x512xf32>
    %229 = arith.mulf %226, %228 : vector<2x512xf32>
    %230 = arith.truncf %229 : vector<2x512xf32> to vector<2x512xbf16>
    %c0_220 = arith.constant 0 : index
    %c0_221 = arith.constant 0 : index
    %231 = vector.load %arg20[%c0_220, %c0_221] : memref<512x128xbf16, #tpu.memory_space<vmem>>, vector<512x128xbf16>
    %cst_222 = arith.constant dense<0.000000e+00> : vector<2x128xf32>
    %232 = tpu.matmul %230, %231, %cst_222 {dimension_numbers = #tpu.dot_dimension_numbers<[1], [0], [0], [1], [0, 0, 1, 1], [], []>} : vector<2x512xbf16>, vector<512x128xbf16>, vector<2x128xf32> -> vector<2x128xf32>
    %c0_223 = arith.constant 0 : index
    %c0_224 = arith.constant 0 : index
    %233 = vector.load %arg21[%c0_223, %c0_224] : memref<1x128xf32, #tpu.memory_space<vmem>>, vector<1x128xf32>
    %234 = vector.broadcast %233 : vector<1x128xf32> to vector<2x128xf32>
    %235 = arith.addf %232, %234 : vector<2x128xf32>
    %c0_225 = arith.constant 0 : index
    %c0_226 = arith.constant 0 : index
    %236 = vector.load %arg22[%c0_225, %c0_226] : memref<2x128xf32, #tpu.memory_space<vmem>>, vector<2x128xf32>
    tpu.vector_store %arg22[%c0_225, %c0_226], %235 {strides = array<i32>} : memref<2x128xf32, #tpu.memory_space<vmem>>, vector<2x128xf32>,
    return
  }
}

</mosaic_0001>

<bundles_post_ra>
// kernel: custom_network_forward.1
= control target key start
LH: loop header
LB: loop body
LE: loop exit
PB: predicated region body
PF: predicated region fallthrough
CT: control target
= control target key end

     0   :  { %s13003_s0 = inlined_call_operand.vmem [shape: f32[128,36], index: 0, kind: input, shape index: {}]   ;;  %s13004_s1 = inlined_call_operand.hbm [shape: f32[2,3], index: 1, kind: input, shape index: {}]   ;;  %s13005_s2 = inlined_call_operand.vmem [shape: f32[36,16], index: 2, kind: input, shape index: {}]   ;;  %s13006_s3 = inlined_call_operand.hbm [shape: f32[1,16], index: 3, kind: input, shape index: {}]   ;;  %s13007_s4 = inlined_call_operand.hbm [shape: f32[4,32,128], index: 4, kind: input, shape index: {}]   ;;  %s13008_s5 = inlined_call_operand.vmem [shape: f32[9,32,32], index: 5, kind: input, shape index: {}]   ;;  %s13009_s6 = inlined_call_operand.hbm [shape: f32[9,16,32], index: 6, kind: input, shape index: {}]   ;;  %s13010_s7 = inlined_call_operand.hbm [shape: f32[1,32], index: 7, kind: input, shape index: {}]   ;;  %s13011_s8 = inlined_call_operand.hbm [shape: f32[4,8,32], index: 8, kind: input, shape index: {}]   ;;  %s13012_s9 = inlined_call_operand.vmem [shape: f32[9,8,8], index: 9, kind: input, shape index: {}]   ;;  %s13013_s10 = inlined_call_operand.hbm [shape: f32[9,32,64], index: 10, kind: input, shape index: {}]   ;;  %s13014_s11 = inlined_call_operand.hbm [shape: f32[1,64], index: 11, kind: input, shape index: {}]   ;;  %s13015_s12 = inlined_call_operand.hbm [shape: f32[4,2,8], index: 12, kind: input, shape index: {}]   ;;  %s13016_s13 = inlined_call_operand.hbm [shape: bf16[64,256], index: 13, kind: input, shape index: {}]   ;;  %s13017_s14 = inlined_call_operand.hbm [shape: f32[3,256], index: 14, kind: input, shape index: {}]   ;;  %s13018_s15 = inlined_call_operand.hbm [shape: f32[1,256], index: 15, kind: input, shape index: {}]   ;;  %s13019_s16 = inlined_call_operand.vmem [shape: bf16[256,512], index: 16, kind: input, shape index: {}]   ;;  %s13020_s17 = inlined_call_operand.hbm [shape: f32[1,512], index: 17, kind: input, shape index: {}]   ;;  %s13021_s18 = inlined_call_operand.hbm [shape: bf16[512,1536], index: 18, kind: input, shape index: {}]   ;;  %s13022_s19 = inlined_call_operand.hbm [shape: f32[1,1536], index: 19, kind: input, shape index: {}]   ;;  %s13023_s20 = inlined_call_operand.hbm [shape: bf16[512,128], index: 20, kind: input, shape index: {}]   ;;  %s13024_s21 = inlined_call_operand.hbm [shape: f32[1,128], index: 21, kind: input, shape index: {}]   ;;  %s13025_s22 = inlined_call_operand.vmem [shape: f32[2,128], index: 22, kind: output, shape index: {}]  }
   0x1   :  { %13033 = sst [smem:[#allocation37_spill]] %s13003_s0 }
   0x2   :  { %13034 = sst [smem:[#allocation38_spill]] %s13004_s1 }
   0x3   :  { %13035 = sst [smem:[#allocation39_spill]] %s13005_s2 }
   0x4   :  { %13036 = sst [smem:[#allocation40_spill]] %s13006_s3 }
   0x5   :  { %13037 = sst [smem:[#allocation41_spill]] %s13007_s4 }
   0x6   :  { %13038 = sst [smem:[#allocation42_spill]] %s13008_s5 }
   0x7   :  { %13039 = sst [smem:[#allocation43_spill]] %s13009_s6 }
   0x8   :  { %13040 = sst [smem:[#allocation44_spill]] %s13025_s22 }
   0x9   :  { %27 = vsyncpa [#allocation3], 0 }
   0xa   :  { %28 = vsyncpa [#allocation5], 0 }
   0xb   :  { %29 = vsyncpa [#allocation8], 0 }
   0xc   :  { %30 = vsyncpa [#allocation11], 0 }
   0xd   :  { %31 = vsyncpa [#allocation14], 0 }
   0xe   :  { %32 = vsyncpa [#allocation17], 0 }
   0xf   :  { %33 = vsyncpa [#allocation20], 0 }
  0x10   :  { %34 = vsyncpa [#allocation23], 0 }
  0x11   :  { %35 = vsyncpa [#allocation26], 0  ;;  %s11818_s3 = smov [#allocation4]   ;;  %s13041_s4 = sld [smem:[#allocation40_spill]] }
  0x12   :  { %s56_s28 = sshll.u32 %s11818_s3, 4  ;;  %s57_s28 = int_to_ptr.vmem [resolvable:$true] %s56_s28 }
  0x17   :  { %s11426_s0 = scalar_lea.hbm %s13041_s4, 16 }
  0x18   :  { %p11427_p0 = scmp.ne.s32.totalorder %s13041_s4, %s11426_s0  ;;  %p11430_p1 = scmp.lt.u32.totalorder %s11426_s0, %s13041_s4 }
  0x1a   :  { %p11432_p2 = pnand %p11430_p1, %p11427_p0 }
  0x1c   :  { %11435 = shalt.err (!%p11432_p2)
}
  0x1d   :  { %s11436_s6 = scalar_lea.vmem %s57_s28, 16  ;;  %s11440_s25 = scalar_lea.vmem %s57_s28, 32 }
  0x1e   :  { %p11437_p3 = scmp.ne.s32.totalorder %s57_s28, %s11436_s6  ;;  %p11441_p4 = scmp.lt.s32.totalorder %s57_s28, %s57_s28 }
  0x1f   :  { %p11442_p5 = scmp.lt.s32.totalorder %s11440_s25, %s11436_s6 }
  0x21   :  { %p11443_p6 = por %p11442_p5, %p11441_p4 }
  0x23   :  { %p11444_p7 = pnand %p11443_p6, %p11437_p3 }
  0x25   :  { %11447 = shalt.err (!%p11444_p7)
}
  0x26   :  { %59 = dma.hbm_to_vmem [thread:$0]  %s13041_s4, 16, %s57_s28, [#allocation5]  }
  0x27   :  { %s11819_s27 = smov [#allocation7]   ;;  %s11820_s29 = smov [#allocation10]  }
  0x28   :  { %s79_s3 = sshll.u32 %s11819_s27, 4  ;;  %s101_s30 = sshll.u32 %s11820_s29, 4  ;;  %s80_s3 = int_to_ptr.vmem [resolvable:$true] %s79_s3  ;;  %s102_s30 = int_to_ptr.vmem [resolvable:$true] %s101_s30 }
  0x29   :  { %s13042_s1 = sld [smem:[#allocation43_spill]] }
  0x2f   :  { %s11448_s5 = scalar_lea.hbm %s13042_s1, 2304 }
  0x30   :  { %p11449_p8 = scmp.ne.s32.totalorder %s13042_s1, %s11448_s5  ;;  %p11452_p9 = scmp.lt.u32.totalorder %s11448_s5, %s13042_s1 }
  0x32   :  { %p11454_p10 = pnand %p11452_p9, %p11449_p8 }
  0x34   :  { %11457 = shalt.err (!%p11454_p10)
}
  0x35   :  { %s11458_s28 = scalar_lea.vmem %s80_s3, 2304  ;;  %p11463_p12 = scmp.lt.s32.totalorder %s80_s3, %s80_s3 }
  0x36   :  { %p11459_p11 = scmp.ne.s32.totalorder %s80_s3, %s11458_s28  ;;  %p11464_p13 = scmp.lt.s32.totalorder %s11458_s28, %s11458_s28 }
  0x38   :  { %p11465_p0 = por %p11464_p13, %p11463_p12 }
  0x3a   :  { %p11466_p1 = pnand %p11465_p0, %p11459_p11 }
  0x3c   :  { %11469 = shalt.err (!%p11466_p1)
}
  0x3d   :  { %s11821_s4 = smov 128   ;;  %s11822_s26 = smov 8  }
  0x3e   :  { %85 = dma.hbm_to_vmem [thread:$0]  %s13042_s1, 2304, %s80_s3, [#allocation8], %s11821_s4, %s11821_s4, %s11822_s26  }
  0x3f   :  { %s11470_s0 = scalar_lea.hbm %s13011_s8, 512 }
  0x40   :  { %p11471_p2 = scmp.ne.s32.totalorder %s13011_s8, %s11470_s0  ;;  %p11474_p3 = scmp.lt.u32.totalorder %s11470_s0, %s13011_s8 }
  0x42   :  { %p11476_p4 = pnand %p11474_p3, %p11471_p2 }
  0x44   :  { %11479 = shalt.err (!%p11476_p4)
}
  0x45   :  { %s11480_s25 = scalar_lea.vmem %s102_s30, 512  ;;  %p11485_p6 = scmp.lt.s32.totalorder %s102_s30, %s102_s30 }
  0x46   :  { %p11481_p5 = scmp.ne.s32.totalorder %s102_s30, %s11480_s25  ;;  %p11486_p7 = scmp.lt.s32.totalorder %s11480_s25, %s11480_s25 }
  0x48   :  { %p11487_p8 = por %p11486_p7, %p11485_p6 }
  0x4a   :  { %p11488_p9 = pnand %p11487_p8, %p11481_p5 }
  0x4c   :  { %11491 = shalt.err (!%p11488_p9)
}
  0x4d   :  { %107 = dma.hbm_to_vmem [thread:$0]  %s13011_s8, 512, %s102_s30, [#allocation11], %s11821_s4, %s11821_s4, %s11822_s26  }
  0x4e   :  { %s11823_s28 = smov [#allocation13]   ;;  %s11824_s2 = smov [#allocation16]  }
  0x4f   :  { %s128_s22 = sshll.u32 %s11823_s28, 4  ;;  %s149_s27 = sshll.u32 %s11824_s2, 4  ;;  %s129_s22 = int_to_ptr.vmem [resolvable:$true] %s128_s22  ;;  %s150_s27 = int_to_ptr.vmem [resolvable:$true] %s149_s27 }
  0x50   :  { %s11492_s23 = scalar_lea.hbm %s13014_s11, 16 }
  0x51   :  { %p11493_p10 = scmp.ne.s32.totalorder %s13014_s11, %s11492_s23  ;;  %p11496_p11 = scmp.lt.u32.totalorder %s11492_s23, %s13014_s11 }
  0x53   :  { %p11498_p12 = pnand %p11496_p11, %p11493_p10 }
  0x55   :  { %11501 = shalt.err (!%p11498_p12)
}
  0x56   :  { %s11502_s8 = scalar_lea.vmem %s129_s22, 16  ;;  %s11506_s30 = scalar_lea.vmem %s129_s22, 32 }
  0x57   :  { %p11503_p13 = scmp.ne.s32.totalorder %s129_s22, %s11502_s8  ;;  %p11507_p0 = scmp.lt.s32.totalorder %s129_s22, %s129_s22 }
  0x58   :  { %p11508_p1 = scmp.lt.s32.totalorder %s11506_s30, %s11502_s8 }
  0x5a   :  { %p11509_p2 = por %p11508_p1, %p11507_p0 }
  0x5c   :  { %p11510_p3 = pnand %p11509_p2, %p11503_p13 }
  0x5e   :  { %11513 = shalt.err (!%p11510_p3)
}
  0x5f   :  { %131 = dma.hbm_to_vmem [thread:$0]  %s13014_s11, 16, %s129_s22, [#allocation14]  }
  0x60   :  { %s11514_s29 = scalar_lea.hbm %s13016_s13, 1024 }
  0x61   :  { %p11515_p4 = scmp.ne.s32.totalorder %s13016_s13, %s11514_s29  ;;  %p11518_p5 = scmp.lt.u32.totalorder %s11514_s29, %s13016_s13 }
  0x63   :  { %p11520_p6 = pnand %p11518_p5, %p11515_p4 }
  0x65   :  { %11523 = shalt.err (!%p11520_p6)
}
  0x66   :  { %s11524_s6 = scalar_lea.vmem %s150_s27, 1024  ;;  %p11529_p8 = scmp.lt.s32.totalorder %s150_s27, %s150_s27 }
  0x67   :  { %p11525_p7 = scmp.ne.s32.totalorder %s150_s27, %s11524_s6  ;;  %p11530_p9 = scmp.lt.s32.totalorder %s11524_s6, %s11524_s6 }
  0x69   :  { %p11531_p10 = por %p11530_p9, %p11529_p8 }
  0x6b   :  { %p11532_p11 = pnand %p11531_p10, %p11525_p7 }
  0x6d   :  { %11535 = shalt.err (!%p11532_p11)
}
  0x6e   :  { %155 = dma.hbm_to_vmem [thread:$0]  %s13016_s13, 1024, %s150_s27, [#allocation17], %s11821_s4, %s11821_s4, %s11822_s26  }
  0x6f   :  { %s11825_s25 = smov [#allocation19]   ;;  %s11826_s30 = smov [#allocation22]  }
  0x70   :  { %s172_s8 = sshll.u32 %s11825_s25, 4  ;;  %s193_s3 = sshll.u32 %s11826_s30, 4  ;;  %s173_s8 = int_to_ptr.vmem [resolvable:$true] %s172_s8  ;;  %s194_s3 = int_to_ptr.vmem [resolvable:$true] %s193_s3 }
  0x71   :  { %s11536_s2 = scalar_lea.hbm %s13018_s15, 32 }
  0x72   :  { %p11537_p12 = scmp.ne.s32.totalorder %s13018_s15, %s11536_s2  ;;  %p11540_p13 = scmp.lt.u32.totalorder %s11536_s2, %s13018_s15 }
  0x74   :  { %p11542_p0 = pnand %p11540_p13, %p11537_p12 }
  0x76   :  { %11545 = shalt.err (!%p11542_p0)
}
  0x77   :  { %s11546_s13 = scalar_lea.vmem %s173_s8, 32  ;;  %p11551_p2 = scmp.lt.s32.totalorder %s173_s8, %s173_s8 }
  0x78   :  { %p11547_p1 = scmp.ne.s32.totalorder %s173_s8, %s11546_s13  ;;  %p11552_p3 = scmp.lt.s32.totalorder %s11546_s13, %s11546_s13 }
  0x7a   :  { %p11553_p4 = por %p11552_p3, %p11551_p2 }
  0x7c   :  { %p11554_p5 = pnand %p11553_p4, %p11547_p1 }
  0x7e   :  { %11557 = shalt.err (!%p11554_p5)
}
  0x7f   :  { %175 = dma.hbm_to_vmem [thread:$0]  %s13018_s15, 32, %s173_s8, [#allocation20]  }
  0x80   :  { %s11558_s22 = scalar_lea.hbm %s13021_s18, 49152 }
  0x81   :  { %p11559_p6 = scmp.ne.s32.totalorder %s13021_s18, %s11558_s22  ;;  %p11562_p7 = scmp.lt.u32.totalorder %s11558_s22, %s13021_s18 }
  0x83   :  { %p11564_p8 = pnand %p11562_p7, %p11559_p6 }
  0x85   :  { %11567 = shalt.err (!%p11564_p8)
}
  0x86   :  { %s11568_s2 = scalar_lea.vmem %s194_s3, 49152  ;;  %p11573_p10 = scmp.lt.s32.totalorder %s194_s3, %s194_s3 }
  0x87   :  { %p11569_p9 = scmp.ne.s32.totalorder %s194_s3, %s11568_s2  ;;  %p11574_p11 = scmp.lt.s32.totalorder %s11568_s2, %s11568_s2 }
  0x89   :  { %p11575_p12 = por %p11574_p11, %p11573_p10 }
  0x8b   :  { %p11576_p13 = pnand %p11575_p12, %p11569_p9 }
  0x8d   :  { %11579 = shalt.err (!%p11576_p13)
}
  0x8e   :  { %s11827_s15 = smov 768   ;;  %s11828_s8 = smov 48  }
  0x8f   :  { %199 = dma.hbm_to_vmem [thread:$0]  %s13021_s18, 49152, %s194_s3, [#allocation23], %s11827_s15, %s11827_s15, %s11828_s8  }
  0x90   :  { %s11829_s23 = smov [#allocation25]   ;;  %s11580_s24 = scalar_lea.hbm %s13023_s20, 4096 }
  0x91   :  { %s215_s5 = sshll.u32 %s11829_s23, 4  ;;  %p11581_p0 = scmp.ne.s32.totalorder %s13023_s20, %s11580_s24  ;;  %s216_s5 = int_to_ptr.vmem [resolvable:$true] %s215_s5 }
  0x92   :  { %p11584_p1 = scmp.lt.u32.totalorder %s11580_s24, %s13023_s20 }
  0x94   :  { %p11586_p2 = pnand %p11584_p1, %p11581_p0 }
  0x96   :  { %11589 = shalt.err (!%p11586_p2)
}
  0x97   :  { %s11590_s30 = scalar_lea.vmem %s216_s5, 4096  ;;  %p11595_p4 = scmp.lt.s32.totalorder %s216_s5, %s216_s5 }
  0x98   :  { %p11591_p3 = scmp.ne.s32.totalorder %s216_s5, %s11590_s30  ;;  %p11596_p5 = scmp.lt.s32.totalorder %s11590_s30, %s11590_s30 }
  0x9a   :  { %p11597_p6 = por %p11596_p5, %p11595_p4 }
  0x9c   :  { %p11598_p7 = pnand %p11597_p6, %p11591_p3 }
  0x9e   :  { %11601 = shalt.err (!%p11598_p7)
}
  0x9f   :  { %s11830_s18 = smov 64   ;;  %s11831_s3 = smov 4  }
  0xa0   :  { %221 = dma.hbm_to_vmem [thread:$0]  %s13023_s20, 4096, %s216_s5, [#allocation26], %s11830_s18, %s11830_s18, %s11831_s3  }
  0xa1   :  { %s11832_s2 = smov [#allocation2]   ;;  %s11833_s8 = smov [#allocation6]  }
  0xa2   :  { %s44_s15 = sshll.u32 %s11832_s2, 4  ;;  %s65_s29 = sshll.u32 %s11833_s8, 4  ;;  %s45_s15 = int_to_ptr.vmem [resolvable:$true] %s44_s15  ;;  %s12067_s29 = int_to_ptr.vmem [resolvable:$true] %s65_s29 }
  0xa3   :  { %s13043_s13 = sld [smem:[#allocation38_spill]] }
  0xa9   :  { %s11602_s27 = scalar_lea.hbm %s13043_s13, 32 }
  0xaa   :  { %p11603_p8 = scmp.ne.s32.totalorder %s13043_s13, %s11602_s27  ;;  %p11606_p9 = scmp.lt.u32.totalorder %s11602_s27, %s13043_s13 }
  0xac   :  { %p11608_p10 = pnand %p11606_p9, %p11603_p8 }
  0xae   :  { %11611 = shalt.err (!%p11608_p10)
}
  0xaf   :  { %s11612_s20 = scalar_lea.vmem %s45_s15, 32  ;;  %p11617_p12 = scmp.lt.s32.totalorder %s45_s15, %s45_s15 }
  0xb0   :  { %p11613_p11 = scmp.ne.s32.totalorder %s45_s15, %s11612_s20  ;;  %p11618_p13 = scmp.lt.s32.totalorder %s11612_s20, %s11612_s20 }
  0xb2   :  { %p11619_p0 = por %p11618_p13, %p11617_p12 }
  0xb4   :  { %p11620_p1 = pnand %p11619_p0, %p11613_p11 }
  0xb6   :  { %11623 = shalt.err (!%p11620_p1)
}
  0xb7   :  { %47 = dma.hbm_to_vmem [thread:$0]  %s13043_s13, 32, %s45_s15, [#allocation3]  }
  0xb8   :  { %s13044_s3 = sld [smem:[#allocation41_spill]] }
  0xbe   :  { %s11624_s1 = scalar_lea.hbm %s13044_s3, 2048 }
  0xbf   :  { %p11625_p2 = scmp.ne.s32.totalorder %s13044_s3, %s11624_s1  ;;  %p11628_p3 = scmp.lt.u32.totalorder %s11624_s1, %s13044_s3 }
  0xc1   :  { %p11630_p4 = pnand %p11628_p3, %p11625_p2 }
  0xc3   :  { %11633 = shalt.err (!%p11630_p4)
}
  0xc4   :  { %s11634_s23 = scalar_lea.vmem %s12067_s29, 2048  ;;  %p11639_p6 = scmp.lt.s32.totalorder %s12067_s29, %s12067_s29 }
  0xc5   :  { %p11635_p5 = scmp.ne.s32.totalorder %s12067_s29, %s11634_s23  ;;  %p11640_p7 = scmp.lt.s32.totalorder %s11634_s23, %s11634_s23 }
  0xc7   :  { %p11641_p8 = por %p11640_p7, %p11639_p6 }
  0xc9   :  { %p11642_p9 = pnand %p11641_p8, %p11635_p5 }
  0xcb   :  { %11645 = shalt.err (!%p11642_p9)
}
  0xcc   :  { %71 = dma.hbm_to_vmem [thread:$0]  %s13044_s3, 2048, %s12067_s29, [#allocation5], %s11821_s4, %s11821_s4, %s11822_s26  }
  0xcd   :  { %s11834_s27 = smov [#allocation9]   ;;  %s11835_s6 = smov [#allocation12]  }
  0xce   :  { %s92_s24 = sshll.u32 %s11834_s27, 4  ;;  %s115_s11 = sshll.u32 %s11835_s6, 4  ;;  %s93_s24 = int_to_ptr.vmem [resolvable:$true] %s92_s24  ;;  %s12101_s11 = int_to_ptr.vmem [resolvable:$true] %s115_s11 }
  0xcf   :  { %s11646_s5 = scalar_lea.hbm %s13010_s7, 16 }
  0xd0   :  { %p11647_p10 = scmp.ne.s32.totalorder %s13010_s7, %s11646_s5  ;;  %p11650_p11 = scmp.lt.u32.totalorder %s11646_s5, %s13010_s7 }
  0xd2   :  { %p11652_p12 = pnand %p11650_p11, %p11647_p10 }
  0xd4   :  { %11655 = shalt.err (!%p11652_p12)
}
  0xd5   :  { %s11656_s29 = scalar_lea.vmem %s93_s24, 16  ;;  %s11660_s3 = scalar_lea.vmem %s93_s24, 32 }
  0xd6   :  { %p11657_p13 = scmp.ne.s32.totalorder %s93_s24, %s11656_s29  ;;  %p11661_p0 = scmp.lt.s32.totalorder %s93_s24, %s93_s24 }
  0xd7   :  { %p11662_p1 = scmp.lt.s32.totalorder %s11660_s3, %s11656_s29 }
  0xd9   :  { %p11663_p2 = por %p11662_p1, %p11661_p0 }
  0xdb   :  { %p11664_p3 = pnand %p11663_p2, %p11657_p13 }
  0xdd   :  { %11667 = shalt.err (!%p11664_p3)
}
  0xde   :  { %95 = dma.hbm_to_vmem [thread:$0]  %s13010_s7, 16, %s93_s24, [#allocation8]  }
  0xdf   :  { %s11668_s23 = scalar_lea.hbm %s13013_s10, 4608 }
  0xe0   :  { %p11669_p4 = scmp.ne.s32.totalorder %s13013_s10, %s11668_s23  ;;  %p11672_p5 = scmp.lt.u32.totalorder %s11668_s23, %s13013_s10 }
  0xe2   :  { %p11674_p6 = pnand %p11672_p5, %p11669_p4 }
  0xe4   :  { %11677 = shalt.err (!%p11674_p6)
}
  0xe5   :  { %s11678_s22 = scalar_lea.vmem %s12101_s11, 4608  ;;  %p11683_p8 = scmp.lt.s32.totalorder %s12101_s11, %s12101_s11 }
  0xe6   :  { %p11679_p7 = scmp.ne.s32.totalorder %s12101_s11, %s11678_s22  ;;  %p11684_p9 = scmp.lt.s32.totalorder %s11678_s22, %s11678_s22 }
  0xe8   :  { %p11685_p10 = por %p11684_p9, %p11683_p8 }
  0xea   :  { %p11686_p11 = pnand %p11685_p10, %p11679_p7 }
  0xec   :  { %11689 = shalt.err (!%p11686_p11)
}
  0xed   :  { %121 = dma.hbm_to_vmem [thread:$0]  %s13013_s10, 4608, %s12101_s11, [#allocation11], %s11821_s4, %s11821_s4, %s11822_s26  }
  0xee   :  { %s11836_s20 = smov [#allocation15]   ;;  %s11690_s18 = scalar_lea.hbm %s13015_s12, 128 }
  0xef   :  { %s137_s5 = sshll.u32 %s11836_s20, 4  ;;  %p11691_p12 = scmp.ne.s32.totalorder %s13015_s12, %s11690_s18  ;;  %s138_s5 = int_to_ptr.vmem [resolvable:$true] %s137_s5 }
  0xf0   :  { %p11694_p13 = scmp.lt.u32.totalorder %s11690_s18, %s13015_s12 }
  0xf2   :  { %p11696_p0 = pnand %p11694_p13, %p11691_p12 }
  0xf4   :  { %11699 = shalt.err (!%p11696_p0)
}
  0xf5   :  { %s11700_s2 = scalar_lea.vmem %s138_s5, 128  ;;  %p11705_p2 = scmp.lt.s32.totalorder %s138_s5, %s138_s5 }
  0xf6   :  { %p11701_p1 = scmp.ne.s32.totalorder %s138_s5, %s11700_s2  ;;  %p11706_p3 = scmp.lt.s32.totalorder %s11700_s2, %s11700_s2 }
  0xf8   :  { %p11707_p4 = por %p11706_p3, %p11705_p2 }
  0xfa   :  { %p11708_p5 = pnand %p11707_p4, %p11701_p1 }
  0xfc   :  { %11711 = shalt.err (!%p11708_p5)
}
  0xfd   :  { %s11837_s10 = smov 32   ;;  %s11838_s4 = smov 2  }
  0xfe   :  { %143 = dma.hbm_to_vmem [thread:$0]  %s13015_s12, 128, %s138_s5, [#allocation14], %s11837_s10, %s11837_s10, %s11838_s4  }
  0xff   :  { %s11839_s8 = smov [#allocation18]   ;;  %s11840_s23 = smov [#allocation21]  }
 0x100   :  { %s162_s0 = sshll.u32 %s11839_s8, 4  ;;  %s184_s15 = sshll.u32 %s11840_s23, 4  ;;  %s163_s0 = int_to_ptr.vmem [resolvable:$true] %s162_s0  ;;  %s185_s15 = int_to_ptr.vmem [resolvable:$true] %s184_s15 }
 0x101   :  { %s11712_s6 = scalar_lea.hbm %s13017_s14, 128 }
 0x102   :  { %p11713_p6 = scmp.ne.s32.totalorder %s13017_s14, %s11712_s6  ;;  %p11716_p7 = scmp.lt.u32.totalorder %s11712_s6, %s13017_s14 }
 0x104   :  { %p11718_p8 = pnand %p11716_p7, %p11713_p6 }
 0x106   :  { %11721 = shalt.err (!%p11718_p8)
}
 0x107   :  { %s11722_s12 = scalar_lea.vmem %s163_s0, 128  ;;  %p11727_p10 = scmp.lt.s32.totalorder %s163_s0, %s163_s0 }
 0x108   :  { %p11723_p9 = scmp.ne.s32.totalorder %s163_s0, %s11722_s12  ;;  %p11728_p11 = scmp.lt.s32.totalorder %s11722_s12, %s11722_s12 }
 0x10a   :  { %p11729_p12 = por %p11728_p11, %p11727_p10 }
 0x10c   :  { %p11730_p13 = pnand %p11729_p12, %p11723_p9 }
 0x10e   :  { %11733 = shalt.err (!%p11730_p13)
}
 0x10f   :  { %165 = dma.hbm_to_vmem [thread:$0]  %s13017_s14, 128, %s163_s0, [#allocation17]  }
 0x110   :  { %s11734_s1 = scalar_lea.hbm %s13020_s17, 64 }
 0x111   :  { %p11735_p0 = scmp.ne.s32.totalorder %s13020_s17, %s11734_s1  ;;  %p11738_p1 = scmp.lt.u32.totalorder %s11734_s1, %s13020_s17 }
 0x113   :  { %p11740_p2 = pnand %p11738_p1, %p11735_p0 }
 0x115   :  { %11743 = shalt.err (!%p11740_p2)
}
 0x116   :  { %s11744_s10 = scalar_lea.vmem %s185_s15, 64  ;;  %p11749_p4 = scmp.lt.s32.totalorder %s185_s15, %s185_s15 }
 0x117   :  { %p11745_p3 = scmp.ne.s32.totalorder %s185_s15, %s11744_s10  ;;  %p11750_p5 = scmp.lt.s32.totalorder %s11744_s10, %s11744_s10 }
 0x119   :  { %p11751_p6 = por %p11750_p5, %p11749_p4 }
 0x11b   :  { %p11752_p7 = pnand %p11751_p6, %p11745_p3 }
 0x11d   :  { %11755 = shalt.err (!%p11752_p7)
}
 0x11e   :  { %187 = dma.hbm_to_vmem [thread:$0]  %s13020_s17, 64, %s185_s15, [#allocation20]  }
 0x11f   :  { %s11841_s26 = smov [#allocation24]   ;;  %s11842_s8 = smov [#allocation27]  }
 0x120   :  { %s206_s11 = sshll.u32 %s11841_s26, 4  ;;  %s228_s0 = sshll.u32 %s11842_s8, 4  ;;  %s207_s11 = int_to_ptr.vmem [resolvable:$true] %s206_s11  ;;  %s229_s0 = int_to_ptr.vmem [resolvable:$true] %s228_s0 }
 0x121   :  { %s11756_s27 = scalar_lea.hbm %s13022_s19, 192 }
 0x122   :  { %p11757_p8 = scmp.ne.s32.totalorder %s13022_s19, %s11756_s27  ;;  %p11760_p9 = scmp.lt.u32.totalorder %s11756_s27, %s13022_s19 }
 0x124   :  { %p11762_p10 = pnand %p11760_p9, %p11757_p8 }
 0x126   :  { %11765 = shalt.err (!%p11762_p10)
}
 0x127   :  { %s11766_s17 = scalar_lea.vmem %s207_s11, 192  ;;  %p11771_p12 = scmp.lt.s32.totalorder %s207_s11, %s207_s11 }
 0x128   :  { %p11767_p11 = scmp.ne.s32.totalorder %s207_s11, %s11766_s17  ;;  %p11772_p13 = scmp.lt.s32.totalorder %s11766_s17, %s11766_s17 }
 0x12a   :  { %p11773_p0 = por %p11772_p13, %p11771_p12 }
 0x12c   :  { %p11774_p1 = pnand %p11773_p0, %p11767_p11 }
 0x12e   :  { %11777 = shalt.err (!%p11774_p1)
}
 0x12f   :  { %209 = dma.hbm_to_vmem [thread:$0]  %s13022_s19, 192, %s207_s11, [#allocation23]  }
 0x130   :  { %s11778_s25 = scalar_lea.hbm %s13024_s21, 16 }
 0x131   :  { %p11779_p2 = scmp.ne.s32.totalorder %s13024_s21, %s11778_s25  ;;  %p11782_p3 = scmp.lt.u32.totalorder %s11778_s25, %s13024_s21 }
 0x133   :  { %p11784_p4 = pnand %p11782_p3, %p11779_p2 }
 0x135   :  { %11787 = shalt.err (!%p11784_p4)
}
 0x136   :  { %s11788_s3 = scalar_lea.vmem %s229_s0, 16  ;;  %s11792_s28 = scalar_lea.vmem %s229_s0, 32 }
 0x137   :  { %p11789_p5 = scmp.ne.s32.totalorder %s229_s0, %s11788_s3  ;;  %p11793_p6 = scmp.lt.s32.totalorder %s229_s0, %s229_s0 }
 0x138   :  { %p11794_p7 = scmp.lt.s32.totalorder %s11792_s28, %s11788_s3 }
 0x13a   :  { %p11795_p8 = por %p11794_p7, %p11793_p6 }
 0x13c   :  { %p11796_p9 = pnand %p11795_p8, %p11789_p5 }
 0x13e   :  { %11799 = shalt.err (!%p11796_p9)
}
 0x13f   :  { %231 = dma.hbm_to_vmem [thread:$0]  %s13024_s21, 16, %s229_s0, [#allocation26]  }
 0x140   :  { %11800 = dma.done.wait [#allocation3], 32  }
 0x141   :  { %11801 = vsyncadd [#allocation3], 4294967264 }
 0x142   :  { %11802 = dma.done.wait [#allocation5], 2064  }
 0x143   :  { %11803 = vsyncadd [#allocation5], 4294965232 }
 0x144   :  { %11804 = dma.done.wait [#allocation8], 2320  }
 0x145   :  { %11805 = vsyncadd [#allocation8], 4294964976 }
 0x146   :  { %11806 = dma.done.wait [#allocation11], 5120  }
 0x147   :  { %11807 = vsyncadd [#allocation11], 4294962176 }
 0x148   :  { %11808 = dma.done.wait [#allocation14], 144  }
 0x149   :  { %11809 = vsyncadd [#allocation14], 4294967152 }
 0x14a   :  { %11810 = dma.done.wait [#allocation17], 1152  }
 0x14b   :  { %11811 = vsyncadd [#allocation17], 4294966144 }
 0x14c   :  { %11812 = dma.done.wait [#allocation20], 96  }
 0x14d   :  { %11813 = vsyncadd [#allocation20], 4294967200 }
 0x14e   :  { %11814 = dma.done.wait [#allocation23], 49344  }
 0x14f   :  { %11815 = vsyncadd [#allocation23], 4294917952 }
 0x150   :  { %11816 = dma.done.wait [#allocation26], 4112  }
 0x151   :  { %11817 = vsyncadd [#allocation26], 4294963184  ;;  %vm312_vm0 = vcmask 293888   ;;  %s13045_s14 = sld [smem:[#allocation39_spill]]  ;;  %s13046_s6 = sld [smem:[#allocation37_spill]]  ;;  %vm361_vm1 = vcmask 1043456  }
 0x152   :  { %v526_v23 = vld [vmem:[#allocation6] sm:$0xff]  ;;  %v12274_v25 = vld [vmem:[#allocation4] ss:$0 sm:$0xff]  ;;  %vm903_vm2 = vcmask 130048   ;;  %s13047_s20 = sld [smem:[#allocation42_spill]]  ;;  %vm1094_vm3 = vcmask 261120  }
 0x153   :  { %v616_v24 = vld [vmem:[#allocation6 + $0x20] sm:$0xff]  ;;  %9698 = vmatprep.mubr.f32.mxu1 %v526_v23  ;;  %v619_v23 = vld [vmem:[#allocation6 + $0x38] sm:$0xff]  ;;  %vm11844_vm4 = vmmov 0   ;;  %vm3119_vm5 = vcmask 64512   ;;  %vm4651_vm6 = vcmask 1042432   ;;  %vm4647_vm7 = vcmask 23552  }
 0x154   :  { %vm4767_vm8 = vcmask 523264   ;;  %s13048_s21 = sld [smem:[#allocation44_spill]] }
 0x157   :  { %v300_v0 = vld [vmem:[%s13045_s14] sm:$0xff]  ;;  %v301_v1 = vld [vmem:[%s13045_s14 + $0x8] sm:$0xff]  ;;  %v302_v2 = vld [vmem:[%s13045_s14 + $0x10] sm:$0xff] }
 0x158   :  { %v10242_v3 = vpack.c.bf16 %v301_v1, %v300_v0  ;;  %v303_v4 = vld [vmem:[%s13045_s14 + $0x18] sm:$0xff]  ;;  %v284_v5 = vld [vmem:[%s13046_s6] sm:$0xff]  ;;  %v285_v8 = vld [vmem:[%s13046_s6 + $0x8] sm:$0xff] }
 0x159   :  { %v10246_v6 = vpack.c.bf16 %v303_v4, %v302_v2  ;;  %9642 = vmatprep.mubr.msk.f32.mxu0 %vm312_vm0, %v284_v5  ;;  %v304_v7 = vld [vmem:[%s13045_s14 + $0x20] sm:$0xf]  ;;  %v286_v9 = vld [vmem:[%s13046_s6 + $0x10] sm:$0xff]  ;;  %v287_v10 = vld [vmem:[%s13046_s6 + $0x18] sm:$0xff] }
 0x15a   :  { %10243 = vmatprep.subr.bf16.mxu0 %v10242_v3  ;;  %v288_v11 = vld [vmem:[%s13046_s6 + $0x20] sm:$0xff]  ;;  %v289_v12 = vld [vmem:[%s13046_s6 + $0x28] sm:$0xff]  ;;  %v290_v13 = vld [vmem:[%s13046_s6 + $0x30] sm:$0xff] }
 0x15b   :  { %10245 = vmatpush3.bf16.msra.mxu0 %v10242_v3  ;;  %v291_v14 = vld [vmem:[%s13046_s6 + $0x38] sm:$0xff]  ;;  %v292_v15 = vld [vmem:[%s13046_s6 + $0x40] sm:$0xff]  ;;  %v293_v16 = vld [vmem:[%s13046_s6 + $0x48] sm:$0xff] }
 0x15c   :  { %10247 = vmatprep.subr.bf16.mxu0 %v10246_v6  ;;  %v294_v17 = vld [vmem:[%s13046_s6 + $0x50] sm:$0xff]  ;;  %v295_v18 = vld [vmem:[%s13046_s6 + $0x58] sm:$0xff]  ;;  %v296_v19 = vld [vmem:[%s13046_s6 + $0x60] sm:$0xff] }
 0x15d   :  { %v297_v20 = vld [vmem:[%s13046_s6 + $0x68] sm:$0xff]  ;;  %v298_v21 = vld [vmem:[%s13046_s6 + $0x70] sm:$0xff]  ;;  %v299_v22 = vld [vmem:[%s13046_s6 + $0x78] sm:$0xff] }
 0x15f   :  { %10249 = vmatpush3.bf16.msra.mxu0 %v10246_v6 }
 0x160   :  { %9640 = vmatprep.subr.msk.mxu0 %vm361_vm1, %v304_v7 }
 0x163   :  { %9641 = vmatpush3.msk.msra.mxu0 %vm361_vm1, %v304_v7 }
 0x164   :  { %9643 = vmatmul.mubr.msk.f32.vlgmr.msra.gmra.mrb[0].mxu0 %vm312_vm0, %v285_v8 }
 0x165   :  { %9645 = vmatprep.mubr.msk.f32.mxu0 %vm312_vm0, %v286_v9 }
 0x168   :  { %9646 = vmatmul.mubr.msk.f32.gmra.mrb[2].mxu0 %vm312_vm0, %v287_v10 }
 0x169   :  { %9648 = vmatprep.mubr.msk.f32.mxu0 %vm312_vm0, %v288_v11 }
 0x16c   :  { %9649 = vmatmul.mubr.msk.f32.gmra.mrb[4].mxu0 %vm312_vm0, %v289_v12 }
 0x16d   :  { %9651 = vmatprep.mubr.msk.f32.mxu0 %vm312_vm0, %v290_v13 }
 0x170   :  { %9652 = vmatmul.mubr.msk.f32.gmra.mrb[6].mxu0 %vm312_vm0, %v291_v14 }
 0x171   :  { %9654 = vmatprep.mubr.msk.f32.mxu0 %vm312_vm0, %v292_v15 }
 0x174   :  { %9655 = vmatmul.mubr.msk.f32.gmra.mrb[8].mxu0 %vm312_vm0, %v293_v16 }
 0x175   :  { %9657 = vmatprep.mubr.msk.f32.mxu0 %vm312_vm0, %v294_v17 }
 0x178   :  { %9658 = vmatmul.mubr.msk.f32.gmra.mrb[10].mxu0 %vm312_vm0, %v295_v18  ;;  %v527_v18 = vld [vmem:[#allocation6 + $0x8] sm:$0xff] }
 0x179   :  { %9660 = vmatprep.mubr.msk.f32.mxu0 %vm312_vm0, %v296_v19  ;;  %v617_v19 = vld [vmem:[#allocation6 + $0x28] sm:$0xff] }
 0x17c   :  { %9661 = vmatmul.mubr.msk.f32.gmra.mrb[12].mxu0 %vm312_vm0, %v297_v20  ;;  %v528_v20 = vld [vmem:[#allocation6 + $0x10] sm:$0xff] }
 0x17d   :  { %9663 = vmatprep.mubr.msk.f32.mxu0 %vm312_vm0, %v298_v21  ;;  %v618_v21 = vld [vmem:[#allocation6 + $0x30] sm:$0xff] }
 0x180   :  { %9664 = vmatmul.mubr.msk.f32.gmra.mrb[14].mxu0 %vm312_vm0, %v299_v22  ;;  %v529_v22 = vld [vmem:[#allocation6 + $0x18] sm:$0xff] }
 0x181   :  { %9736 = vmatprep.mubr.f32.mxu0 %v616_v24  ;;  %v710_v24 = vld [vmem:[#allocation6 + $0x40] sm:$0xff] }
 0x237   :  { %v9644_v26 = vpop.f32.mrb[0].mxu0 }
 0x238   :  { %v437_v27 = vadd.f32 %v9644_v26, %v12274_v25  ;;  %v431_v28 = vpop.f32.mrb[1].mxu0  ;;  %v711_v26 = vld [vmem:[#allocation6 + $0x48] sm:$0xff] }
 0x239   :  { %v432_v29 = vadd.f32 %v12274_v25, %v431_v28  ;;  %v712_v28 = vld [vmem:[#allocation6 + $0x50] sm:$0xff] }
 0x23a   :  { %v511_v30 = vmax.f32 %v437_v27, 0.0  ;;  %v805_v27 = vld [vmem:[#allocation6 + $0x68] sm:$0xff] }
 0x23b   :  { %v510_v31 = vmax.f32 %v432_v29, 0.0  ;;  %v9647_v32 = vpop.f32.mrb[2].mxu0  ;;  %v806_v29 = vld [vmem:[#allocation6 + $0x70] sm:$0xff] }
 0x23c   :  { %v447_v33 = vadd.f32 %v9647_v32, %v12274_v25  ;;  %v441_v34 = vpop.f32.mrb[3].mxu0  ;;  %v1007_v32 = vld [vmem:[#allocation7 + $0x10] sm:$0xff] }
 0x23d   :  { %v12279_v35 = vpack.c.bf16 %v511_v30, %v510_v31  ;;  %v442_v36 = vadd.f32 %v12274_v25, %v441_v34  ;;  %v713_v30 = vld [vmem:[#allocation6 + $0x58] sm:$0xff]  ;;  %v901_v34 = vld [vmem:[#allocation7] sm:$0xff] }
 0x23e   :  { %v513_v37 = vmax.f32 %v447_v33, 0.0  ;;  %v807_v31 = vld [vmem:[#allocation6 + $0x78] sm:$0xff] }
 0x23f   :  { %v512_v38 = vmax.f32 %v442_v36, 0.0  ;;  %v9650_v39 = vpop.f32.mrb[4].mxu0  ;;  %10251 = vmatprep.subr.bf16.mxu1 %v12279_v35  ;;  %10283 = vmatprep.subr.bf16.mxu0 %v12279_v35  ;;  %v1008_v33 = vld [vmem:[#allocation7 + $0x18] sm:$0xff]  ;;  %v902_v36 = vld [vmem:[#allocation7 + $0x8] sm:$0xff] }
 0x240   :  { %v457_v40 = vadd.f32 %v9650_v39, %v12274_v25  ;;  %v451_v41 = vpop.f32.mrb[5].mxu0  ;;  %10253 = vmatpush3.bf16.msra.mxu1 %v12279_v35  ;;  %10285 = vmatpush3.bf16.msra.mxu0 %v12279_v35  ;;  %v1296_v39 = vld [vmem:[#allocation7 + $0x28] sm:$0xff] }
 0x241   :  { %v12287_v42 = vpack.c.bf16 %v513_v37, %v512_v38  ;;  %v452_v43 = vadd.f32 %v12274_v25, %v451_v41  ;;  %v10378_v37 = vpack.c.bf16 %v902_v36, %v901_v34  ;;  %v1295_v38 = vld [vmem:[#allocation7 + $0x20] sm:$0xff] }
 0x242   :  { %v515_v44 = vmax.f32 %v457_v40, 0.0  ;;  %v10402_v40 = vpack.c.bf16 %v1296_v39, %v1295_v38  ;;  %v8634_v38 = vld [vmem:[%s13047_s20 + $0x28] sm:$0xff] }
 0x243   :  { %v514_v45 = vmax.f32 %v452_v43, 0.0  ;;  %v9653_v46 = vpop.f32.mrb[6].mxu0  ;;  %10255 = vmatprep.subr.bf16.mxu1 %v12287_v42  ;;  %10287 = vmatprep.subr.bf16.mxu0 %v12287_v42 }
 0x244   :  { %v467_v47 = vadd.f32 %v9653_v46, %v12274_v25  ;;  %v461_v48 = vpop.f32.mrb[7].mxu0  ;;  %10257 = vmatpush3.bf16.msra.mxu1 %v12287_v42  ;;  %10289 = vmatpush3.bf16.msra.mxu0 %v12287_v42 }
 0x245   :  { %v12295_v49 = vpack.c.bf16 %v515_v44, %v514_v45  ;;  %v462_v50 = vadd.f32 %v12274_v25, %v461_v48 }
 0x246   :  { %v517_v51 = vmax.f32 %v467_v47, 0.0 }
 0x247   :  { %v516_v52 = vmax.f32 %v462_v50, 0.0  ;;  %v9656_v53 = vpop.f32.mrb[8].mxu0  ;;  %10259 = vmatprep.subr.bf16.mxu1 %v12295_v49  ;;  %10291 = vmatprep.subr.bf16.mxu0 %v12295_v49 }
 0x248   :  { %v477_v54 = vadd.f32 %v9656_v53, %v12274_v25  ;;  %v471_v55 = vpop.f32.mrb[9].mxu0  ;;  %10261 = vmatpush3.bf16.msra.mxu1 %v12295_v49  ;;  %10293 = vmatpush3.bf16.msra.mxu0 %v12295_v49 }
 0x249   :  { %v12303_v56 = vpack.c.bf16 %v517_v51, %v516_v52  ;;  %v472_v57 = vadd.f32 %v12274_v25, %v471_v55 }
 0x24a   :  { %v519_v58 = vmax.f32 %v477_v54, 0.0 }
 0x24b   :  { %v518_v59 = vmax.f32 %v472_v57, 0.0  ;;  %v9659_v60 = vpop.f32.mrb[10].mxu0  ;;  %10263 = vmatprep.subr.bf16.mxu1 %v12303_v56  ;;  %10295 = vmatprep.subr.bf16.mxu0 %v12303_v56 }
 0x24c   :  { %v487_v61 = vadd.f32 %v9659_v60, %v12274_v25  ;;  %v481_v62 = vpop.f32.mrb[11].mxu0  ;;  %10265 = vmatpush3.bf16.msra.mxu1 %v12303_v56  ;;  %10297 = vmatpush3.bf16.msra.mxu0 %v12303_v56  ;;  %v1490_v60 = vld [vmem:[#allocation7 + $0x38] sm:$0xff] }
 0x24d   :  { %v12311_v63 = vpack.c.bf16 %v519_v58, %v518_v59  ;;  %v482_v0 = vadd.f32 %v12274_v25, %v481_v62  ;;  %v1489_v59 = vld [vmem:[#allocation7 + $0x30] sm:$0xff] }
 0x24e   :  { %v521_v1 = vmax.f32 %v487_v61, 0.0 }
 0x24f   :  { %v520_v2 = vmax.f32 %v482_v0, 0.0  ;;  %v9662_v3 = vpop.f32.mrb[12].mxu0  ;;  %10267 = vmatprep.subr.bf16.mxu1 %v12311_v63  ;;  %10299 = vmatprep.subr.bf16.mxu0 %v12311_v63 }
 0x250   :  { %v497_v4 = vadd.f32 %v9662_v3, %v12274_v25  ;;  %v491_v5 = vpop.f32.mrb[13].mxu0  ;;  %10269 = vmatpush3.bf16.msra.mxu1 %v12311_v63  ;;  %10301 = vmatpush3.bf16.msra.mxu0 %v12311_v63 }
 0x251   :  { %v10270_v6 = vpack.c.bf16 %v521_v1, %v520_v2  ;;  %v492_v7 = vadd.f32 %v12274_v25, %v491_v5 }
 0x252   :  { %v523_v8 = vmax.f32 %v497_v4, 0.0  ;;  %v10414_v4 = vpack.c.bf16 %v1490_v60, %v1489_v59  ;;  %v8651_v60 = vld [vmem:[%s13047_s20 + $0x50] sm:$0xff] }
 0x253   :  { %v522_v9 = vmax.f32 %v492_v7, 0.0  ;;  %v9665_v10 = vpop.f32.mrb[14].mxu0  ;;  %10271 = vmatprep.subr.bf16.mxu1 %v10270_v6  ;;  %10303 = vmatprep.subr.bf16.mxu0 %v10270_v6 }
 0x254   :  { %v507_v11 = vadd.f32 %v9665_v10, %v12274_v25  ;;  %v501_v12 = vpop.f32.mrb[15].mxu0  ;;  %10273 = vmatpush3.bf16.msra.mxu1 %v10270_v6  ;;  %10305 = vmatpush3.bf16.msra.mxu0 %v10270_v6 }
 0x255   :  { %v10274_v13 = vpack.c.bf16 %v523_v8, %v522_v9  ;;  %v502_v14 = vadd.f32 %v12274_v25, %v501_v12  ;;  %v804_v25 = vld [vmem:[#allocation6 + $0x60] sm:$0xff]  ;;  %v1684_v9 = vld [vmem:[#allocation7 + $0x48] sm:$0xff]  ;;  %v1878_v12 = vld [vmem:[#allocation7 + $0x58] sm:$0xff] }
 0x256   :  { %v525_v15 = vmax.f32 %v507_v11, 0.0  ;;  %v1683_v8 = vld [vmem:[#allocation7 + $0x40] sm:$0xff]  ;;  %v1877_v11 = vld [vmem:[#allocation7 + $0x50] sm:$0xff] }
 0x257   :  { %v524_v16 = vmax.f32 %v502_v14, 0.0  ;;  %10275 = vmatprep.subr.bf16.mxu1 %v10274_v13  ;;  %10307 = vmatprep.subr.bf16.mxu0 %v10274_v13  ;;  %v10426_v10 = vpack.c.bf16 %v1684_v9, %v1683_v8  ;;  %v2071_v14 = vld [vmem:[#allocation7 + $0x60] sm:$0xff]  ;;  %v8664_v9 = vld [vmem:[%s13047_s20 + $0x78] sm:$0xff] }
 0x258   :  { %10277 = vmatpush3.bf16.msra.mxu1 %v10274_v13  ;;  %10309 = vmatpush3.bf16.msra.mxu0 %v10274_v13 }
 0x259   :  { %v10278_v17 = vpack.c.bf16 %v525_v15, %v524_v16  ;;  %v2072_v15 = vld [vmem:[#allocation7 + $0x68] sm:$0xff] }
 0x25a   :  { %v10450_v16 = vpack.c.bf16 %v2072_v15, %v2071_v14  ;;  %v8674_v14 = vld [vmem:[%s13047_s20 + $0x88] sm:$0xff] }
 0x25b   :  { %10279 = vmatprep.subr.bf16.mxu1 %v10278_v17  ;;  %10311 = vmatprep.subr.bf16.mxu0 %v10278_v17 }
 0x25c   :  { %10281 = vmatpush3.bf16.msra.mxu1 %v10278_v17  ;;  %10313 = vmatpush3.bf16.msra.mxu0 %v10278_v17 }
 0x25d   :  { %10315 = vmatprep.subr.bf16.mxu1 %v12279_v35  ;;  %10347 = vmatprep.subr.bf16.mxu0 %v12279_v35 }
 0x25f   :  { %9699 = vmatmul.mubr.f32.vlgmr.msra.gmra.mrb[0].mxu1 %v527_v18  ;;  %9737 = vmatmul.mubr.f32.vlgmr.msra.gmra.mrb[16].mxu0 %v617_v19  ;;  %v2266_v18 = vld [vmem:[#allocation7 + $0x78] sm:$0xff] }
 0x260   :  { %10317 = vmatpush3.bf16.msra.mxu1 %v12279_v35  ;;  %10349 = vmatpush3.bf16.msra.mxu0 %v12279_v35  ;;  %v10382_v35 = vpack.c.bf16 %v1008_v33, %v1007_v32 }
 0x261   :  { %10319 = vmatprep.subr.bf16.mxu1 %v12287_v42  ;;  %10351 = vmatprep.subr.bf16.mxu0 %v12287_v42 }
 0x262   :  { %9701 = vmatprep.mubr.f32.mxu1 %v528_v20  ;;  %9739 = vmatprep.mubr.f32.mxu0 %v618_v21  ;;  %v2459_v20 = vld [vmem:[#allocation7 + $0x80] sm:$0xff]  ;;  %v2460_v21 = vld [vmem:[#allocation7 + $0x88] sm:$0xff] }
 0x263   :  { %9702 = vmatmul.mubr.f32.gmra.mrb[2].mxu1 %v529_v22  ;;  %9740 = vmatmul.mubr.f32.gmra.mrb[18].mxu0 %v619_v23  ;;  %v10474_v22 = vpack.c.bf16 %v2460_v21, %v2459_v20  ;;  %v8633_v23 = vld [vmem:[%s13047_s20 + $0x20] sm:$0xff] }
 0x264   :  { %10321 = vmatpush3.bf16.msra.mxu1 %v12287_v42  ;;  %10353 = vmatpush3.bf16.msra.mxu0 %v12287_v42  ;;  %v8685_v21 = vld [vmem:[%s13047_s20 + $0xa0] sm:$0xff] }
 0x265   :  { %10323 = vmatprep.subr.bf16.mxu1 %v12295_v49  ;;  %10355 = vmatprep.subr.bf16.mxu0 %v12295_v49 }
 0x266   :  { %9774 = vmatprep.mubr.f32.mxu1 %v710_v24  ;;  %9812 = vmatprep.mubr.f32.mxu0 %v804_v25 }
 0x268   :  { %10325 = vmatpush3.bf16.msra.mxu1 %v12295_v49  ;;  %10357 = vmatpush3.bf16.msra.mxu0 %v12295_v49 }
 0x269   :  { %10327 = vmatprep.subr.bf16.mxu1 %v12303_v56  ;;  %10359 = vmatprep.subr.bf16.mxu0 %v12303_v56 }
 0x26c   :  { %10329 = vmatpush3.bf16.msra.mxu1 %v12303_v56  ;;  %10361 = vmatpush3.bf16.msra.mxu0 %v12303_v56 }
 0x26d   :  { %10331 = vmatprep.subr.bf16.mxu1 %v12311_v63  ;;  %10363 = vmatprep.subr.bf16.mxu0 %v12311_v63 }
 0x270   :  { %10333 = vmatpush3.bf16.msra.mxu1 %v12311_v63  ;;  %10365 = vmatpush3.bf16.msra.mxu0 %v12311_v63 }
 0x271   :  { %10335 = vmatprep.subr.bf16.mxu1 %v10270_v6  ;;  %10367 = vmatprep.subr.bf16.mxu0 %v10270_v6 }
 0x274   :  { %10337 = vmatpush3.bf16.msra.mxu1 %v10270_v6  ;;  %10369 = vmatpush3.bf16.msra.mxu0 %v10270_v6 }
 0x275   :  { %10339 = vmatprep.subr.bf16.mxu1 %v10274_v13  ;;  %10371 = vmatprep.subr.bf16.mxu0 %v10274_v13 }
 0x278   :  { %10341 = vmatpush3.bf16.msra.mxu1 %v10274_v13  ;;  %10373 = vmatpush3.bf16.msra.mxu0 %v10274_v13  ;;  %v10438_v13 = vpack.c.bf16 %v1878_v12, %v1877_v11  ;;  %v8673_v11 = vld [vmem:[%s13047_s20 + $0x80] sm:$0xff] }
 0x279   :  { %10343 = vmatprep.subr.bf16.mxu1 %v10278_v17  ;;  %10375 = vmatprep.subr.bf16.mxu0 %v10278_v17 }
 0x27c   :  { %10345 = vmatpush3.bf16.msra.mxu1 %v10278_v17  ;;  %10377 = vmatpush3.bf16.msra.mxu0 %v10278_v17  ;;  %v2265_v17 = vld [vmem:[#allocation7 + $0x70] sm:$0xff] }
 0x27d   :  { %10383 = vmatprep.subr.bf16.mxu1 %v10382_v35  ;;  %10379 = vmatprep.subr.bf16.mxu0 %v10378_v37  ;;  %v10462_v19 = vpack.c.bf16 %v2266_v18, %v2265_v17 }
 0x27f   :  { %9775 = vmatmul.mubr.f32.vlgmr.msra.gmra.mrb[4].mxu1 %v711_v26  ;;  %9813 = vmatmul.mubr.f32.vlgmr.msra.gmra.mrb[20].mxu0 %v805_v27 }
 0x280   :  { %9777 = vmatprep.mubr.f32.mxu1 %v712_v28  ;;  %9815 = vmatprep.mubr.f32.mxu0 %v806_v29 }
 0x281   :  { %10385 = vmatpush3.bf16.msra.mxu1 %v10382_v35  ;;  %10381 = vmatpush3.bf16.msra.mxu0 %v10378_v37 }
 0x282   :  { %10403 = vmatprep.subr.bf16.mxu1 %v10402_v40 }
 0x283   :  { %9778 = vmatmul.mubr.f32.gmra.mrb[6].mxu1 %v713_v30  ;;  %9816 = vmatmul.mubr.f32.gmra.mrb[22].mxu0 %v807_v31 }
 0x332   :  { %v9700_v41 = vpop.f32.mrb[0].mxu1  ;;  %v9738_v42 = vpop.f32.mrb[16].mxu0 }
 0x333   :  { %v706_v43 = vmax.f32 %v9700_v41, %v9738_v42  ;;  %v596_v44 = vpop.f32.mrb[1].mxu1  ;;  %v686_v45 = vpop.f32.mrb[17].mxu0 }
 0x334   :  { %v705_v46 = vmax.f32 %v596_v44, %v686_v45  ;;  %v897_v45 = vld [vmem:[%s13047_s20] sm:$0xff] }
 0x336   :  { %v9703_v47 = vpop.f32.mrb[2].mxu1  ;;  %v9741_v48 = vpop.f32.mrb[18].mxu0 }
 0x337   :  { %v708_v49 = vmax.f32 %v9703_v47, %v9741_v48  ;;  %v606_v50 = vpop.f32.mrb[3].mxu1  ;;  %v696_v51 = vpop.f32.mrb[19].mxu0  ;;  %v898_v48 = vld [vmem:[%s13047_s20 + $0x8] sm:$0xff] }
 0x338   :  { %v707_v52 = vmax.f32 %v606_v50, %v696_v51  ;;  %v899_v50 = vld [vmem:[%s13047_s20 + $0x10] sm:$0xff] }
 0x352   :  { %v9776_v53 = vpop.f32.mrb[4].mxu1  ;;  %v9814_v54 = vpop.f32.mrb[20].mxu0 }
 0x353   :  { %v800_v55 = vmax.f32 %v706_v43, %v9776_v53  ;;  %v780_v56 = vpop.f32.mrb[5].mxu1  ;;  %v874_v57 = vpop.f32.mrb[21].mxu0  ;;  %v8636_v43 = vld [vmem:[%s13047_s20 + $0x38] sm:$0xff] }
 0x354   :  { %v799_v58 = vmax.f32 %v705_v46, %v780_v56  ;;  %v900_v53 = vld [vmem:[%s13047_s20 + $0x18] sm:$0xff] }
 0x355   :  { %v12342_v61 = vmax.f32 %v800_v55, %v9814_v54  ;;  %v8649_v55 = vld [vmem:[%s13047_s20 + $0x40] sm:$0xff] }
 0x356   :  { %v12344_v62 = vmax.f32 %v799_v58, %v874_v57  ;;  %v9779_v63 = vpop.f32.mrb[6].mxu1  ;;  %v9817_v0 = vpop.f32.mrb[22].mxu0  ;;  %v8650_v58 = vld [vmem:[%s13047_s20 + $0x48] sm:$0xff] }
 0x357   :  { %v802_v1 = vmax.f32 %v708_v49, %v9779_v63  ;;  %v790_v2 = vpop.f32.mrb[7].mxu1  ;;  %v884_v3 = vpop.f32.mrb[23].mxu0  ;;  %v8652_v63 = vld [vmem:[%s13047_s20 + $0x58] sm:$0xff] }
 0x358   :  { %v801_v5 = vmax.f32 %v707_v52, %v790_v2  ;;  %9822 = vmatprep.mubr.msk.f32.mxu0 %vm903_vm2, %v12344_v62  ;;  %9832 = vmatprep.mubr.msk.f32.mxu1 %vm903_vm2, %v12344_v62 }
 0x359   :  { %v12350_v6 = vmax.f32 %v802_v1, %v9817_v0  ;;  %9823 = vmatmul.mubr.msk.f32.vlgmr.msra.gmra.mrb[24].mxu0 %vm903_vm2, %v12342_v61  ;;  %9833 = vmatmul.mubr.msk.f32.vlgmr.msra.gmra.mrb[8].mxu1 %vm903_vm2, %v12342_v61  ;;  %v8661_v1 = vld [vmem:[%s13047_s20 + $0x60] sm:$0xff] }
 0x35a   :  { %v895_v7 = vmax.f32 %v801_v5, %v884_v3  ;;  %10405 = vmatpush3.bf16.msra.mxu1 %v10402_v40  ;;  %v8635_v40 = vld [vmem:[%s13047_s20 + $0x30] sm:$0xff] }
 0x35b   :  { %10415 = vmatprep.subr.bf16.mxu1 %v10414_v4 }
 0x35c   :  { %9825 = vmatprep.mubr.msk.f32.mxu0 %vm903_vm2, %v895_v7  ;;  %9835 = vmatprep.mubr.msk.f32.mxu1 %vm903_vm2, %v895_v7 }
 0x35d   :  { %9826 = vmatmul.mubr.msk.f32.gmra.mrb[26].mxu0 %vm903_vm2, %v12350_v6  ;;  %9836 = vmatmul.mubr.msk.f32.gmra.mrb[10].mxu1 %vm903_vm2, %v12350_v6 }
 0x35e   :  { %9870 = vmatprep.mubr.msk.f32.mxu1 %vm903_vm2, %v12344_v62  ;;  %9846 = vmatprep.mubr.msk.f32.mxu0 %vm1094_vm3, %v8633_v23 }
 0x361   :  { %9871 = vmatmul.mubr.msk.f32.vlgmr.msra.gmra.mrb[12].mxu1 %vm903_vm2, %v12342_v61 }
 0x362   :  { %9873 = vmatprep.mubr.msk.f32.mxu1 %vm903_vm2, %v895_v7  ;;  %10417 = vmatpush3.bf16.msra.mxu1 %v10414_v4  ;;  %v8662_v4 = vld [vmem:[%s13047_s20 + $0x68] sm:$0xff] }
 0x363   :  { %10427 = vmatprep.subr.bf16.mxu1 %v10426_v10 }
 0x365   :  { %9874 = vmatmul.mubr.msk.f32.gmra.mrb[14].mxu1 %vm903_vm2, %v12350_v6 }
 0x366   :  { %9894 = vmatprep.mubr.msk.f32.mxu1 %vm903_vm2, %v12344_v62 }
 0x369   :  { %9895 = vmatmul.mubr.msk.f32.vlgmr.msra.gmra.mrb[16].mxu1 %vm903_vm2, %v12342_v61 }
 0x36a   :  { %9897 = vmatprep.mubr.msk.f32.mxu1 %vm903_vm2, %v895_v7  ;;  %10429 = vmatpush3.bf16.msra.mxu1 %v10426_v10 }
 0x36b   :  { %10439 = vmatprep.subr.bf16.mxu1 %v10438_v13 }
 0x36d   :  { %9898 = vmatmul.mubr.msk.f32.gmra.mrb[18].mxu1 %vm903_vm2, %v12350_v6 }
 0x36e   :  { %9918 = vmatprep.mubr.msk.f32.mxu1 %vm903_vm2, %v12344_v62 }
 0x371   :  { %9919 = vmatmul.mubr.msk.f32.vlgmr.msra.gmra.mrb[20].mxu1 %vm903_vm2, %v12342_v61 }
 0x372   :  { %9921 = vmatprep.mubr.msk.f32.mxu1 %vm903_vm2, %v895_v7  ;;  %10441 = vmatpush3.bf16.msra.mxu1 %v10438_v13 }
 0x373   :  { %10451 = vmatprep.subr.bf16.mxu1 %v10450_v16 }
 0x375   :  { %9922 = vmatmul.mubr.msk.f32.gmra.mrb[22].mxu1 %vm903_vm2, %v12350_v6 }
 0x376   :  { %9942 = vmatprep.mubr.msk.f32.mxu1 %vm903_vm2, %v12344_v62 }
 0x379   :  { %9943 = vmatmul.mubr.msk.f32.vlgmr.msra.gmra.mrb[24].mxu1 %vm903_vm2, %v12342_v61 }
 0x37a   :  { %9945 = vmatprep.mubr.msk.f32.mxu1 %vm903_vm2, %v895_v7  ;;  %10453 = vmatpush3.bf16.msra.mxu1 %v10450_v16  ;;  %v8675_v16 = vld [vmem:[%s13047_s20 + $0x90] sm:$0xff] }
 0x37b   :  { %10463 = vmatprep.subr.bf16.mxu1 %v10462_v19 }
 0x37d   :  { %9946 = vmatmul.mubr.msk.f32.gmra.mrb[26].mxu1 %vm903_vm2, %v12350_v6 }
 0x37e   :  { %9966 = vmatprep.mubr.msk.f32.mxu1 %vm903_vm2, %v12344_v62 }
 0x381   :  { %9967 = vmatmul.mubr.msk.f32.vlgmr.msra.gmra.mrb[28].mxu1 %vm903_vm2, %v12342_v61 }
 0x382   :  { %9969 = vmatprep.mubr.msk.f32.mxu1 %vm903_vm2, %v895_v7  ;;  %10465 = vmatpush3.bf16.msra.mxu1 %v10462_v19  ;;  %v8676_v19 = vld [vmem:[%s13047_s20 + $0x98] sm:$0xff] }
 0x383   :  { %10475 = vmatprep.subr.bf16.mxu1 %v10474_v22 }
 0x385   :  { %9970 = vmatmul.mubr.msk.f32.gmra.mrb[30].mxu1 %vm903_vm2, %v12350_v6 }
 0x386   :  { %9990 = vmatprep.mubr.msk.f32.mxu1 %vm903_vm2, %v12344_v62 }
 0x389   :  { %9991 = vmatmul.mubr.msk.f32.vlgmr.msra.gmra.mrb[32].mxu1 %vm903_vm2, %v12342_v61 }
 0x38a   :  { %9993 = vmatprep.mubr.msk.f32.mxu1 %vm903_vm2, %v895_v7  ;;  %10477 = vmatpush3.bf16.msra.mxu1 %v10474_v22 }
 0x38d   :  { %9994 = vmatmul.mubr.msk.f32.gmra.mrb[34].mxu1 %vm903_vm2, %v12350_v6 }
 0x38e   :  { %10014 = vmatprep.mubr.msk.f32.mxu1 %vm903_vm2, %v12344_v62 }
 0x391   :  { %10015 = vmatmul.mubr.msk.f32.vlgmr.msra.gmra.mrb[36].mxu1 %vm903_vm2, %v12342_v61 }
 0x392   :  { %10017 = vmatprep.mubr.msk.f32.mxu1 %vm903_vm2, %v895_v7 }
 0x395   :  { %10018 = vmatmul.mubr.msk.f32.gmra.mrb[38].mxu1 %vm903_vm2, %v12350_v6  ;;  %v8663_v6 = vld [vmem:[%s13047_s20 + $0x70] sm:$0xff] }
 0x42c   :  { %v9824_v24 = vpop.f32.mrb[24].mxu0  ;;  %v9834_v25 = vpop.f32.mrb[8].mxu1 }
 0x42d   :  { %v982_v26 = vpop.f32.mrb[25].mxu0  ;;  %v1075_v27 = vpop.f32.mrb[9].mxu1 }
 0x42e   :  { %v10394_v28 = vpack.c.bf16 %v9824_v24, %v982_v26  ;;  %v10386_v29 = vpack.c.bf16 %v9834_v25, %v1075_v27  ;;  %v8686_v24 = vld [vmem:[%s13047_s20 + $0xa8] sm:$0xff]  ;;  %v8687_v26 = vld [vmem:[%s13047_s20 + $0xb0] sm:$0xff] }
 0x430   :  { %v9827_v30 = vpop.f32.mrb[26].mxu0  ;;  %v9837_v31 = vpop.f32.mrb[10].mxu1  ;;  %10387 = vmatprep.subr.bf16.mxu0 %v10386_v29 }
 0x431   :  { %v992_v32 = vpop.f32.mrb[27].mxu0  ;;  %v1085_v33 = vpop.f32.mrb[11].mxu1  ;;  %10389 = vmatpush3.bf16.msra.mxu0 %v10386_v29  ;;  %v8688_v29 = vld [vmem:[%s13047_s20 + $0xb8] sm:$0xff] }
 0x432   :  { %v10398_v34 = vpack.c.bf16 %v9827_v30, %v992_v32  ;;  %v10390_v35 = vpack.c.bf16 %v9837_v31, %v1085_v33  ;;  %v8697_v31 = vld [vmem:[%s13047_s20 + $0xc0] sm:$0xff] }
 0x434   :  { %10391 = vmatprep.subr.bf16.mxu0 %v10390_v35  ;;  %v9872_v36 = vpop.f32.mrb[12].mxu1 }
 0x435   :  { %10393 = vmatpush3.bf16.msra.mxu0 %v10390_v35  ;;  %v1363_v37 = vpop.f32.mrb[13].mxu1 }
 0x436   :  { %v10406_v39 = vpack.c.bf16 %v9872_v36, %v1363_v37  ;;  %10395 = vmatprep.subr.bf16.mxu0 %v10394_v28  ;;  %v8699_v36 = vld [vmem:[%s13047_s20 + $0xd0] sm:$0xff] }
 0x438   :  { %9847 = vmatmul.mubr.msk.f32.vlgmr.msra.gmra.mrb[28].mxu0 %vm1094_vm3, %v8634_v38  ;;  %v9875_v41 = vpop.f32.mrb[14].mxu1 }
 0x439   :  { %10397 = vmatpush3.bf16.msra.mxu0 %v10394_v28  ;;  %v1373_v42 = vpop.f32.mrb[15].mxu1  ;;  %9849 = vmatprep.mubr.msk.f32.mxu0 %vm1094_vm3, %v8635_v40 }
 0x43a   :  { %v10410_v44 = vpack.c.bf16 %v9875_v41, %v1373_v42  ;;  %10399 = vmatprep.subr.bf16.mxu0 %v10398_v34  ;;  %v8709_v41 = vld [vmem:[%s13047_s20 + $0xe0] sm:$0xff]  ;;  %v8710_v42 = vld [vmem:[%s13047_s20 + $0xe8] sm:$0xff] }
 0x43c   :  { %9850 = vmatmul.mubr.msk.f32.gmra.mrb[30].mxu0 %vm1094_vm3, %v8636_v43  ;;  %v9896_v46 = vpop.f32.mrb[16].mxu1  ;;  %v8711_v43 = vld [vmem:[%s13047_s20 + $0xf0] sm:$0xff] }
 0x43d   :  { %10401 = vmatpush3.bf16.msra.mxu0 %v10398_v34  ;;  %v1557_v47 = vpop.f32.mrb[17].mxu1  ;;  %9860 = vmatprep.mubr.msk.f32.mxu0 %vm1094_vm3, %v897_v45  ;;  %v8698_v34 = vld [vmem:[%s13047_s20 + $0xc8] sm:$0xff]  ;;  %v8721_v45 = vld [vmem:[%s13047_s20 + $0x100] sm:$0xff] }
 0x43e   :  { %v10418_v49 = vpack.c.bf16 %v9896_v46, %v1557_v47  ;;  %10407 = vmatprep.subr.bf16.mxu0 %v10406_v39  ;;  %v8722_v46 = vld [vmem:[%s13047_s20 + $0x108] sm:$0xff]  ;;  %v8723_v47 = vld [vmem:[%s13047_s20 + $0x110] sm:$0xff] }
 0x440   :  { %9861 = vmatmul.mubr.msk.f32.vlgmr.msra.gmra.mrb[28].mxu0 %vm1094_vm3, %v898_v48  ;;  %v9899_v51 = vpop.f32.mrb[18].mxu1  ;;  %v8724_v48 = vld [vmem:[%s13047_s20 + $0x118] sm:$0xff] }
 0x441   :  { %10409 = vmatpush3.bf16.msra.mxu0 %v10406_v39  ;;  %v1567_v52 = vpop.f32.mrb[19].mxu1  ;;  %9863 = vmatprep.mubr.msk.f32.mxu0 %vm1094_vm3, %v899_v50  ;;  %v8700_v39 = vld [vmem:[%s13047_s20 + $0xd8] sm:$0xff]  ;;  %v11845_v50 = vmov 0.0  }
 0x442   :  { %v10422_v54 = vpack.c.bf16 %v9899_v51, %v1567_v52  ;;  %10411 = vmatprep.subr.bf16.mxu0 %v10410_v44  ;;  %10042 = vmatprep.mubr.msk.f32.mxu1 %vm11844_vm4, %v11845_v50  ;;  %v8733_v51 = vld [vmem:[#allocation9] ss:$0 sm:$0xff] }
 0x444   :  { %9864 = vmatmul.mubr.msk.f32.gmra.mrb[30].mxu0 %vm1094_vm3, %v900_v53  ;;  %v9920_v56 = vpop.f32.mrb[20].mxu1 }
 0x445   :  { %10413 = vmatpush3.bf16.msra.mxu0 %v10410_v44  ;;  %v1751_v57 = vpop.f32.mrb[21].mxu1  ;;  %9884 = vmatprep.mubr.msk.f32.mxu0 %vm1094_vm3, %v8649_v55  ;;  %v8712_v44 = vld [vmem:[%s13047_s20 + $0xf8] sm:$0xff] }
 0x446   :  { %v10430_v59 = vpack.c.bf16 %v9920_v56, %v1751_v57  ;;  %10419 = vmatprep.subr.bf16.mxu0 %v10418_v49 }
 0x448   :  { %9885 = vmatmul.mubr.msk.f32.vlgmr.msra.gmra.mrb[28].mxu0 %vm1094_vm3, %v8650_v58  ;;  %v9923_v61 = vpop.f32.mrb[22].mxu1 }
 0x449   :  { %10421 = vmatpush3.bf16.msra.mxu0 %v10418_v49  ;;  %v1761_v62 = vpop.f32.mrb[23].mxu1  ;;  %9887 = vmatprep.mubr.msk.f32.mxu0 %vm1094_vm3, %v8651_v60  ;;  %v11843_v49 = vmov 0.0|0.0  }
 0x44a   :  { %v10434_v0 = vpack.c.bf16 %v9923_v61, %v1761_v62  ;;  %10423 = vmatprep.subr.bf16.mxu0 %v10422_v54  ;;  %10486 = vmatprep.subr.bf16.mxu1 %v11843_v49 }
 0x44c   :  { %9888 = vmatmul.mubr.msk.f32.gmra.mrb[30].mxu0 %vm1094_vm3, %v8652_v63  ;;  %v9944_v2 = vpop.f32.mrb[24].mxu1 }
 0x44d   :  { %10425 = vmatpush3.bf16.msra.mxu0 %v10422_v54  ;;  %v1945_v3 = vpop.f32.mrb[25].mxu1  ;;  %9908 = vmatprep.mubr.msk.f32.mxu0 %vm1094_vm3, %v8661_v1 }
 0x44e   :  { %v10442_v5 = vpack.c.bf16 %v9944_v2, %v1945_v3  ;;  %10431 = vmatprep.subr.bf16.mxu0 %v10430_v59  ;;  %v2662_v2 = vld [vmem:[#allocation10] sm:$0xff]  ;;  %v2813_v3 = vld [vmem:[#allocation10 + $0x10] sm:$0xff] }
 0x450   :  { %9909 = vmatmul.mubr.msk.f32.vlgmr.msra.gmra.mrb[28].mxu0 %vm1094_vm3, %v8662_v4  ;;  %v9947_v7 = vpop.f32.mrb[26].mxu1  ;;  %v2737_v4 = vld [vmem:[#allocation10 + $0x8] sm:$0xff] }
 0x451   :  { %10433 = vmatpush3.bf16.msra.mxu0 %v10430_v59  ;;  %v1955_v8 = vpop.f32.mrb[27].mxu1  ;;  %9911 = vmatprep.mubr.msk.f32.mxu0 %vm1094_vm3, %v8663_v6  ;;  %v3045_v6 = vld [vmem:[#allocation12 + $0x20] sm:$0xff] }
 0x452   :  { %v10446_v10 = vpack.c.bf16 %v9947_v7, %v1955_v8  ;;  %10435 = vmatprep.subr.bf16.mxu0 %v10434_v0  ;;  %v3046_v7 = vld [vmem:[#allocation12 + $0x28] sm:$0xff] }
 0x453   :  { %v10517_v8 = vpack.c.bf16 %v3046_v7, %v3045_v6 }
 0x454   :  { %9912 = vmatmul.mubr.msk.f32.gmra.mrb[30].mxu0 %vm1094_vm3, %v8664_v9  ;;  %v9968_v12 = vpop.f32.mrb[28].mxu1  ;;  %v2965_v9 = vld [vmem:[#allocation12] sm:$0xff] }
 0x455   :  { %10437 = vmatpush3.bf16.msra.mxu0 %v10434_v0  ;;  %v2139_v13 = vpop.f32.mrb[29].mxu1  ;;  %9932 = vmatprep.mubr.msk.f32.mxu0 %vm1094_vm3, %v8673_v11 }
 0x456   :  { %v10454_v15 = vpack.c.bf16 %v9968_v12, %v2139_v13  ;;  %10443 = vmatprep.subr.bf16.mxu0 %v10442_v5  ;;  %v3047_v12 = vld [vmem:[#allocation12 + $0x30] sm:$0xff]  ;;  %v3048_v13 = vld [vmem:[#allocation12 + $0x38] sm:$0xff] }
 0x458   :  { %9933 = vmatmul.mubr.msk.f32.vlgmr.msra.gmra.mrb[28].mxu0 %vm1094_vm3, %v8674_v14  ;;  %v9971_v17 = vpop.f32.mrb[30].mxu1  ;;  %v10520_v14 = vpack.c.bf16 %v3048_v13, %v3047_v12  ;;  %v3724_v13 = vld [vmem:[#allocation12 + $0xb0] sm:$0xff] }
 0x459   :  { %10445 = vmatpush3.bf16.msra.mxu0 %v10442_v5  ;;  %v2149_v18 = vpop.f32.mrb[31].mxu1  ;;  %9935 = vmatprep.mubr.msk.f32.mxu0 %vm1094_vm3, %v8675_v16  ;;  %v2889_v5 = vld [vmem:[#allocation10 + $0x18] sm:$0xff] }
 0x45a   :  { %v10458_v20 = vpack.c.bf16 %v9971_v17, %v2149_v18  ;;  %10447 = vmatprep.subr.bf16.mxu0 %v10446_v10  ;;  %v2968_v16 = vld [vmem:[#allocation12 + $0x18] sm:$0xff] }
 0x45c   :  { %9936 = vmatmul.mubr.msk.f32.gmra.mrb[30].mxu0 %vm1094_vm3, %v8676_v19  ;;  %v9992_v22 = vpop.f32.mrb[32].mxu1 }
 0x45d   :  { %10449 = vmatpush3.bf16.msra.mxu0 %v10446_v10  ;;  %v2333_v23 = vpop.f32.mrb[33].mxu1  ;;  %9956 = vmatprep.mubr.msk.f32.mxu0 %vm1094_vm3, %v8685_v21  ;;  %v2966_v10 = vld [vmem:[#allocation12 + $0x8] sm:$0xff] }
 0x45e   :  { %v10466_v25 = vpack.c.bf16 %v9992_v22, %v2333_v23  ;;  %10455 = vmatprep.subr.bf16.mxu0 %v10454_v15  ;;  %v10511_v11 = vpack.c.bf16 %v2966_v10, %v2965_v9  ;;  %v3723_v9 = vld [vmem:[#allocation12 + $0xa8] sm:$0xff] }
 0x45f   :  { %v8749_v10 = vld [vmem:[%s13012_s9 + $0x20] sm:$0xff] }
 0x460   :  { %9957 = vmatmul.mubr.msk.f32.vlgmr.msra.gmra.mrb[28].mxu0 %vm1094_vm3, %v8686_v24  ;;  %v9995_v27 = vpop.f32.mrb[34].mxu1 }
 0x461   :  { %10457 = vmatpush3.bf16.msra.mxu0 %v10454_v15  ;;  %v2343_v28 = vpop.f32.mrb[35].mxu1  ;;  %9959 = vmatprep.mubr.msk.f32.mxu0 %vm1094_vm3, %v8687_v26  ;;  %v2967_v15 = vld [vmem:[#allocation12 + $0x10] sm:$0xff]  ;;  %v3269_v26 = vld [vmem:[#allocation12 + $0x40] sm:$0xff] }
 0x462   :  { %v10470_v30 = vpack.c.bf16 %v9995_v27, %v2343_v28  ;;  %10459 = vmatprep.subr.bf16.mxu0 %v10458_v20  ;;  %v10514_v17 = vpack.c.bf16 %v2968_v16, %v2967_v15  ;;  %v3270_v27 = vld [vmem:[#allocation12 + $0x48] sm:$0xff] }
 0x464   :  { %9960 = vmatmul.mubr.msk.f32.gmra.mrb[30].mxu0 %vm1094_vm3, %v8688_v29  ;;  %v10016_v32 = vpop.f32.mrb[36].mxu1  ;;  %v10523_v29 = vpack.c.bf16 %v3270_v27, %v3269_v26  ;;  %v3876_v26 = vld [vmem:[#allocation12 + $0xd8] sm:$0xff] }
 0x465   :  { %10461 = vmatpush3.bf16.msra.mxu0 %v10458_v20  ;;  %v2527_v33 = vpop.f32.mrb[37].mxu1  ;;  %9980 = vmatprep.mubr.msk.f32.mxu0 %vm1094_vm3, %v8697_v31 }
 0x466   :  { %v10478_v35 = vpack.c.bf16 %v10016_v32, %v2527_v33  ;;  %10467 = vmatprep.subr.bf16.mxu0 %v10466_v25  ;;  %v3271_v32 = vld [vmem:[#allocation12 + $0x50] sm:$0xff]  ;;  %v3272_v33 = vld [vmem:[#allocation12 + $0x58] sm:$0xff] }
 0x468   :  { %9981 = vmatmul.mubr.msk.f32.vlgmr.msra.gmra.mrb[28].mxu0 %vm1094_vm3, %v8698_v34  ;;  %v10019_v37 = vpop.f32.mrb[38].mxu1  ;;  %v10526_v34 = vpack.c.bf16 %v3272_v33, %v3271_v32  ;;  %v4024_v33 = vld [vmem:[#allocation12 + $0xe0] sm:$0xff] }
 0x469   :  { %10469 = vmatpush3.bf16.msra.mxu0 %v10466_v25  ;;  %v2537_v38 = vpop.f32.mrb[39].mxu1  ;;  %9983 = vmatprep.mubr.msk.f32.mxu0 %vm1094_vm3, %v8699_v36 }
 0x46a   :  { %v10482_v40 = vpack.c.bf16 %v10019_v37, %v2537_v38  ;;  %10471 = vmatprep.subr.bf16.mxu0 %v10470_v30 }
 0x46c   :  { %9984 = vmatmul.mubr.msk.f32.gmra.mrb[30].mxu0 %vm1094_vm3, %v8700_v39 }
 0x46d   :  { %10473 = vmatpush3.bf16.msra.mxu0 %v10470_v30  ;;  %10004 = vmatprep.mubr.msk.f32.mxu0 %vm1094_vm3, %v8709_v41  ;;  %v3420_v41 = vld [vmem:[#allocation12 + $0x60] sm:$0xff] }
 0x46e   :  { %10479 = vmatprep.subr.bf16.mxu0 %v10478_v35 }
 0x470   :  { %10005 = vmatmul.mubr.msk.f32.vlgmr.msra.gmra.mrb[28].mxu0 %vm1094_vm3, %v8710_v42  ;;  %v3421_v42 = vld [vmem:[#allocation12 + $0x68] sm:$0xff] }
 0x471   :  { %10481 = vmatpush3.bf16.msra.mxu0 %v10478_v35  ;;  %10007 = vmatprep.mubr.msk.f32.mxu0 %vm1094_vm3, %v8711_v43  ;;  %v8739_v35 = vld [vmem:[%s13012_s9 + $0x8] sm:$0xff]  ;;  %v8743_v43 = vld [vmem:[%s13012_s9 + $0x10] sm:$0xff] }
 0x472   :  { %10483 = vmatprep.subr.bf16.mxu0 %v10482_v40 }
 0x474   :  { %10008 = vmatmul.mubr.msk.f32.gmra.mrb[30].mxu0 %vm1094_vm3, %v8712_v44  ;;  %v10529_v44 = vpack.c.bf16 %v3421_v42, %v3420_v41 }
 0x475   :  { %10485 = vmatpush3.bf16.msra.mxu0 %v10482_v40  ;;  %10028 = vmatprep.mubr.msk.f32.mxu0 %vm1094_vm3, %v8721_v45  ;;  %v2964_v40 = vld [vmem:[%s13012_s9] sm:$0xff] }
 0x476   :  { %10498 = vmatprep.subr.bf16.mxu0 %v11843_v49 }
 0x478   :  { %10029 = vmatmul.mubr.msk.f32.vlgmr.msra.gmra.mrb[28].mxu0 %vm1094_vm3, %v8722_v46  ;;  %v3422_v46 = vld [vmem:[#allocation12 + $0x70] sm:$0xff] }
 0x479   :  { %10031 = vmatprep.mubr.msk.f32.mxu0 %vm1094_vm3, %v8723_v47  ;;  %v3423_v47 = vld [vmem:[#allocation12 + $0x78] sm:$0xff] }
 0x47c   :  { %10032 = vmatmul.mubr.msk.f32.gmra.mrb[30].mxu0 %vm1094_vm3, %v8724_v48 }
 0x47d   :  { %10064 = vmatprep.mubr.msk.f32.mxu0 %vm11844_vm4, %v11845_v50 }
 0x54b   :  { %v10030_v52 = vpop.f32.mrb[28].mxu0 }
 0x54c   :  { %v2655_v53 = vadd.f32 %v10030_v52, %v8733_v51  ;;  %v2624_v54 = vpop.f32.mrb[29].mxu0 }
 0x54d   :  { %v2654_v55 = vadd.f32 %v8733_v51, %v2624_v54 }
 0x54e   :  { %v2659_v56 = vmax.f32 %v2655_v53, 0.0 }
 0x54f   :  { %v2658_v57 = vmax.f32 %v2654_v55, 0.0  ;;  %v10033_v58 = vpop.f32.mrb[30].mxu0 }
 0x550   :  { %v2657_v59 = vadd.f32 %v10033_v58, %v8733_v51  ;;  %v2634_v60 = vpop.f32.mrb[31].mxu0 }
 0x551   :  { %v10487_v61 = vpack.c.bf16 %v2659_v56, %v2658_v57  ;;  %v2656_v62 = vadd.f32 %v8733_v51, %v2634_v60  ;;  %v10532_v51 = vpack.c.bf16 %v3423_v47, %v3422_v46  ;;  %v3571_v60 = vld [vmem:[#allocation12 + $0x80] sm:$0xff]  ;;  %v4176_v46 = vld [vmem:[#allocation12 + $0x108] sm:$0xff] }
 0x552   :  { %v2661_v63 = vmax.f32 %v2657_v59, 0.0  ;;  %v8758_v47 = vld [vmem:[%s13012_s9 + $0x38] sm:$0xff] }
 0x553   :  { %v2660_v0 = vmax.f32 %v2656_v62, 0.0  ;;  %10488 = vmatpush3.bf16.msra.mxu1 %v10487_v61  ;;  %10500 = vmatpush3.bf16.msra.mxu0 %v10487_v61  ;;  %v8746_v62 = vld [vmem:[%s13012_s9 + $0x18] sm:$0xff] }
 0x554   :  { %10489 = vmatprep.subr.bf16.mxu1 %v11843_v49  ;;  %10501 = vmatprep.subr.bf16.mxu0 %v11843_v49 }
 0x555   :  { %v10490_v1 = vpack.c.bf16 %v2661_v63, %v2660_v0 }
 0x557   :  { %10491 = vmatpush3.bf16.msra.mxu1 %v10490_v1  ;;  %10503 = vmatpush3.bf16.msra.mxu0 %v10490_v1 }
 0x558   :  { %10492 = vmatprep.subr.bf16.mxu1 %v11843_v49  ;;  %10510 = vmatprep.subr.bf16.mxu0 %v11843_v49 }
 0x55a   :  { %10043 = vmatmul.mubr.msk.f32.vlgmr.msra.gmra.mrb[40].mxu1 %vm1094_vm3, %v2662_v2  ;;  %10065 = vmatmul.mubr.msk.f32.vlgmr.msra.gmra.mrb[32].mxu0 %vm1094_vm3, %v2813_v3  ;;  %v3574_v2 = vld [vmem:[#allocation12 + $0x98] sm:$0xff] }
 0x55b   :  { %10494 = vmatpush3.bf16.msra.mxu1 %v10487_v61  ;;  %10053 = vmatprep.mubr.msk.f32.mxu1 %vm11844_vm4, %v11845_v50 }
 0x55c   :  { %10495 = vmatprep.subr.bf16.mxu1 %v11843_v49  ;;  %10086 = vmatprep.mubr.msk.f32.mxu0 %vm11844_vm4, %v11845_v50 }
 0x55d   :  { %10512 = vmatpush3.bf16.msra.mxu0 %v10511_v11 }
 0x55e   :  { %10513 = vmatprep.subr.bf16.mxu0 %v11843_v49 }
 0x55f   :  { %10497 = vmatpush3.bf16.msra.mxu1 %v10490_v1 }
 0x560   :  { %10504 = vmatprep.subr.bf16.mxu1 %v11843_v49 }
 0x561   :  { %10515 = vmatpush3.bf16.msra.mxu0 %v10514_v17 }
 0x562   :  { %10054 = vmatmul.mubr.msk.f32.vlgmr.msra.gmra.mrb[42].mxu1 %vm1094_vm3, %v2737_v4  ;;  %10100 = vmatprep.subr.mxu0 %v11845_v50 }
 0x563   :  { %10506 = vmatpush3.bf16.msra.mxu1 %v10487_v61  ;;  %10075 = vmatprep.mubr.msk.f32.mxu1 %vm11844_vm4, %v11845_v50  ;;  %v3572_v61 = vld [vmem:[#allocation12 + $0x88] sm:$0xff] }
 0x564   :  { %10507 = vmatprep.subr.bf16.mxu1 %v11843_v49  ;;  %v10535_v63 = vpack.c.bf16 %v3572_v61, %v3571_v60 }
 0x567   :  { %10509 = vmatpush3.bf16.msra.mxu1 %v10490_v1  ;;  %v3573_v1 = vld [vmem:[#allocation12 + $0x90] sm:$0xff] }
 0x568   :  { %10516 = vmatprep.subr.bf16.mxu1 %v11843_v49  ;;  %v10538_v4 = vpack.c.bf16 %v3574_v2, %v3573_v1  ;;  %v4332_v2 = vld [vmem:[#allocation15] sm:$0x3] }
 0x56a   :  { %10076 = vmatmul.mubr.msk.f32.vlgmr.msra.gmra.mrb[44].mxu1 %vm1094_vm3, %v2889_v5 }
 0x56b   :  { %10097 = vmatprep.mubr.msk.f32.mxu1 %vm11844_vm4, %v11845_v50  ;;  %10518 = vmatpush3.bf16.msra.mxu1 %v10517_v8  ;;  %v3722_v8 = vld [vmem:[#allocation12 + $0xa0] sm:$0xff] }
 0x56c   :  { %10519 = vmatprep.subr.bf16.mxu1 %v11843_v49  ;;  %v10541_v11 = vpack.c.bf16 %v3723_v9, %v3722_v8  ;;  %v10666_v8 = vld [vmem:[#allocation16 + $0x14] ss:$8 sps:$4 sm:$0xff]   ;;  %v10664_v9 = vld [vmem:[#allocation16 + $0x10] ss:$8 sps:$4 sm:$0xff]  }
 0x56f   :  { %10521 = vmatpush3.bf16.msra.mxu1 %v10520_v14  ;;  %v3725_v14 = vld [vmem:[#allocation12 + $0xb8] sm:$0xff] }
 0x570   :  { %10522 = vmatprep.subr.bf16.mxu1 %v11843_v49  ;;  %v10544_v16 = vpack.c.bf16 %v3725_v14, %v3724_v13  ;;  %v4644_v13 = vld [vmem:[#allocation18] sm:$0x77]  ;;  %v10670_v14 = vld [vmem:[#allocation16 + $0x30] ss:$8 sps:$4 sm:$0xff]  }
 0x62d   :  { %v2732_v18 = vpop.f32.mrb[40].mxu1  ;;  %v2883_v19 = vpop.f32.mrb[32].mxu0 }
 0x62e   :  { %v10044_v20 = vpop.f32.mrb[41].mxu1  ;;  %v10066_v21 = vpop.f32.mrb[33].mxu0 }
 0x62f   :  { %v3873_v20 = vld [vmem:[#allocation12 + $0xc0] sm:$0xff]  ;;  %v3874_v21 = vld [vmem:[#allocation12 + $0xc8] sm:$0xff] }
 0x635   :  { %v2807_v22 = vpop.f32.mrb[42].mxu1 }
 0x636   :  { %v2811_v23 = vmax.f32 %v2732_v18, %v2807_v22  ;;  %v10055_v24 = vpop.f32.mrb[43].mxu1  ;;  %v8752_v22 = vld [vmem:[%s13012_s9 + $0x28] sm:$0xff] }
 0x638   :  { %v2887_v25 = vmax.f32 %v2811_v23, %v2883_v19  ;;  %v10547_v23 = vpack.c.bf16 %v3874_v21, %v3873_v20  ;;  %v10682_v20 = vld [vmem:[%s13019_s16 + $0x24] ss:$16 sps:$4 sm:$0xff]   ;;  %v10680_v21 = vld [vmem:[%s13019_s16 + $0x20] ss:$16 sps:$4 sm:$0xff]  }
 0x63d   :  { %v2959_v28 = vpop.f32.mrb[44].mxu1 }
 0x63e   :  { %v12585_v30 = vmax.f32 %v2887_v25, %v2959_v28  ;;  %v10077_v31 = vpop.f32.mrb[45].mxu1  ;;  %v3875_v25 = vld [vmem:[#allocation12 + $0xd0] sm:$0xff] }
 0x63f   :  { %v10550_v28 = vpack.c.bf16 %v3876_v26, %v3875_v25  ;;  %v10692_v25 = vld [vmem:[%s13019_s16 + $0x60] ss:$16 sps:$4 sm:$0xff]   ;;  %v10700_v26 = vld [vmem:[%s13019_s16 + $0x84] ss:$16 sps:$4 sm:$0xff]  }
 0x640   :  { %10087 = vmatmul.mubr.msk.f32.vlgmr.msra.gmra.mrb[34].mxu0 %vm1094_vm3, %v12585_v30  ;;  %10098 = vmatmul.mubr.msk.f32.vlgmr.msra.gmra.mrb[46].mxu1 %vm1094_vm3, %v12585_v30 }
 0x641   :  { %10524 = vmatpush3.bf16.msra.mxu1 %v10523_v29  ;;  %10118 = vmatprep.mubr.msk.f32.mxu1 %vm11844_vm4, %v11845_v50 }
 0x642   :  { %10525 = vmatprep.subr.bf16.mxu1 %v11843_v49  ;;  %10102 = vmatprep.mubr.msk.f32.mxu0 %vm11844_vm4, %v11845_v50 }
 0x645   :  { %10527 = vmatpush3.bf16.msra.mxu1 %v10526_v34  ;;  %v4025_v34 = vld [vmem:[#allocation12 + $0xe8] sm:$0xff] }
 0x646   :  { %10137 = vmatprep.subr.mxu1 %v11845_v50 }
 0x648   :  { %10119 = vmatmul.mubr.msk.f32.vlgmr.msra.gmra.mrb[48].mxu1 %vm1094_vm3, %v12585_v30 }
 0x649   :  { %10139 = vmatprep.mubr.msk.f32.mxu1 %vm11844_vm4, %v11845_v50 }
 0x713   :  { %v3038_v36 = vpop.f32.mrb[34].mxu0  ;;  %v3115_v37 = vpop.f32.mrb[46].mxu1 }
 0x714   :  { %v10088_v38 = vpop.f32.mrb[35].mxu0  ;;  %v10099_v39 = vpop.f32.mrb[47].mxu1  ;;  %10101 = vmatpush3.msra.mxu0 %v3115_v37 }
 0x715   :  { %10103 = vmatmul.mubr.msk.f32.vlgmr.msra.gmra.mrb[36].mxu0 %vm3119_vm5, %v8739_v35  ;;  %10105 = vmatprep.subr.mxu0 %v11845_v50  ;;  %v8755_v35 = vld [vmem:[%s13012_s9 + $0x30] sm:$0xff]  ;;  %v4026_v38 = vld [vmem:[#allocation12 + $0xf0] sm:$0xff] }
 0x716   :  { %10106 = vmatpush3.msra.mxu0 %v3038_v36  ;;  %10107 = vmatprep.mubr.msk.f32.mxu0 %vm11844_vm4, %v11845_v50  ;;  %v10553_v36 = vpack.c.bf16 %v4025_v34, %v4024_v33  ;;  %v4027_v39 = vld [vmem:[#allocation12 + $0xf8] sm:$0xff] }
 0x717   :  { %10121 = vmatprep.subr.mxu0 %v11845_v50  ;;  %v10556_v41 = vpack.c.bf16 %v4027_v39, %v4026_v38  ;;  %v10718_v33 = vld [vmem:[%s13019_s16 + $0xe4] ss:$16 sps:$4 sm:$0xff]   ;;  %v10716_v34 = vld [vmem:[%s13019_s16 + $0xe0] ss:$16 sps:$4 sm:$0xff]  }
 0x718   :  { %v10728_v38 = vld [vmem:[%s13019_s16 + $0x120] ss:$16 sps:$4 sm:$0xff]   ;;  %v10736_v39 = vld [vmem:[%s13019_s16 + $0x144] ss:$16 sps:$4 sm:$0xff]  }
 0x719   :  { %10108 = vmatmul.mubr.msk.f32.vlgmr.msra.gmra.mrb[38].mxu0 %vm3119_vm5, %v2964_v40 }
 0x71a   :  { %10123 = vmatprep.mubr.msk.f32.mxu0 %vm11844_vm4, %v11845_v50 }
 0x71b   :  { %v3339_v45 = vpop.f32.mrb[48].mxu1 }
 0x71c   :  { %v10120_v48 = vpop.f32.mrb[49].mxu1  ;;  %10122 = vmatpush3.msra.mxu0 %v3339_v45  ;;  %v4175_v45 = vld [vmem:[#allocation12 + $0x100] sm:$0xff] }
 0x71d   :  { %10528 = vmatprep.subr.bf16.mxu0 %v11843_v49  ;;  %10124 = vmatmul.mubr.msk.f32.vlgmr.msra.gmra.mrb[40].mxu0 %vm3119_vm5, %v8743_v43  ;;  %v10559_v48 = vpack.c.bf16 %v4176_v46, %v4175_v45  ;;  %v10754_v45 = vld [vmem:[%s13019_s16 + $0x1a4] ss:$16 sps:$4 sm:$0xff]   ;;  %v10752_v46 = vld [vmem:[%s13019_s16 + $0x1a0] ss:$16 sps:$4 sm:$0xff]  }
 0x71e   :  { %10530 = vmatpush3.bf16.msra.mxu0 %v10529_v44  ;;  %10134 = vmatprep.mubr.msk.f32.mxu0 %vm11844_vm4, %v11845_v50 }
 0x71f   :  { %10531 = vmatprep.subr.bf16.mxu0 %v11843_v49 }
 0x722   :  { %10533 = vmatpush3.bf16.msra.mxu0 %v10532_v51 }
 0x723   :  { %10153 = vmatprep.subr.mxu0 %v11845_v50 }
 0x725   :  { %10135 = vmatmul.mubr.msk.f32.vlgmr.msra.gmra.mrb[42].mxu0 %vm1094_vm3, %v12585_v30 }
 0x726   :  { %10155 = vmatprep.mubr.msk.f32.mxu0 %vm11844_vm4, %v11845_v50 }
 0x7e8   :  { %v3189_v52 = vpop.f32.mrb[36].mxu0 }
 0x7e9   :  { %v10104_v53 = vpop.f32.mrb[37].mxu0 }
 0x7ea   :  { %v4178_v53 = vld [vmem:[#allocation12 + $0x118] sm:$0xff] }
 0x7ec   :  { %v3262_v54 = vpop.f32.mrb[38].mxu0 }
 0x7ed   :  { %v3263_v55 = vadd.f32 %v3262_v54, %v3189_v52  ;;  %v10109_v56 = vpop.f32.mrb[39].mxu0  ;;  %v4177_v52 = vld [vmem:[#allocation12 + $0x110] sm:$0xff] }
 0x7f0   :  { %v3412_v57 = vpop.f32.mrb[40].mxu0 }
 0x7f1   :  { %v3416_v58 = vadd.f32 %v3412_v57, %v3263_v55  ;;  %v10125_v59 = vpop.f32.mrb[41].mxu0  ;;  %v10562_v55 = vpack.c.bf16 %v4178_v53, %v4177_v52 }
 0x7f2   :  { %v8761_v59 = vld [vmem:[%s13012_s9 + $0x40] sm:$0xff] }
 0x7f8   :  { %v3490_v0 = vpop.f32.mrb[42].mxu0 }
 0x7f9   :  { %v10136_v3 = vpop.f32.mrb[43].mxu0  ;;  %10138 = vmatpush3.msra.mxu1 %v3490_v0 }
 0x7fa   :  { %10140 = vmatmul.mubr.msk.f32.vlgmr.msra.gmra.mrb[50].mxu1 %vm3119_vm5, %v8746_v62  ;;  %10534 = vmatprep.subr.bf16.mxu1 %v11843_v49  ;;  %v4407_v3 = vld [vmem:[#allocation15 + $0x2] sm:$0x3] }
 0x7fb   :  { %10536 = vmatpush3.bf16.msra.mxu1 %v10535_v63  ;;  %10150 = vmatprep.mubr.msk.f32.mxu1 %vm11844_vm4, %v11845_v50 }
 0x7fc   :  { %10537 = vmatprep.subr.bf16.mxu1 %v11843_v49 }
 0x7ff   :  { %10539 = vmatpush3.bf16.msra.mxu1 %v10538_v4  ;;  %v10663_v4 = vld [vmem:[#allocation16 + $0x4] ss:$8 sps:$4 sm:$0xff]  }
 0x800   :  { %10169 = vmatprep.subr.mxu1 %v11845_v50 }
 0x802   :  { %10151 = vmatmul.mubr.msk.f32.vlgmr.msra.gmra.mrb[52].mxu1 %vm1094_vm3, %v12585_v30 }
 0x803   :  { %10171 = vmatprep.mubr.msk.f32.mxu1 %vm11844_vm4, %v11845_v50 }
 0x8cd   :  { %v3563_v5 = vpop.f32.mrb[50].mxu1 }
 0x8ce   :  { %v3567_v6 = vadd.f32 %v3563_v5, %v3416_v58  ;;  %v10141_v7 = vpop.f32.mrb[51].mxu1  ;;  %v4483_v5 = vld [vmem:[#allocation15 + $0x4] sm:$0x3] }
 0x8cf   :  { %v10661_v7 = vld [vmem:[#allocation16] ss:$8 sps:$4 sm:$0xff]  }
 0x8d5   :  { %v3641_v12 = vpop.f32.mrb[52].mxu1 }
 0x8d6   :  { %v10152_v15 = vpop.f32.mrb[53].mxu1  ;;  %10154 = vmatpush3.msra.mxu0 %v3641_v12  ;;  %v10672_v12 = vld [vmem:[#allocation16 + $0x34] ss:$8 sps:$4 sm:$0xff]  }
 0x8d7   :  { %10156 = vmatmul.mubr.msk.f32.vlgmr.msra.gmra.mrb[44].mxu0 %vm3119_vm5, %v8749_v10  ;;  %10540 = vmatprep.subr.bf16.mxu0 %v11843_v49  ;;  %v10667_v10 = vld [vmem:[#allocation16 + $0x20] ss:$8 sps:$4 sm:$0xff]   ;;  %v4646_v15 = vcombine.high %v4644_v13, %v4644_v13 }
 0x8d8   :  { %10542 = vmatpush3.bf16.msra.mxu0 %v10541_v11  ;;  %10166 = vmatprep.mubr.msk.f32.mxu0 %vm11844_vm4, %v11845_v50  ;;  %v10669_v11 = vld [vmem:[#allocation16 + $0x24] ss:$8 sps:$4 sm:$0xff]  }
 0x8d9   :  { %10543 = vmatprep.subr.bf16.mxu0 %v11843_v49 }
 0x8dc   :  { %10545 = vmatpush3.bf16.msra.mxu0 %v10544_v16  ;;  %v4643_v16 = vld [vmem:[#allocation2] sm:$0x3] }
 0x8dd   :  { %10185 = vmatprep.subr.mxu0 %v11845_v50 }
 0x8df   :  { %10167 = vmatmul.mubr.msk.f32.vlgmr.msra.gmra.mrb[46].mxu0 %vm1094_vm3, %v12585_v30 }
 0x8e0   :  { %10187 = vmatprep.mubr.msk.f32.mxu0 %vm11844_vm4, %v11845_v50 }
 0x9aa   :  { %v3714_v17 = vpop.f32.mrb[44].mxu0 }
 0x9ab   :  { %v3718_v18 = vadd.f32 %v3714_v17, %v3567_v6  ;;  %v10157_v19 = vpop.f32.mrb[45].mxu0  ;;  %v4559_v6 = vld [vmem:[#allocation15 + $0x6] sm:$0x3]  ;;  %v10674_v17 = vld [vmem:[%s13019_s16] ss:$16 sps:$4 sm:$0xff]  }
 0x9ac   :  { %v10679_v19 = vld [vmem:[%s13019_s16 + $0xc] ss:$16 sps:$4 sm:$0xff]  }
 0x9b2   :  { %v3792_v24 = vpop.f32.mrb[46].mxu0 }
 0x9b3   :  { %v10168_v27 = vpop.f32.mrb[47].mxu0  ;;  %10170 = vmatpush3.msra.mxu1 %v3792_v24  ;;  %v10694_v24 = vld [vmem:[%s13019_s16 + $0x64] ss:$16 sps:$4 sm:$0xff]  }
 0x9b4   :  { %10172 = vmatmul.mubr.msk.f32.vlgmr.msra.gmra.mrb[54].mxu1 %vm3119_vm5, %v8752_v22  ;;  %10546 = vmatprep.subr.bf16.mxu1 %v11843_v49  ;;  %v10688_v22 = vld [vmem:[%s13019_s16 + $0x44] ss:$16 sps:$4 sm:$0xff]   ;;  %v10698_v27 = vld [vmem:[%s13019_s16 + $0x80] ss:$16 sps:$4 sm:$0xff]  }
 0x9b5   :  { %10548 = vmatpush3.bf16.msra.mxu1 %v10547_v23  ;;  %10182 = vmatprep.mubr.msk.f32.mxu1 %vm11844_vm4, %v11845_v50  ;;  %v10686_v23 = vld [vmem:[%s13019_s16 + $0x40] ss:$16 sps:$4 sm:$0xff]  }
 0x9b6   :  { %10549 = vmatprep.subr.bf16.mxu1 %v11843_v49 }
 0x9b9   :  { %10551 = vmatpush3.bf16.msra.mxu1 %v10550_v28  ;;  %v10706_v28 = vld [vmem:[%s13019_s16 + $0xa4] ss:$16 sps:$4 sm:$0xff]  }
 0x9ba   :  { %10201 = vmatprep.subr.mxu1 %v11845_v50 }
 0x9bc   :  { %10183 = vmatmul.mubr.msk.f32.vlgmr.msra.gmra.mrb[56].mxu1 %vm1094_vm3, %v12585_v30 }
 0x9bd   :  { %10203 = vmatprep.mubr.msk.f32.mxu1 %vm11844_vm4, %v11845_v50 }
 0xa87   :  { %v3865_v29 = vpop.f32.mrb[54].mxu1 }
 0xa88   :  { %v3869_v31 = vadd.f32 %v3865_v29, %v3718_v18  ;;  %v10173_v32 = vpop.f32.mrb[55].mxu1  ;;  %v10676_v18 = vld [vmem:[%s13019_s16 + $0x4] ss:$16 sps:$4 sm:$0xff]   ;;  %v10704_v29 = vld [vmem:[%s13019_s16 + $0xa0] ss:$16 sps:$4 sm:$0xff]  }
 0xa89   :  { %v10710_v32 = vld [vmem:[%s13019_s16 + $0xc0] ss:$16 sps:$4 sm:$0xff]  }
 0xa8f   :  { %v3943_v37 = vpop.f32.mrb[56].mxu1 }
 0xa90   :  { %v10184_v40 = vpop.f32.mrb[57].mxu1  ;;  %10186 = vmatpush3.msra.mxu0 %v3943_v37  ;;  %v10730_v37 = vld [vmem:[%s13019_s16 + $0x124] ss:$16 sps:$4 sm:$0xff]  }
 0xa91   :  { %10188 = vmatmul.mubr.msk.f32.vlgmr.msra.gmra.mrb[48].mxu0 %vm3119_vm5, %v8755_v35  ;;  %10552 = vmatprep.subr.bf16.mxu0 %v11843_v49  ;;  %v10724_v35 = vld [vmem:[%s13019_s16 + $0x104] ss:$16 sps:$4 sm:$0xff]   ;;  %v10734_v40 = vld [vmem:[%s13019_s16 + $0x140] ss:$16 sps:$4 sm:$0xff]  }
 0xa92   :  { %10554 = vmatpush3.bf16.msra.mxu0 %v10553_v36  ;;  %10198 = vmatprep.mubr.msk.f32.mxu0 %vm11844_vm4, %v11845_v50  ;;  %v10722_v36 = vld [vmem:[%s13019_s16 + $0x100] ss:$16 sps:$4 sm:$0xff]  }
 0xa93   :  { %10555 = vmatprep.subr.bf16.mxu0 %v11843_v49 }
 0xa96   :  { %10557 = vmatpush3.bf16.msra.mxu0 %v10556_v41  ;;  %v10742_v41 = vld [vmem:[%s13019_s16 + $0x164] ss:$16 sps:$4 sm:$0xff]  }
 0xa97   :  { %10217 = vmatprep.subr.mxu0 %v11845_v50 }
 0xa99   :  { %10199 = vmatmul.mubr.msk.f32.vlgmr.msra.gmra.mrb[50].mxu0 %vm1094_vm3, %v12585_v30 }
 0xa9a   :  { %10219 = vmatprep.mubr.msk.f32.mxu0 %vm11844_vm4, %v11845_v50 }
 0xb64   :  { %v4016_v42 = vpop.f32.mrb[48].mxu0 }
 0xb65   :  { %v4020_v43 = vadd.f32 %v4016_v42, %v3869_v31  ;;  %v10189_v44 = vpop.f32.mrb[49].mxu0  ;;  %v10712_v31 = vld [vmem:[%s13019_s16 + $0xc4] ss:$16 sps:$4 sm:$0xff]   ;;  %v10740_v42 = vld [vmem:[%s13019_s16 + $0x160] ss:$16 sps:$4 sm:$0xff]  }
 0xb66   :  { %v10746_v44 = vld [vmem:[%s13019_s16 + $0x180] ss:$16 sps:$4 sm:$0xff]  }
 0xb6c   :  { %v4094_v51 = vpop.f32.mrb[50].mxu0 }
 0xb6d   :  { %v10200_v54 = vpop.f32.mrb[51].mxu0  ;;  %10202 = vmatpush3.msra.mxu1 %v4094_v51 }
 0xb6e   :  { %10204 = vmatmul.mubr.msk.f32.vlgmr.msra.gmra.mrb[58].mxu1 %vm3119_vm5, %v8758_v47  ;;  %10558 = vmatprep.subr.bf16.mxu1 %v11843_v49 }
 0xb6f   :  { %10560 = vmatpush3.bf16.msra.mxu1 %v10559_v48  ;;  %10214 = vmatprep.mubr.msk.f32.mxu1 %vm11844_vm4, %v11845_v50 }
 0xb70   :  { %10561 = vmatprep.subr.bf16.mxu1 %v11843_v49 }
 0xb73   :  { %10563 = vmatpush3.bf16.msra.mxu1 %v10562_v55 }
 0xb74   :  { %10227 = vmatprep.subr.mxu1 %v11845_v50 }
 0xb76   :  { %10215 = vmatmul.mubr.msk.f32.vlgmr.msra.gmra.mrb[60].mxu1 %vm1094_vm3, %v12585_v30  ;;  %v8764_v30 = vld [vmem:[#allocation13] ss:$0 sm:$0xff] }
 0xb77   :  { %10229 = vmatprep.mubr.msk.f32.mxu1 %vm11844_vm4, %v11845_v50 }
 0xc41   :  { %v4167_v56 = vpop.f32.mrb[58].mxu1 }
 0xc42   :  { %v4171_v57 = vadd.f32 %v4167_v56, %v4020_v43  ;;  %v10205_v58 = vpop.f32.mrb[59].mxu1  ;;  %v10748_v43 = vld [vmem:[%s13019_s16 + $0x184] ss:$16 sps:$4 sm:$0xff]  }
 0xc49   :  { %v4245_v60 = vpop.f32.mrb[60].mxu1 }
 0xc4a   :  { %v10216_v61 = vpop.f32.mrb[61].mxu1  ;;  %10218 = vmatpush3.msra.mxu0 %v4245_v60  ;;  %v10677_v60 = vld [vmem:[%s13019_s16 + $0x8] ss:$16 sps:$4 sm:$0xff]  }
 0xc4b   :  { %10220 = vmatmul.mubr.msk.f32.vlgmr.msra.gmra.mrb[52].mxu0 %vm3119_vm5, %v8761_v59  ;;  %10222 = vmatprep.subr.mxu0 %v11845_v50 }
 0xc4c   :  { %10224 = vmatprep.mubr.msk.f32.mxu0 %vm11844_vm4, %v11845_v50 }
 0xd1e   :  { %v4318_v49 = vpop.f32.mrb[52].mxu0 }
 0xd1f   :  { %v4322_v62 = vadd.f32 %v4318_v49, %v4171_v57  ;;  %v10221_v63 = vpop.f32.mrb[53].mxu0  ;;  %v10685_v49 = vld [vmem:[%s13019_s16 + $0x2c] ss:$16 sps:$4 sm:$0xff]  }
 0xd20   :  { %v10689_v63 = vld [vmem:[%s13019_s16 + $0x48] ss:$16 sps:$4 sm:$0xff]  }
 0xd21   :  { %v4330_v0 = vadd.f32 %v8764_v30, %v4322_v62  ;;  %v10683_v30 = vld [vmem:[%s13019_s16 + $0x28] ss:$16 sps:$4 sm:$0xff]   ;;  %v10691_v62 = vld [vmem:[%s13019_s16 + $0x4c] ss:$16 sps:$4 sm:$0xff]  }
 0xd23   :  { %v4331_v1 = vmax.f32 %v4330_v0, 0.0  ;;  %v10697_v0 = vld [vmem:[%s13019_s16 + $0x6c] ss:$16 sps:$4 sm:$0xff]  }
 0xd25   :  { %10223 = vmatpush3.msra.mxu0 %v4331_v1  ;;  %10228 = vmatpush3.msra.mxu1 %v4331_v1 }
 0xd26   :  { %10225 = vmatmul.mubr.msk.f32.vlgmr.msra.gmra.mrb[54].mxu0 %vm3119_vm5, %v4332_v2  ;;  %10232 = vmatprep.subr.mxu0 %v11845_v50  ;;  %v10703_v2 = vld [vmem:[%s13019_s16 + $0x8c] ss:$16 sps:$4 sm:$0xff]  }
 0xd27   :  { %10237 = vmatprep.subr.mxu1 %v11845_v50  ;;  %10230 = vmatmul.mubr.msk.f32.vlgmr.msra.gmra.mrb[62].mxu1 %vm3119_vm5, %v4407_v3  ;;  %v10701_v3 = vld [vmem:[%s13019_s16 + $0x88] ss:$16 sps:$4 sm:$0xff]  }
 0xd28   :  { %10233 = vmatpush3.msra.mxu0 %v4331_v1  ;;  %10238 = vmatpush3.msra.mxu1 %v4331_v1  ;;  %v10695_v1 = vld [vmem:[%s13019_s16 + $0x68] ss:$16 sps:$4 sm:$0xff]  }
 0xd29   :  { %10234 = vmatprep.mubr.msk.f32.mxu0 %vm11844_vm4, %v11845_v50  ;;  %10239 = vmatprep.mubr.msk.f32.mxu1 %vm11844_vm4, %v11845_v50 }
 0xd2a   :  { %10235 = vmatmul.mubr.msk.f32.vlgmr.msra.gmra.mrb[56].mxu0 %vm3119_vm5, %v4483_v5  ;;  %4771 = vmatprep.subr.bf16.mxu1 %v10663_v4  ;;  %v10709_v4 = vld [vmem:[%s13019_s16 + $0xac] ss:$16 sps:$4 sm:$0xff]   ;;  %v10707_v5 = vld [vmem:[%s13019_s16 + $0xa8] ss:$16 sps:$4 sm:$0xff]  }
 0xd2b   :  { %10240 = vmatmul.mubr.msk.f32.vlgmr.msra.gmra.mrb[64].mxu1 %vm3119_vm5, %v4559_v6  ;;  %4720 = vmatprep.mubr.f32.mxu0 %v11845_v50  ;;  %v11846_v50 = vmov 0   ;;  %v10715_v6 = vld [vmem:[%s13019_s16 + $0xcc] ss:$16 sps:$4 sm:$0xff]  }
 0xd2c   :  { %4772 = vmatpush1.bf16.msra.mxu1 %v10661_v7  ;;  %8769 = vmatprep.subr.msk.mxu0 %vm4651_vm6, %v4646_v15  ;;  %v10713_v7 = vld [vmem:[%s13019_s16 + $0xc8] ss:$16 sps:$4 sm:$0xff]  }
 0xd2d   :  { %4773 = vmatprep.subr.bf16.mxu1 %v10666_v8  ;;  %8770 = vmatpush1.msk.msra.mxu0 %vm4651_vm6, %v4644_v13  ;;  %v10721_v8 = vld [vmem:[%s13019_s16 + $0xec] ss:$16 sps:$4 sm:$0xff]   ;;  %v10731_v13 = vld [vmem:[%s13019_s16 + $0x128] ss:$16 sps:$4 sm:$0xff]  }
 0xd2e   :  { %4803 = vmatprep.mubr.bf16.mxu1 %v11846_v50  ;;  %8771 = vmatmul.mubr.msk.f32.vlgmr.msra.gmra.mrb[58].mxu0 %vm4647_vm7, %v4643_v16  ;;  %v10737_v15 = vld [vmem:[%s13019_s16 + $0x148] ss:$16 sps:$4 sm:$0xff]   ;;  %v10745_v16 = vld [vmem:[%s13019_s16 + $0x16c] ss:$16 sps:$4 sm:$0xff]  }
 0xd2f   :  { %5236 = vmatprep.subr.bf16.mxu0 %v10676_v18  ;;  %v10743_v50 = vld [vmem:[%s13019_s16 + $0x168] ss:$16 sps:$4 sm:$0xff]  }
 0xd30   :  { %4774 = vmatpush1.bf16.msra.mxu1 %v10664_v9  ;;  %5237 = vmatpush1.bf16.msra.mxu0 %v10674_v17  ;;  %v10719_v9 = vld [vmem:[%s13019_s16 + $0xe8] ss:$16 sps:$4 sm:$0xff]   ;;  %v10751_v17 = vld [vmem:[%s13019_s16 + $0x18c] ss:$16 sps:$4 sm:$0xff]  }
 0xd31   :  { %4775 = vmatprep.subr.bf16.mxu1 %v10669_v11  ;;  %5238 = vmatprep.subr.bf16.mxu0 %v10682_v20  ;;  %v10725_v11 = vld [vmem:[%s13019_s16 + $0x108] ss:$16 sps:$4 sm:$0xff]  }
 0xd32   :  { %v10749_v18 = vld [vmem:[%s13019_s16 + $0x188] ss:$16 sps:$4 sm:$0xff]  }
 0xd33   :  { %v10755_v20 = vld [vmem:[%s13019_s16 + $0x1a8] ss:$16 sps:$4 sm:$0xff]  }
 0xd34   :  { %4776 = vmatpush1.bf16.msra.mxu1 %v10667_v10  ;;  %5239 = vmatpush1.bf16.msra.mxu0 %v10680_v21  ;;  %v10727_v10 = vld [vmem:[%s13019_s16 + $0x10c] ss:$16 sps:$4 sm:$0xff]  }
 0xd35   :  { %4777 = vmatprep.subr.bf16.mxu1 %v10672_v12  ;;  %5240 = vmatprep.subr.bf16.mxu0 %v10688_v22  ;;  %v10733_v12 = vld [vmem:[%s13019_s16 + $0x12c] ss:$16 sps:$4 sm:$0xff]  }
 0xd38   :  { %4778 = vmatpush1.bf16.msra.mxu1 %v10670_v14  ;;  %5241 = vmatpush1.bf16.msra.mxu0 %v10686_v23  ;;  %v10739_v14 = vld [vmem:[%s13019_s16 + $0x14c] ss:$16 sps:$4 sm:$0xff]   ;;  %v10760_v23 = vld [vmem:[%s13019_s16 + $0x1c4] ss:$16 sps:$4 sm:$0xff]  }
 0xd39   :  { %5277 = vmatprep.subr.bf16.mxu1 %v10679_v19  ;;  %5242 = vmatprep.subr.bf16.mxu0 %v10694_v24  ;;  %v10757_v19 = vld [vmem:[%s13019_s16 + $0x1ac] ss:$16 sps:$4 sm:$0xff]  }
 0xd3a   :  { %v10763_v24 = vld [vmem:[%s13019_s16 + $0x1cc] ss:$16 sps:$4 sm:$0xff]  }
 0xd3c   :  { %5243 = vmatpush1.bf16.msra.mxu0 %v10692_v25  ;;  %v10758_v25 = vld [vmem:[%s13019_s16 + $0x1c0] ss:$16 sps:$4 sm:$0xff]  }
 0xd3d   :  { %5244 = vmatprep.subr.bf16.mxu0 %v10700_v26  ;;  %v10761_v26 = vld [vmem:[%s13019_s16 + $0x1c8] ss:$16 sps:$4 sm:$0xff]  }
 0xd40   :  { %5245 = vmatpush1.bf16.msra.mxu0 %v10698_v27  ;;  %v10766_v27 = vld [vmem:[%s13019_s16 + $0x1e4] ss:$16 sps:$4 sm:$0xff]  }
 0xd41   :  { %5246 = vmatprep.subr.bf16.mxu0 %v10706_v28  ;;  %v10769_v28 = vld [vmem:[%s13019_s16 + $0x1ec] ss:$16 sps:$4 sm:$0xff]  }
 0xd44   :  { %5247 = vmatpush1.bf16.msra.mxu0 %v10704_v29  ;;  %v10764_v29 = vld [vmem:[%s13019_s16 + $0x1e0] ss:$16 sps:$4 sm:$0xff]  }
 0xd45   :  { %5248 = vmatprep.subr.bf16.mxu0 %v10712_v31  ;;  %v10767_v31 = vld [vmem:[%s13019_s16 + $0x1e8] ss:$16 sps:$4 sm:$0xff]  }
 0xd48   :  { %5249 = vmatpush1.bf16.msra.mxu0 %v10710_v32  ;;  %v10772_v32 = vld [vmem:[#allocation22 + $0x4] ss:$48 sps:$4 sm:$0xff]  }
 0xd49   :  { %5250 = vmatprep.subr.bf16.mxu0 %v10718_v33  ;;  %v10775_v33 = vld [vmem:[#allocation22 + $0xc] ss:$48 sps:$4 sm:$0xff]  }
 0xd4c   :  { %5251 = vmatpush1.bf16.msra.mxu0 %v10716_v34  ;;  %v4814_v34 = vlaneseq }
 0xd4d   :  { %5252 = vmatprep.subr.bf16.mxu0 %v10724_v35 }
 0xd4e   :  { %v12903_v35 = vshrl.u32 %v4814_v34, 7  ;;  %v10839_v34 = vld [vmem:[#allocation22 + $0x428] ss:$48 sps:$4 sm:$0xff]  }
 0xd50   :  { %5253 = vmatpush1.bf16.msra.mxu0 %v10722_v36  ;;  %v12906_v36 = vsub.s32 0, %v12903_v35 }
 0xd51   :  { %5254 = vmatprep.subr.bf16.mxu0 %v10730_v37  ;;  %v4812_v37 = vld [vmem:[#allocation19] sm:$0x3] }
 0xd54   :  { %5255 = vmatpush1.bf16.msra.mxu0 %v10728_v38  ;;  %v12909_v38 = vsub.s32 1, %v12903_v35 }
 0xd55   :  { %5256 = vmatprep.subr.bf16.mxu0 %v10736_v39  ;;  %v4817_v39 = vrot.slane %v4812_v37, %v12906_v36 }
 0xd58   :  { %5257 = vmatpush1.bf16.msra.mxu0 %v10734_v40 }
 0xd59   :  { %5258 = vmatprep.subr.bf16.mxu0 %v10742_v41  ;;  %v4821_v41 = vrot.slane %v4812_v37, %v12909_v38  ;;  %v10844_v37 = vld [vmem:[#allocation22 + $0x484] ss:$48 sps:$4 sm:$0xff]  }
 0xd5c   :  { %5259 = vmatpush1.bf16.msra.mxu0 %v10740_v42 }
 0xd5d   :  { %5260 = vmatprep.subr.bf16.mxu0 %v10748_v43 }
 0xd60   :  { %5261 = vmatpush1.bf16.msra.mxu0 %v10746_v44 }
 0xd61   :  { %5262 = vmatprep.subr.bf16.mxu0 %v10754_v45 }
 0xd64   :  { %5263 = vmatpush1.bf16.msra.mxu0 %v10752_v46 }
 0xd65   :  { %5264 = vmatprep.subr.bf16.mxu0 %v10760_v23  ;;  %v10829_v23 = vld [vmem:[#allocation22 + $0x36c] ss:$48 sps:$4 sm:$0xff]  }
 0xd68   :  { %5265 = vmatpush1.bf16.msra.mxu0 %v10758_v25  ;;  %v10827_v25 = vld [vmem:[#allocation22 + $0x368] ss:$48 sps:$4 sm:$0xff]  }
 0xd69   :  { %5266 = vmatprep.subr.bf16.mxu0 %v10766_v27  ;;  %v10835_v27 = vld [vmem:[#allocation22 + $0x3cc] ss:$48 sps:$4 sm:$0xff]  }
 0xd6c   :  { %5267 = vmatpush1.bf16.msra.mxu0 %v10764_v29  ;;  %v10833_v29 = vld [vmem:[#allocation22 + $0x3c8] ss:$48 sps:$4 sm:$0xff]  }
 0xd6d   :  { %7694 = vmatprep.subr.bf16.mxu0 %v10772_v32  ;;  %v10841_v32 = vld [vmem:[#allocation22 + $0x42c] ss:$48 sps:$4 sm:$0xff]  }
 0xdf9   :  { %v4402_v47 = vpop.f32.mrb[54].mxu0 }
 0xdfa   :  { %v4477_v48 = vpop.f32.mrb[62].mxu1  ;;  %v10226_v51 = vpop.f32.mrb[55].mxu0 }
 0xdfb   :  { %v4481_v52 = vmax.f32 %v4402_v47, %v4477_v48  ;;  %v10231_v53 = vpop.f32.mrb[63].mxu1 }
 0xdfd   :  { %v4553_v54 = vpop.f32.mrb[56].mxu0 }
 0xdfe   :  { %v4557_v55 = vmax.f32 %v4481_v52, %v4553_v54  ;;  %v4629_v56 = vpop.f32.mrb[64].mxu1  ;;  %v10236_v57 = vpop.f32.mrb[57].mxu0  ;;  %v10770_v54 = vld [vmem:[#allocation22] ss:$48 sps:$4 sm:$0xff]  }
 0xdff   :  { %v10241_v58 = vpop.f32.mrb[65].mxu1  ;;  %v10778_v57 = vld [vmem:[#allocation22 + $0x64] ss:$48 sps:$4 sm:$0xff]  }
 0xe00   :  { %v4633_v59 = vmax.f32 %v4557_v55, %v4629_v56  ;;  %v10773_v55 = vld [vmem:[#allocation22 + $0x8] ss:$48 sps:$4 sm:$0xff]   ;;  %v10781_v58 = vld [vmem:[#allocation22 + $0x6c] ss:$48 sps:$4 sm:$0xff]  }
 0xe01   :  { %v4722_v21 = vpop.f32.mrb[58].mxu0 }
 0xe02   :  { %v4634_v61 = vpack.c.bf16 %v4633_v59, %v4633_v59  ;;  %v4724_v22 = vpop.f32.mrb[59].mxu0  ;;  %v10776_v59 = vld [vmem:[#allocation22 + $0x60] ss:$48 sps:$4 sm:$0xff]  }
 0xe04   :  { %8780 = vmatmul.mubr.msk.bf16.vlgmr.msra.gmra.mrb[68].mxu1 %vm4767_vm8, %v4634_v61  ;;  %v10784_v61 = vld [vmem:[#allocation22 + $0xc4] ss:$48 sps:$4 sm:$0xff]  }
 0xe05   :  { %5278 = vmatpush1.bf16.msra.mxu1 %v10677_v60  ;;  %v10779_v60 = vld [vmem:[#allocation22 + $0x68] ss:$48 sps:$4 sm:$0xff]  }
 0xe06   :  { %5279 = vmatprep.subr.bf16.mxu1 %v10685_v49  ;;  %v10787_v49 = vld [vmem:[#allocation22 + $0xcc] ss:$48 sps:$4 sm:$0xff]  }
 0xe09   :  { %5280 = vmatpush1.bf16.msra.mxu1 %v10683_v30  ;;  %v10782_v30 = vld [vmem:[#allocation22 + $0xc0] ss:$48 sps:$4 sm:$0xff]  }
 0xe0a   :  { %5281 = vmatprep.subr.bf16.mxu1 %v10691_v62  ;;  %v10785_v62 = vld [vmem:[#allocation22 + $0xc8] ss:$48 sps:$4 sm:$0xff]  }
 0xe0d   :  { %5282 = vmatpush1.bf16.msra.mxu1 %v10689_v63  ;;  %v10790_v63 = vld [vmem:[#allocation22 + $0x124] ss:$48 sps:$4 sm:$0xff]  }
 0xe0e   :  { %5283 = vmatprep.subr.bf16.mxu1 %v10697_v0  ;;  %v10793_v0 = vld [vmem:[#allocation22 + $0x12c] ss:$48 sps:$4 sm:$0xff]  }
 0xe11   :  { %5284 = vmatpush1.bf16.msra.mxu1 %v10695_v1  ;;  %v10788_v1 = vld [vmem:[#allocation22 + $0x120] ss:$48 sps:$4 sm:$0xff]  }
 0xe12   :  { %5285 = vmatprep.subr.bf16.mxu1 %v10703_v2  ;;  %v10791_v2 = vld [vmem:[#allocation22 + $0x128] ss:$48 sps:$4 sm:$0xff]  }
 0xe15   :  { %5286 = vmatpush1.bf16.msra.mxu1 %v10701_v3  ;;  %v10796_v3 = vld [vmem:[#allocation22 + $0x184] ss:$48 sps:$4 sm:$0xff]  }
 0xe16   :  { %5287 = vmatprep.subr.bf16.mxu1 %v10709_v4  ;;  %v10799_v4 = vld [vmem:[#allocation22 + $0x18c] ss:$48 sps:$4 sm:$0xff]  }
 0xe19   :  { %5288 = vmatpush1.bf16.msra.mxu1 %v10707_v5  ;;  %v10794_v5 = vld [vmem:[#allocation22 + $0x180] ss:$48 sps:$4 sm:$0xff]  }
 0xe1a   :  { %5289 = vmatprep.subr.bf16.mxu1 %v10715_v6  ;;  %v10797_v6 = vld [vmem:[#allocation22 + $0x188] ss:$48 sps:$4 sm:$0xff]  }
 0xe1d   :  { %5290 = vmatpush1.bf16.msra.mxu1 %v10713_v7  ;;  %v10802_v7 = vld [vmem:[#allocation22 + $0x1e4] ss:$48 sps:$4 sm:$0xff]  }
 0xe1e   :  { %5291 = vmatprep.subr.bf16.mxu1 %v10721_v8  ;;  %v10805_v8 = vld [vmem:[#allocation22 + $0x1ec] ss:$48 sps:$4 sm:$0xff]  }
 0xe21   :  { %5292 = vmatpush1.bf16.msra.mxu1 %v10719_v9  ;;  %v10800_v9 = vld [vmem:[#allocation22 + $0x1e0] ss:$48 sps:$4 sm:$0xff]  }
 0xe22   :  { %5293 = vmatprep.subr.bf16.mxu1 %v10727_v10  ;;  %v10803_v10 = vld [vmem:[#allocation22 + $0x1e8] ss:$48 sps:$4 sm:$0xff]  }
 0xe25   :  { %5294 = vmatpush1.bf16.msra.mxu1 %v10725_v11  ;;  %v10808_v11 = vld [vmem:[#allocation22 + $0x244] ss:$48 sps:$4 sm:$0xff]  }
 0xe26   :  { %5295 = vmatprep.subr.bf16.mxu1 %v10733_v12  ;;  %v10811_v12 = vld [vmem:[#allocation22 + $0x24c] ss:$48 sps:$4 sm:$0xff]  }
 0xe29   :  { %5296 = vmatpush1.bf16.msra.mxu1 %v10731_v13  ;;  %v10806_v13 = vld [vmem:[#allocation22 + $0x240] ss:$48 sps:$4 sm:$0xff]  }
 0xe2a   :  { %5297 = vmatprep.subr.bf16.mxu1 %v10739_v14  ;;  %v10809_v14 = vld [vmem:[#allocation22 + $0x248] ss:$48 sps:$4 sm:$0xff]  }
 0xe2d   :  { %5298 = vmatpush1.bf16.msra.mxu1 %v10737_v15  ;;  %v10814_v15 = vld [vmem:[#allocation22 + $0x2a4] ss:$48 sps:$4 sm:$0xff]  }
 0xe2e   :  { %5299 = vmatprep.subr.bf16.mxu1 %v10745_v16  ;;  %v10817_v16 = vld [vmem:[#allocation22 + $0x2ac] ss:$48 sps:$4 sm:$0xff]  }
 0xe31   :  { %5300 = vmatpush1.bf16.msra.mxu1 %v10743_v50  ;;  %v10812_v50 = vld [vmem:[#allocation22 + $0x2a0] ss:$48 sps:$4 sm:$0xff]  }
 0xe32   :  { %5301 = vmatprep.subr.bf16.mxu1 %v10751_v17  ;;  %v10815_v17 = vld [vmem:[#allocation22 + $0x2a8] ss:$48 sps:$4 sm:$0xff]  }
 0xe35   :  { %5302 = vmatpush1.bf16.msra.mxu1 %v10749_v18  ;;  %v10820_v18 = vld [vmem:[#allocation22 + $0x304] ss:$48 sps:$4 sm:$0xff]  }
 0xe36   :  { %5303 = vmatprep.subr.bf16.mxu1 %v10757_v19  ;;  %v10823_v19 = vld [vmem:[#allocation22 + $0x30c] ss:$48 sps:$4 sm:$0xff]  }
 0xe39   :  { %5304 = vmatpush1.bf16.msra.mxu1 %v10755_v20  ;;  %v10818_v20 = vld [vmem:[#allocation22 + $0x300] ss:$48 sps:$4 sm:$0xff]  }
 0xe3a   :  { %5305 = vmatprep.subr.bf16.mxu1 %v10763_v24  ;;  %v10824_v24 = vld [vmem:[#allocation22 + $0x360] ss:$48 sps:$4 sm:$0xff]  }
 0xe3d   :  { %5306 = vmatpush1.bf16.msra.mxu1 %v10761_v26  ;;  %v10832_v26 = vld [vmem:[#allocation22 + $0x3c4] ss:$48 sps:$4 sm:$0xff]  }
 0xe3e   :  { %5307 = vmatprep.subr.bf16.mxu1 %v10769_v28  ;;  %v10830_v28 = vld [vmem:[#allocation22 + $0x3c0] ss:$48 sps:$4 sm:$0xff]  }
 0xe41   :  { %5308 = vmatpush1.bf16.msra.mxu1 %v10767_v31  ;;  %v10838_v31 = vld [vmem:[#allocation22 + $0x424] ss:$48 sps:$4 sm:$0xff]  }
 0xe42   :  { %7776 = vmatprep.subr.bf16.mxu1 %v10775_v33  ;;  %v10836_v33 = vld [vmem:[#allocation22 + $0x420] ss:$48 sps:$4 sm:$0xff]  }
 0xed7   :  { %v4805_v40 = vpop.f32.mrb[68].mxu1 }
 0xed8   :  { %v4806_v42 = vadd.f32 %v4805_v40, %v4722_v21  ;;  %v4807_v43 = vpop.f32.mrb[69].mxu1  ;;  %v10821_v21 = vld [vmem:[#allocation22 + $0x308] ss:$48 sps:$4 sm:$0xff]   ;;  %v10842_v40 = vld [vmem:[#allocation22 + $0x480] ss:$48 sps:$4 sm:$0xff]  }
 0xed9   :  { %v4808_v44 = vadd.f32 %v4807_v43, %v4724_v22  ;;  %v4809_v45 = vpop.f32.mrb[70].mxu1  ;;  %v10826_v22 = vld [vmem:[#allocation22 + $0x364] ss:$48 sps:$4 sm:$0xff]   ;;  %v10853_v43 = vld [vmem:[#allocation22 + $0x4ec] ss:$48 sps:$4 sm:$0xff]  }
 0xeda   :  { %v4824_v46 = vadd.f32 %v4817_v39, %v4806_v42  ;;  %v4810_v47 = vpop.f32.mrb[71].mxu1  ;;  %v10847_v39 = vld [vmem:[#allocation22 + $0x48c] ss:$48 sps:$4 sm:$0xff]   ;;  %v10850_v42 = vld [vmem:[#allocation22 + $0x4e4] ss:$48 sps:$4 sm:$0xff]  }
 0xedb   :  { %v4825_v48 = vadd.f32 %v4821_v41, %v4808_v44  ;;  %v10845_v41 = vld [vmem:[#allocation22 + $0x488] ss:$48 sps:$4 sm:$0xff]   ;;  %v10848_v44 = vld [vmem:[#allocation22 + $0x4e0] ss:$48 sps:$4 sm:$0xff]   ;;  %v10859_v47 = vld [vmem:[#allocation22 + $0x54c] ss:$48 sps:$4 sm:$0xff]  }
 0xedc   :  { %v4826_v51 = vmax.f32 %v4824_v46, 0.0  ;;  %v10851_v45 = vld [vmem:[#allocation22 + $0x4e8] ss:$48 sps:$4 sm:$0xff]   ;;  %v10856_v46 = vld [vmem:[#allocation22 + $0x544] ss:$48 sps:$4 sm:$0xff]  }
 0xedd   :  { %v4827_v52 = vmax.f32 %v4825_v48, 0.0  ;;  %v10854_v48 = vld [vmem:[#allocation22 + $0x540] ss:$48 sps:$4 sm:$0xff]  }
 0xede   :  { %v4828_v56 = vpack.c.bf16 %v4826_v51, %v4826_v51  ;;  %v10857_v51 = vld [vmem:[#allocation22 + $0x548] ss:$48 sps:$4 sm:$0xff]  }
 0xedf   :  { %v4829_v53 = vpack.c.bf16 %v4827_v52, %v4827_v52  ;;  %v10862_v52 = vld [vmem:[#allocation22 + $0x5a4] ss:$48 sps:$4 sm:$0xff]  }
 0xee1   :  { %5268 = vmatprep.mubr.bf16.mxu0 %v4829_v53  ;;  %5309 = vmatprep.mubr.bf16.mxu1 %v4829_v53  ;;  %v10865_v53 = vld [vmem:[#allocation22 + $0x5ac] ss:$48 sps:$4 sm:$0xff]  }
 0xee2   :  { %5269 = vmatmul.mubr.bf16.vlgmr.msra.gmra.mrb[60].mxu0 %v4828_v56  ;;  %5310 = vmatmul.mubr.bf16.vlgmr.msra.gmra.mrb[72].mxu1 %v4828_v56  ;;  %v10868_v56 = vld [vmem:[#allocation22 + $0x604] ss:$48 sps:$4 sm:$0xff]  }
 0xee3   :  { %7695 = vmatpush1.bf16.msra.mxu0 %v10770_v54  ;;  %7777 = vmatpush1.bf16.msra.mxu1 %v10773_v55  ;;  %v10860_v54 = vld [vmem:[#allocation22 + $0x5a0] ss:$48 sps:$4 sm:$0xff]   ;;  %v10863_v55 = vld [vmem:[#allocation22 + $0x5a8] ss:$48 sps:$4 sm:$0xff]  }
 0xee4   :  { %7696 = vmatprep.subr.bf16.mxu0 %v10778_v57  ;;  %7778 = vmatprep.subr.bf16.mxu1 %v10781_v58  ;;  %v10871_v57 = vld [vmem:[#allocation22 + $0x60c] ss:$48 sps:$4 sm:$0xff]  }
 0xee5   :  { %v12913_v58 = vld [vmem:[#allocation21] sm:$0xf] }
 0xee7   :  { %7697 = vmatpush1.bf16.msra.mxu0 %v10776_v59  ;;  %7779 = vmatpush1.bf16.msra.mxu1 %v10779_v60  ;;  %v12916_v59 = vsub.s32 3, %v12903_v35  ;;  %v4899_v60 = vrot.slane %v12913_v58, %v12906_v36 }
 0xee8   :  { %7698 = vmatprep.subr.bf16.mxu0 %v10784_v61  ;;  %7780 = vmatprep.subr.bf16.mxu1 %v10787_v49  ;;  %v4903_v61 = vrot.slane %v12913_v58, %v12909_v38 }
 0xee9   :  { %v4911_v49 = vrot.slane %v12913_v58, %v12916_v59 }
 0xeeb   :  { %7699 = vmatpush1.bf16.msra.mxu0 %v10782_v30  ;;  %7781 = vmatpush1.bf16.msra.mxu1 %v10785_v62 }
 0xeec   :  { %7700 = vmatprep.subr.bf16.mxu0 %v10790_v63  ;;  %7782 = vmatprep.subr.bf16.mxu1 %v10793_v0 }
 0xeef   :  { %7701 = vmatpush1.bf16.msra.mxu0 %v10788_v1  ;;  %7783 = vmatpush1.bf16.msra.mxu1 %v10791_v2 }
 0xef0   :  { %7702 = vmatprep.subr.bf16.mxu0 %v10796_v3  ;;  %7784 = vmatprep.subr.bf16.mxu1 %v10799_v4 }
 0xef3   :  { %7703 = vmatpush1.bf16.msra.mxu0 %v10794_v5  ;;  %7785 = vmatpush1.bf16.msra.mxu1 %v10797_v6 }
 0xef4   :  { %7704 = vmatprep.subr.bf16.mxu0 %v10802_v7  ;;  %7786 = vmatprep.subr.bf16.mxu1 %v10805_v8 }
 0xef7   :  { %7705 = vmatpush1.bf16.msra.mxu0 %v10800_v9  ;;  %7787 = vmatpush1.bf16.msra.mxu1 %v10803_v10 }
 0xef8   :  { %7706 = vmatprep.subr.bf16.mxu0 %v10808_v11  ;;  %7788 = vmatprep.subr.bf16.mxu1 %v10811_v12  ;;  %v10866_v12 = vld [vmem:[#allocation22 + $0x600] ss:$48 sps:$4 sm:$0xff]  }
 0xefb   :  { %7707 = vmatpush1.bf16.msra.mxu0 %v10806_v13  ;;  %7789 = vmatpush1.bf16.msra.mxu1 %v10809_v14  ;;  %v10869_v13 = vld [vmem:[#allocation22 + $0x608] ss:$48 sps:$4 sm:$0xff]  }
 0xefc   :  { %7708 = vmatprep.subr.bf16.mxu0 %v10814_v15  ;;  %7790 = vmatprep.subr.bf16.mxu1 %v10817_v16  ;;  %v10874_v15 = vld [vmem:[#allocation22 + $0x664] ss:$48 sps:$4 sm:$0xff]   ;;  %v10877_v16 = vld [vmem:[#allocation22 + $0x66c] ss:$48 sps:$4 sm:$0xff]  }
 0xeff   :  { %7709 = vmatpush1.bf16.msra.mxu0 %v10812_v50  ;;  %7791 = vmatpush1.bf16.msra.mxu1 %v10815_v17  ;;  %v10872_v17 = vld [vmem:[#allocation22 + $0x660] ss:$48 sps:$4 sm:$0xff]  }
 0xf00   :  { %7710 = vmatprep.subr.bf16.mxu0 %v10820_v18  ;;  %7792 = vmatprep.subr.bf16.mxu1 %v10823_v19  ;;  %v10875_v18 = vld [vmem:[#allocation22 + $0x668] ss:$48 sps:$4 sm:$0xff]   ;;  %v10880_v19 = vld [vmem:[#allocation22 + $0x6c4] ss:$48 sps:$4 sm:$0xff]  }
 0xf03   :  { %7711 = vmatpush1.bf16.msra.mxu0 %v10818_v20  ;;  %7793 = vmatpush1.bf16.msra.mxu1 %v10821_v21  ;;  %v10883_v20 = vld [vmem:[#allocation22 + $0x6cc] ss:$48 sps:$4 sm:$0xff]   ;;  %v10878_v21 = vld [vmem:[#allocation22 + $0x6c0] ss:$48 sps:$4 sm:$0xff]  }
 0xf04   :  { %7712 = vmatprep.subr.bf16.mxu0 %v10826_v22  ;;  %7794 = vmatprep.subr.bf16.mxu1 %v10829_v23  ;;  %v10881_v22 = vld [vmem:[#allocation22 + $0x6c8] ss:$48 sps:$4 sm:$0xff]   ;;  %v10886_v23 = vld [vmem:[#allocation22 + $0x724] ss:$48 sps:$4 sm:$0xff]  }
 0xf07   :  { %7713 = vmatpush1.bf16.msra.mxu0 %v10824_v24  ;;  %7795 = vmatpush1.bf16.msra.mxu1 %v10827_v25  ;;  %v10889_v24 = vld [vmem:[#allocation22 + $0x72c] ss:$48 sps:$4 sm:$0xff]   ;;  %v10884_v25 = vld [vmem:[#allocation22 + $0x720] ss:$48 sps:$4 sm:$0xff]  }
 0xf08   :  { %7714 = vmatprep.subr.bf16.mxu0 %v10832_v26  ;;  %7796 = vmatprep.subr.bf16.mxu1 %v10835_v27  ;;  %v10887_v26 = vld [vmem:[#allocation22 + $0x728] ss:$48 sps:$4 sm:$0xff]   ;;  %v10892_v27 = vld [vmem:[#allocation22 + $0x784] ss:$48 sps:$4 sm:$0xff]  }
 0xf0b   :  { %7715 = vmatpush1.bf16.msra.mxu0 %v10830_v28  ;;  %7797 = vmatpush1.bf16.msra.mxu1 %v10833_v29  ;;  %v10895_v28 = vld [vmem:[#allocation22 + $0x78c] ss:$48 sps:$4 sm:$0xff]   ;;  %v10890_v29 = vld [vmem:[#allocation22 + $0x780] ss:$48 sps:$4 sm:$0xff]  }
 0xf0c   :  { %7716 = vmatprep.subr.bf16.mxu0 %v10838_v31  ;;  %7798 = vmatprep.subr.bf16.mxu1 %v10841_v32  ;;  %v10893_v31 = vld [vmem:[#allocation22 + $0x788] ss:$48 sps:$4 sm:$0xff]   ;;  %v10898_v32 = vld [vmem:[#allocation22 + $0x7e4] ss:$48 sps:$4 sm:$0xff]  }
 0xf0f   :  { %7717 = vmatpush1.bf16.msra.mxu0 %v10836_v33  ;;  %7799 = vmatpush1.bf16.msra.mxu1 %v10839_v34  ;;  %v10901_v33 = vld [vmem:[#allocation22 + $0x7ec] ss:$48 sps:$4 sm:$0xff]   ;;  %v10896_v34 = vld [vmem:[#allocation22 + $0x7e0] ss:$48 sps:$4 sm:$0xff]  }
 0xf10   :  { %7718 = vmatprep.subr.bf16.mxu0 %v10844_v37  ;;  %7800 = vmatprep.subr.bf16.mxu1 %v10847_v39  ;;  %v10899_v37 = vld [vmem:[#allocation22 + $0x7e8] ss:$48 sps:$4 sm:$0xff]   ;;  %v10904_v39 = vld [vmem:[#allocation22 + $0x844] ss:$48 sps:$4 sm:$0xff]  }
 0xf13   :  { %7719 = vmatpush1.bf16.msra.mxu0 %v10842_v40  ;;  %7801 = vmatpush1.bf16.msra.mxu1 %v10845_v41  ;;  %v10907_v40 = vld [vmem:[#allocation22 + $0x84c] ss:$48 sps:$4 sm:$0xff]   ;;  %v10902_v41 = vld [vmem:[#allocation22 + $0x840] ss:$48 sps:$4 sm:$0xff]  }
 0xf14   :  { %7720 = vmatprep.subr.bf16.mxu0 %v10850_v42  ;;  %7802 = vmatprep.subr.bf16.mxu1 %v10853_v43  ;;  %v10905_v42 = vld [vmem:[#allocation22 + $0x848] ss:$48 sps:$4 sm:$0xff]   ;;  %v10910_v43 = vld [vmem:[#allocation22 + $0x8a4] ss:$48 sps:$4 sm:$0xff]  }
 0xf17   :  { %7721 = vmatpush1.bf16.msra.mxu0 %v10848_v44  ;;  %7803 = vmatpush1.bf16.msra.mxu1 %v10851_v45  ;;  %v10913_v44 = vld [vmem:[#allocation22 + $0x8ac] ss:$48 sps:$4 sm:$0xff]   ;;  %v10908_v45 = vld [vmem:[#allocation22 + $0x8a0] ss:$48 sps:$4 sm:$0xff]  }
 0xf18   :  { %7722 = vmatprep.subr.bf16.mxu0 %v10856_v46  ;;  %7804 = vmatprep.subr.bf16.mxu1 %v10859_v47  ;;  %v10911_v46 = vld [vmem:[#allocation22 + $0x8a8] ss:$48 sps:$4 sm:$0xff]   ;;  %v10916_v47 = vld [vmem:[#allocation22 + $0x904] ss:$48 sps:$4 sm:$0xff]  }
 0xf1b   :  { %7723 = vmatpush1.bf16.msra.mxu0 %v10854_v48  ;;  %7805 = vmatpush1.bf16.msra.mxu1 %v10857_v51  ;;  %v10919_v48 = vld [vmem:[#allocation22 + $0x90c] ss:$48 sps:$4 sm:$0xff]   ;;  %v10914_v51 = vld [vmem:[#allocation22 + $0x900] ss:$48 sps:$4 sm:$0xff]  }
 0xf1c   :  { %7724 = vmatprep.subr.bf16.mxu0 %v10862_v52  ;;  %7806 = vmatprep.subr.bf16.mxu1 %v10865_v53  ;;  %v10917_v52 = vld [vmem:[#allocation22 + $0x908] ss:$48 sps:$4 sm:$0xff]   ;;  %v10922_v53 = vld [vmem:[#allocation22 + $0x964] ss:$48 sps:$4 sm:$0xff]  }
 0xf1f   :  { %7725 = vmatpush1.bf16.msra.mxu0 %v10860_v54  ;;  %7807 = vmatpush1.bf16.msra.mxu1 %v10863_v55  ;;  %v10925_v54 = vld [vmem:[#allocation22 + $0x96c] ss:$48 sps:$4 sm:$0xff]   ;;  %v10920_v55 = vld [vmem:[#allocation22 + $0x960] ss:$48 sps:$4 sm:$0xff]  }
 0xf20   :  { %7735 = vmatprep.subr.bf16.mxu0 %v10868_v56  ;;  %7817 = vmatprep.subr.bf16.mxu1 %v10871_v57  ;;  %v10923_v56 = vld [vmem:[#allocation22 + $0x968] ss:$48 sps:$4 sm:$0xff]   ;;  %v10928_v57 = vld [vmem:[#allocation22 + $0x9c4] ss:$48 sps:$4 sm:$0xff]  }
 0xfb5   :  { %v5270_v30 = vpop.f32.mrb[60].mxu0  ;;  %v12924_v62 = vpop.f32.mrb[72].mxu1 }
 0xfb6   :  { %v5271_v63 = vadd.f32 %v5270_v30, %v4899_v60  ;;  %v5272_v0 = vpop.f32.mrb[61].mxu0  ;;  %v5313_v1 = vpop.f32.mrb[73].mxu1  ;;  %v10931_v60 = vld [vmem:[#allocation22 + $0x9cc] ss:$48 sps:$4 sm:$0xff]   ;;  %v10934_v30 = vld [vmem:[#allocation22 + $0xa24] ss:$48 sps:$4 sm:$0xff]  }
 0xfb7   :  { %v5273_v2 = vadd.f32 %v5272_v0, %v4903_v61  ;;  %v5314_v3 = vadd.f32 %v5313_v1, %v4911_v49  ;;  %v5274_v4 = vpop.f32.mrb[62].mxu0  ;;  %v5315_v5 = vpop.f32.mrb[74].mxu1  ;;  %v10926_v61 = vld [vmem:[#allocation22 + $0x9c0] ss:$48 sps:$4 sm:$0xff]   ;;  %v10929_v49 = vld [vmem:[#allocation22 + $0x9c8] ss:$48 sps:$4 sm:$0xff]  }
 0xfb8   :  { %v5318_v6 = vmax.f32 %v5271_v63, 0.0  ;;  %v5275_v7 = vpop.f32.mrb[63].mxu0  ;;  %v5316_v8 = vpop.f32.mrb[75].mxu1  ;;  %v10937_v63 = vld [vmem:[#allocation22 + $0xa2c] ss:$48 sps:$4 sm:$0xff]  }
 0xfb9   :  { %v5319_v9 = vmax.f32 %v5273_v2, 0.0  ;;  %v5321_v10 = vmax.f32 %v5314_v3, 0.0  ;;  %v10932_v0 = vld [vmem:[#allocation22 + $0xa20] ss:$48 sps:$4 sm:$0xff]   ;;  %v10935_v1 = vld [vmem:[#allocation22 + $0xa28] ss:$48 sps:$4 sm:$0xff]  }
 0xfba   :  { %v12928_v14 = vpack.c.bf16 %v5318_v6, %v5318_v6  ;;  %v10940_v2 = vld [vmem:[#allocation22 + $0xa84] ss:$48 sps:$4 sm:$0xff]   ;;  %v10943_v3 = vld [vmem:[#allocation22 + $0xa8c] ss:$48 sps:$4 sm:$0xff]   ;;  %v10938_v4 = vld [vmem:[#allocation22 + $0xa80] ss:$48 sps:$4 sm:$0xff]  }
 0xfbb   :  { %v12926_v11 = vpack.c.bf16 %v5319_v9, %v5319_v9  ;;  %v12932_v50 = vpack.c.bf16 %v5321_v10, %v5321_v10  ;;  %v10941_v5 = vld [vmem:[#allocation22 + $0xa88] ss:$48 sps:$4 sm:$0xff]   ;;  %v12939_v6 = vsub.s32 2, %v12903_v35  ;;  %v10946_v7 = vld [vmem:[#allocation22 + $0xae4] ss:$48 sps:$4 sm:$0xff]  }
 0xfbc   :  { %v10949_v8 = vld [vmem:[#allocation22 + $0xaec] ss:$48 sps:$4 sm:$0xff]   ;;  %v10944_v9 = vld [vmem:[#allocation22 + $0xae0] ss:$48 sps:$4 sm:$0xff]   ;;  %v10947_v10 = vld [vmem:[#allocation22 + $0xae8] ss:$48 sps:$4 sm:$0xff]  }
 0xfbd   :  { %7726 = vmatprep.mubr.bf16.mxu0 %v12926_v11  ;;  %7808 = vmatprep.mubr.bf16.mxu1 %v12926_v11 }
 0xfbe   :  { %7727 = vmatmul.mubr.bf16.vlgmr.msra.gmra.mrb[64].mxu0 %v12928_v14  ;;  %7809 = vmatmul.mubr.bf16.vlgmr.msra.gmra.mrb[76].mxu1 %v12928_v14 }
 0xfbf   :  { %7736 = vmatpush1.bf16.msra.mxu0 %v10866_v12  ;;  %7818 = vmatpush1.bf16.msra.mxu1 %v10869_v13  ;;  %v4907_v12 = vrot.slane %v12913_v58, %v12939_v6  ;;  %v10952_v13 = vld [vmem:[#allocation22 + $0xb44] ss:$48 sps:$4 sm:$0xff]  }
 0xfc0   :  { %7767 = vmatprep.mubr.bf16.mxu0 %v12932_v50  ;;  %7849 = vmatprep.mubr.bf16.mxu1 %v12932_v50  ;;  %v10964_v58 = vld [vmem:[#allocation22 + $0x14] ss:$48 sps:$4 sm:$0xff]  }
 0xfc1   :  { %7737 = vmatprep.subr.bf16.mxu0 %v10874_v15  ;;  %7819 = vmatprep.subr.bf16.mxu1 %v10877_v16  ;;  %v10955_v15 = vld [vmem:[#allocation22 + $0xb4c] ss:$48 sps:$4 sm:$0xff]   ;;  %v10950_v16 = vld [vmem:[#allocation22 + $0xb40] ss:$48 sps:$4 sm:$0xff]  }
 0xfc3   :  { %7738 = vmatpush1.bf16.msra.mxu0 %v10872_v17  ;;  %7820 = vmatpush1.bf16.msra.mxu1 %v10875_v18  ;;  %v10953_v17 = vld [vmem:[#allocation22 + $0xb48] ss:$48 sps:$4 sm:$0xff]   ;;  %v5312_v18 = vadd.f32 %v12924_v62, %v4907_v12  ;;  %v11030_v12 = vld [vmem:[#allocation22 + $0x434] ss:$48 sps:$4 sm:$0xff]  }
 0xfc4   :  { %7739 = vmatprep.subr.bf16.mxu0 %v10880_v19  ;;  %7821 = vmatprep.subr.bf16.mxu1 %v10883_v20  ;;  %v10958_v19 = vld [vmem:[#allocation22 + $0xba4] ss:$48 sps:$4 sm:$0xff]   ;;  %v10961_v20 = vld [vmem:[#allocation22 + $0xbac] ss:$48 sps:$4 sm:$0xff]   ;;  %v10965_v62 = vld [vmem:[#allocation22 + $0x18] ss:$48 sps:$4 sm:$0xff]  }
 0xfc7   :  { %7740 = vmatpush1.bf16.msra.mxu0 %v10878_v21  ;;  %7822 = vmatpush1.bf16.msra.mxu1 %v10881_v22  ;;  %v10956_v21 = vld [vmem:[#allocation22 + $0xba0] ss:$48 sps:$4 sm:$0xff]   ;;  %v10959_v22 = vld [vmem:[#allocation22 + $0xba8] ss:$48 sps:$4 sm:$0xff]  }
 0xfc8   :  { %7741 = vmatprep.subr.bf16.mxu0 %v10886_v23  ;;  %7823 = vmatprep.subr.bf16.mxu1 %v10889_v24  ;;  %v5320_v23 = vmax.f32 %v5312_v18, 0.0  ;;  %v10967_v24 = vld [vmem:[#allocation22 + $0x1c] ss:$48 sps:$4 sm:$0xff]  }
 0xfc9   :  { %v11039_v18 = vld [vmem:[#allocation22 + $0x49c] ss:$48 sps:$4 sm:$0xff]  }
 0xfcb   :  { %7742 = vmatpush1.bf16.msra.mxu0 %v10884_v25  ;;  %7824 = vmatpush1.bf16.msra.mxu1 %v10887_v26  ;;  %v10962_v25 = vld [vmem:[#allocation22 + $0x10] ss:$48 sps:$4 sm:$0xff]   ;;  %v12944_v26 = vpack.c.bf16 %v5320_v23, %v5320_v23 }
 0xfcc   :  { %7743 = vmatprep.subr.bf16.mxu0 %v10892_v27  ;;  %7825 = vmatprep.subr.bf16.mxu1 %v10895_v28  ;;  %v10970_v27 = vld [vmem:[#allocation22 + $0x74] ss:$48 sps:$4 sm:$0xff]   ;;  %v10973_v28 = vld [vmem:[#allocation22 + $0x7c] ss:$48 sps:$4 sm:$0xff]   ;;  %v11040_v23 = vld [vmem:[#allocation22 + $0x4f0] ss:$48 sps:$4 sm:$0xff]  }
 0xfcf   :  { %7744 = vmatpush1.bf16.msra.mxu0 %v10890_v29  ;;  %7826 = vmatpush1.bf16.msra.mxu1 %v10893_v31  ;;  %v10968_v29 = vld [vmem:[#allocation22 + $0x70] ss:$48 sps:$4 sm:$0xff]   ;;  %v10971_v31 = vld [vmem:[#allocation22 + $0x78] ss:$48 sps:$4 sm:$0xff]  }
 0xfd0   :  { %7745 = vmatprep.subr.bf16.mxu0 %v10898_v32  ;;  %7827 = vmatprep.subr.bf16.mxu1 %v10901_v33  ;;  %v10976_v32 = vld [vmem:[#allocation22 + $0xd4] ss:$48 sps:$4 sm:$0xff]   ;;  %v10979_v33 = vld [vmem:[#allocation22 + $0xdc] ss:$48 sps:$4 sm:$0xff]  }
 0xfd3   :  { %7746 = vmatpush1.bf16.msra.mxu0 %v10896_v34  ;;  %7828 = vmatpush1.bf16.msra.mxu1 %v10899_v37  ;;  %v10974_v34 = vld [vmem:[#allocation22 + $0xd0] ss:$48 sps:$4 sm:$0xff]   ;;  %v10977_v37 = vld [vmem:[#allocation22 + $0xd8] ss:$48 sps:$4 sm:$0xff]  }
 0xfd4   :  { %7747 = vmatprep.subr.bf16.mxu0 %v10904_v39  ;;  %7829 = vmatprep.subr.bf16.mxu1 %v10907_v40  ;;  %v10982_v39 = vld [vmem:[#allocation22 + $0x134] ss:$48 sps:$4 sm:$0xff]   ;;  %v10985_v40 = vld [vmem:[#allocation22 + $0x13c] ss:$48 sps:$4 sm:$0xff]  }
 0xfd7   :  { %7748 = vmatpush1.bf16.msra.mxu0 %v10902_v41  ;;  %7830 = vmatpush1.bf16.msra.mxu1 %v10905_v42  ;;  %v10980_v41 = vld [vmem:[#allocation22 + $0x130] ss:$48 sps:$4 sm:$0xff]   ;;  %v10983_v42 = vld [vmem:[#allocation22 + $0x138] ss:$48 sps:$4 sm:$0xff]  }
 0xfd8   :  { %7749 = vmatprep.subr.bf16.mxu0 %v10910_v43  ;;  %7831 = vmatprep.subr.bf16.mxu1 %v10913_v44  ;;  %v10988_v43 = vld [vmem:[#allocation22 + $0x194] ss:$48 sps:$4 sm:$0xff]   ;;  %v10991_v44 = vld [vmem:[#allocation22 + $0x19c] ss:$48 sps:$4 sm:$0xff]  }
 0xfdb   :  { %7750 = vmatpush1.bf16.msra.mxu0 %v10908_v45  ;;  %7832 = vmatpush1.bf16.msra.mxu1 %v10911_v46  ;;  %v10986_v45 = vld [vmem:[#allocation22 + $0x190] ss:$48 sps:$4 sm:$0xff]   ;;  %v10989_v46 = vld [vmem:[#allocation22 + $0x198] ss:$48 sps:$4 sm:$0xff]  }
 0xfdc   :  { %7751 = vmatprep.subr.bf16.mxu0 %v10916_v47  ;;  %7833 = vmatprep.subr.bf16.mxu1 %v10919_v48  ;;  %v10994_v47 = vld [vmem:[#allocation22 + $0x1f4] ss:$48 sps:$4 sm:$0xff]   ;;  %v10997_v48 = vld [vmem:[#allocation22 + $0x1fc] ss:$48 sps:$4 sm:$0xff]  }
 0xfdf   :  { %7752 = vmatpush1.bf16.msra.mxu0 %v10914_v51  ;;  %7834 = vmatpush1.bf16.msra.mxu1 %v10917_v52  ;;  %v10992_v51 = vld [vmem:[#allocation22 + $0x1f0] ss:$48 sps:$4 sm:$0xff]   ;;  %v10995_v52 = vld [vmem:[#allocation22 + $0x1f8] ss:$48 sps:$4 sm:$0xff]  }
 0xfe0   :  { %7753 = vmatprep.subr.bf16.mxu0 %v10922_v53  ;;  %7835 = vmatprep.subr.bf16.mxu1 %v10925_v54  ;;  %v11000_v53 = vld [vmem:[#allocation22 + $0x254] ss:$48 sps:$4 sm:$0xff]   ;;  %v11003_v54 = vld [vmem:[#allocation22 + $0x25c] ss:$48 sps:$4 sm:$0xff]  }
 0xfe3   :  { %7754 = vmatpush1.bf16.msra.mxu0 %v10920_v55  ;;  %7836 = vmatpush1.bf16.msra.mxu1 %v10923_v56  ;;  %v10998_v55 = vld [vmem:[#allocation22 + $0x250] ss:$48 sps:$4 sm:$0xff]   ;;  %v11001_v56 = vld [vmem:[#allocation22 + $0x258] ss:$48 sps:$4 sm:$0xff]  }
 0xfe4   :  { %7755 = vmatprep.subr.bf16.mxu0 %v10928_v57  ;;  %7837 = vmatprep.subr.bf16.mxu1 %v10931_v60  ;;  %v11006_v57 = vld [vmem:[#allocation22 + $0x2b4] ss:$48 sps:$4 sm:$0xff]   ;;  %v11009_v60 = vld [vmem:[#allocation22 + $0x2bc] ss:$48 sps:$4 sm:$0xff]  }
 0xfe7   :  { %7756 = vmatpush1.bf16.msra.mxu0 %v10926_v61  ;;  %7838 = vmatpush1.bf16.msra.mxu1 %v10929_v49  ;;  %v11004_v61 = vld [vmem:[#allocation22 + $0x2b0] ss:$48 sps:$4 sm:$0xff]   ;;  %v11007_v49 = vld [vmem:[#allocation22 + $0x2b8] ss:$48 sps:$4 sm:$0xff]  }
 0xfe8   :  { %7757 = vmatprep.subr.bf16.mxu0 %v10934_v30  ;;  %7839 = vmatprep.subr.bf16.mxu1 %v10937_v63  ;;  %v11012_v30 = vld [vmem:[#allocation22 + $0x314] ss:$48 sps:$4 sm:$0xff]   ;;  %v11015_v63 = vld [vmem:[#allocation22 + $0x31c] ss:$48 sps:$4 sm:$0xff]  }
 0xfeb   :  { %7758 = vmatpush1.bf16.msra.mxu0 %v10932_v0  ;;  %7840 = vmatpush1.bf16.msra.mxu1 %v10935_v1  ;;  %v11010_v0 = vld [vmem:[#allocation22 + $0x310] ss:$48 sps:$4 sm:$0xff]   ;;  %v11013_v1 = vld [vmem:[#allocation22 + $0x318] ss:$48 sps:$4 sm:$0xff]  }
 0xfec   :  { %7759 = vmatprep.subr.bf16.mxu0 %v10940_v2  ;;  %7841 = vmatprep.subr.bf16.mxu1 %v10943_v3  ;;  %v11018_v2 = vld [vmem:[#allocation22 + $0x374] ss:$48 sps:$4 sm:$0xff]   ;;  %v11021_v3 = vld [vmem:[#allocation22 + $0x37c] ss:$48 sps:$4 sm:$0xff]  }
 0xfef   :  { %7760 = vmatpush1.bf16.msra.mxu0 %v10938_v4  ;;  %7842 = vmatpush1.bf16.msra.mxu1 %v10941_v5  ;;  %v11016_v4 = vld [vmem:[#allocation22 + $0x370] ss:$48 sps:$4 sm:$0xff]   ;;  %v11019_v5 = vld [vmem:[#allocation22 + $0x378] ss:$48 sps:$4 sm:$0xff]  }
 0xff0   :  { %7761 = vmatprep.subr.bf16.mxu0 %v10946_v7  ;;  %7843 = vmatprep.subr.bf16.mxu1 %v10949_v8  ;;  %v11024_v7 = vld [vmem:[#allocation22 + $0x3d4] ss:$48 sps:$4 sm:$0xff]   ;;  %v11027_v8 = vld [vmem:[#allocation22 + $0x3dc] ss:$48 sps:$4 sm:$0xff]  }
 0xff3   :  { %7762 = vmatpush1.bf16.msra.mxu0 %v10944_v9  ;;  %7844 = vmatpush1.bf16.msra.mxu1 %v10947_v10  ;;  %v11022_v9 = vld [vmem:[#allocation22 + $0x3d0] ss:$48 sps:$4 sm:$0xff]   ;;  %v11025_v10 = vld [vmem:[#allocation22 + $0x3d8] ss:$48 sps:$4 sm:$0xff]  }
 0xff4   :  { %7763 = vmatprep.subr.bf16.mxu0 %v10952_v13  ;;  %7845 = vmatprep.subr.bf16.mxu1 %v10955_v15  ;;  %v11033_v13 = vld [vmem:[#allocation22 + $0x43c] ss:$48 sps:$4 sm:$0xff]   ;;  %v11028_v15 = vld [vmem:[#allocation22 + $0x430] ss:$48 sps:$4 sm:$0xff]  }
 0xff7   :  { %7764 = vmatpush1.bf16.msra.mxu0 %v10950_v16  ;;  %7846 = vmatpush1.bf16.msra.mxu1 %v10953_v17  ;;  %v11031_v16 = vld [vmem:[#allocation22 + $0x438] ss:$48 sps:$4 sm:$0xff]   ;;  %v11036_v17 = vld [vmem:[#allocation22 + $0x494] ss:$48 sps:$4 sm:$0xff]  }
 0xff8   :  { %7765 = vmatprep.subr.bf16.mxu0 %v10958_v19  ;;  %7847 = vmatprep.subr.bf16.mxu1 %v10961_v20  ;;  %v11034_v19 = vld [vmem:[#allocation22 + $0x490] ss:$48 sps:$4 sm:$0xff]   ;;  %v11037_v20 = vld [vmem:[#allocation22 + $0x498] ss:$48 sps:$4 sm:$0xff]  }
 0xffb   :  { %7766 = vmatpush1.bf16.msra.mxu0 %v10956_v21  ;;  %7848 = vmatpush1.bf16.msra.mxu1 %v10959_v22  ;;  %v11042_v21 = vld [vmem:[#allocation22 + $0x4f4] ss:$48 sps:$4 sm:$0xff]   ;;  %v11045_v22 = vld [vmem:[#allocation22 + $0x4fc] ss:$48 sps:$4 sm:$0xff]  }
 0xffc   :  { %7858 = vmatprep.subr.bf16.mxu0 %v10964_v58  ;;  %7940 = vmatprep.subr.bf16.mxu1 %v10967_v24  ;;  %v11043_v58 = vld [vmem:[#allocation22 + $0x4f8] ss:$48 sps:$4 sm:$0xff]   ;;  %v11048_v24 = vld [vmem:[#allocation22 + $0x554] ss:$48 sps:$4 sm:$0xff]  }
 0xffe   :  { %7768 = vmatmul.mubr.bf16.vlgmr.msra.gmra.mrb[64].mxu0 %v12944_v26  ;;  %7850 = vmatmul.mubr.bf16.vlgmr.msra.gmra.mrb[76].mxu1 %v12944_v26 }
 0xfff   :  { %7859 = vmatpush1.bf16.msra.mxu0 %v10962_v25  ;;  %7890 = vmatprep.mubr.bf16.mxu0 %v12926_v11  ;;  %v11051_v25 = vld [vmem:[#allocation22 + $0x55c] ss:$48 sps:$4 sm:$0xff]  }
0x1000   :  { %7941 = vmatpush1.bf16.msra.mxu1 %v10965_v62  ;;  %7972 = vmatprep.mubr.bf16.mxu1 %v12926_v11  ;;  %v11046_v62 = vld [vmem:[#allocation22 + $0x550] ss:$48 sps:$4 sm:$0xff]  }
0x1001   :  { %7860 = vmatprep.subr.bf16.mxu0 %v10970_v27  ;;  %7942 = vmatprep.subr.bf16.mxu1 %v10973_v28  ;;  %v11049_v27 = vld [vmem:[#allocation22 + $0x558] ss:$48 sps:$4 sm:$0xff]   ;;  %v11054_v28 = vld [vmem:[#allocation22 + $0x5b4] ss:$48 sps:$4 sm:$0xff]  }
0x1003   :  { %7861 = vmatpush1.bf16.msra.mxu0 %v10968_v29  ;;  %v11057_v29 = vld [vmem:[#allocation22 + $0x5bc] ss:$48 sps:$4 sm:$0xff]  }
0x1004   :  { %7943 = vmatpush1.bf16.msra.mxu1 %v10971_v31  ;;  %7862 = vmatprep.subr.bf16.mxu0 %v10976_v32  ;;  %v11052_v31 = vld [vmem:[#allocation22 + $0x5b0] ss:$48 sps:$4 sm:$0xff]   ;;  %v11055_v32 = vld [vmem:[#allocation22 + $0x5b8] ss:$48 sps:$4 sm:$0xff]  }
0x1005   :  { %7944 = vmatprep.subr.bf16.mxu1 %v10979_v33  ;;  %v11060_v33 = vld [vmem:[#allocation22 + $0x614] ss:$48 sps:$4 sm:$0xff]  }
0x1007   :  { %7863 = vmatpush1.bf16.msra.mxu0 %v10974_v34  ;;  %v11063_v34 = vld [vmem:[#allocation22 + $0x61c] ss:$48 sps:$4 sm:$0xff]  }
0x1008   :  { %7945 = vmatpush1.bf16.msra.mxu1 %v10977_v37  ;;  %7864 = vmatprep.subr.bf16.mxu0 %v10982_v39  ;;  %v11058_v37 = vld [vmem:[#allocation22 + $0x610] ss:$48 sps:$4 sm:$0xff]   ;;  %v11061_v39 = vld [vmem:[#allocation22 + $0x618] ss:$48 sps:$4 sm:$0xff]  }
0x1009   :  { %7946 = vmatprep.subr.bf16.mxu1 %v10985_v40  ;;  %v11066_v40 = vld [vmem:[#allocation22 + $0x674] ss:$48 sps:$4 sm:$0xff]  }
0x100b   :  { %7865 = vmatpush1.bf16.msra.mxu0 %v10980_v41  ;;  %v11069_v41 = vld [vmem:[#allocation22 + $0x67c] ss:$48 sps:$4 sm:$0xff]  }
0x100c   :  { %7947 = vmatpush1.bf16.msra.mxu1 %v10983_v42  ;;  %7866 = vmatprep.subr.bf16.mxu0 %v10988_v43  ;;  %v11064_v42 = vld [vmem:[#allocation22 + $0x670] ss:$48 sps:$4 sm:$0xff]   ;;  %v11067_v43 = vld [vmem:[#allocation22 + $0x678] ss:$48 sps:$4 sm:$0xff]  }
0x100d   :  { %7948 = vmatprep.subr.bf16.mxu1 %v10991_v44  ;;  %v11072_v44 = vld [vmem:[#allocation22 + $0x6d4] ss:$48 sps:$4 sm:$0xff]  }
0x100f   :  { %7867 = vmatpush1.bf16.msra.mxu0 %v10986_v45  ;;  %v11075_v45 = vld [vmem:[#allocation22 + $0x6dc] ss:$48 sps:$4 sm:$0xff]  }
0x1010   :  { %7949 = vmatpush1.bf16.msra.mxu1 %v10989_v46  ;;  %7868 = vmatprep.subr.bf16.mxu0 %v10994_v47  ;;  %v11070_v46 = vld [vmem:[#allocation22 + $0x6d0] ss:$48 sps:$4 sm:$0xff]   ;;  %v11073_v47 = vld [vmem:[#allocation22 + $0x6d8] ss:$48 sps:$4 sm:$0xff]  }
0x1011   :  { %7950 = vmatprep.subr.bf16.mxu1 %v10997_v48  ;;  %v11078_v48 = vld [vmem:[#allocation22 + $0x734] ss:$48 sps:$4 sm:$0xff]  }
0x1013   :  { %7869 = vmatpush1.bf16.msra.mxu0 %v10992_v51  ;;  %v11081_v51 = vld [vmem:[#allocation22 + $0x73c] ss:$48 sps:$4 sm:$0xff]  }
0x1014   :  { %7951 = vmatpush1.bf16.msra.mxu1 %v10995_v52  ;;  %7870 = vmatprep.subr.bf16.mxu0 %v11000_v53  ;;  %v11076_v52 = vld [vmem:[#allocation22 + $0x730] ss:$48 sps:$4 sm:$0xff]   ;;  %v11079_v53 = vld [vmem:[#allocation22 + $0x738] ss:$48 sps:$4 sm:$0xff]  }
0x1015   :  { %7952 = vmatprep.subr.bf16.mxu1 %v11003_v54  ;;  %v11084_v54 = vld [vmem:[#allocation22 + $0x794] ss:$48 sps:$4 sm:$0xff]  }
0x1017   :  { %7871 = vmatpush1.bf16.msra.mxu0 %v10998_v55  ;;  %v11087_v55 = vld [vmem:[#allocation22 + $0x79c] ss:$48 sps:$4 sm:$0xff]  }
0x1018   :  { %7953 = vmatpush1.bf16.msra.mxu1 %v11001_v56  ;;  %7872 = vmatprep.subr.bf16.mxu0 %v11006_v57  ;;  %v11082_v56 = vld [vmem:[#allocation22 + $0x790] ss:$48 sps:$4 sm:$0xff]   ;;  %v11085_v57 = vld [vmem:[#allocation22 + $0x798] ss:$48 sps:$4 sm:$0xff]  }
0x1019   :  { %7954 = vmatprep.subr.bf16.mxu1 %v11009_v60  ;;  %v11090_v60 = vld [vmem:[#allocation22 + $0x7f4] ss:$48 sps:$4 sm:$0xff]  }
0x101b   :  { %7873 = vmatpush1.bf16.msra.mxu0 %v11004_v61  ;;  %v11093_v61 = vld [vmem:[#allocation22 + $0x7fc] ss:$48 sps:$4 sm:$0xff]  }
0x101c   :  { %7955 = vmatpush1.bf16.msra.mxu1 %v11007_v49  ;;  %7874 = vmatprep.subr.bf16.mxu0 %v11012_v30  ;;  %v11088_v49 = vld [vmem:[#allocation22 + $0x7f0] ss:$48 sps:$4 sm:$0xff]   ;;  %v11091_v30 = vld [vmem:[#allocation22 + $0x7f8] ss:$48 sps:$4 sm:$0xff]  }
0x101d   :  { %7956 = vmatprep.subr.bf16.mxu1 %v11015_v63  ;;  %v11096_v63 = vld [vmem:[#allocation22 + $0x854] ss:$48 sps:$4 sm:$0xff]  }
0x101f   :  { %7875 = vmatpush1.bf16.msra.mxu0 %v11010_v0  ;;  %v11099_v0 = vld [vmem:[#allocation22 + $0x85c] ss:$48 sps:$4 sm:$0xff]  }
0x1020   :  { %7957 = vmatpush1.bf16.msra.mxu1 %v11013_v1  ;;  %7876 = vmatprep.subr.bf16.mxu0 %v11018_v2  ;;  %v11094_v1 = vld [vmem:[#allocation22 + $0x850] ss:$48 sps:$4 sm:$0xff]   ;;  %v11097_v2 = vld [vmem:[#allocation22 + $0x858] ss:$48 sps:$4 sm:$0xff]  }
0x1021   :  { %7958 = vmatprep.subr.bf16.mxu1 %v11021_v3  ;;  %v11102_v3 = vld [vmem:[#allocation22 + $0x8b4] ss:$48 sps:$4 sm:$0xff]  }
0x1023   :  { %7877 = vmatpush1.bf16.msra.mxu0 %v11016_v4  ;;  %v11105_v4 = vld [vmem:[#allocation22 + $0x8bc] ss:$48 sps:$4 sm:$0xff]  }
0x1024   :  { %7959 = vmatpush1.bf16.msra.mxu1 %v11019_v5  ;;  %7878 = vmatprep.subr.bf16.mxu0 %v11024_v7  ;;  %v11100_v5 = vld [vmem:[#allocation22 + $0x8b0] ss:$48 sps:$4 sm:$0xff]   ;;  %v11103_v7 = vld [vmem:[#allocation22 + $0x8b8] ss:$48 sps:$4 sm:$0xff]  }
0x1025   :  { %7960 = vmatprep.subr.bf16.mxu1 %v11027_v8  ;;  %v11108_v8 = vld [vmem:[#allocation22 + $0x914] ss:$48 sps:$4 sm:$0xff]  }
0x1027   :  { %7879 = vmatpush1.bf16.msra.mxu0 %v11022_v9  ;;  %v11111_v9 = vld [vmem:[#allocation22 + $0x91c] ss:$48 sps:$4 sm:$0xff]  }
0x1028   :  { %7961 = vmatpush1.bf16.msra.mxu1 %v11025_v10  ;;  %7880 = vmatprep.subr.bf16.mxu0 %v11030_v12  ;;  %v11106_v10 = vld [vmem:[#allocation22 + $0x910] ss:$48 sps:$4 sm:$0xff]   ;;  %v11109_v12 = vld [vmem:[#allocation22 + $0x918] ss:$48 sps:$4 sm:$0xff]  }
0x1029   :  { %7962 = vmatprep.subr.bf16.mxu1 %v11033_v13  ;;  %v11114_v13 = vld [vmem:[#allocation22 + $0x974] ss:$48 sps:$4 sm:$0xff]  }
0x102b   :  { %7881 = vmatpush1.bf16.msra.mxu0 %v11028_v15  ;;  %v11117_v15 = vld [vmem:[#allocation22 + $0x97c] ss:$48 sps:$4 sm:$0xff]  }
0x102c   :  { %7963 = vmatpush1.bf16.msra.mxu1 %v11031_v16  ;;  %7882 = vmatprep.subr.bf16.mxu0 %v11036_v17  ;;  %v11112_v16 = vld [vmem:[#allocation22 + $0x970] ss:$48 sps:$4 sm:$0xff]   ;;  %v11115_v17 = vld [vmem:[#allocation22 + $0x978] ss:$48 sps:$4 sm:$0xff]  }
0x102d   :  { %7964 = vmatprep.subr.bf16.mxu1 %v11039_v18  ;;  %v11120_v18 = vld [vmem:[#allocation22 + $0x9d4] ss:$48 sps:$4 sm:$0xff]  }
0x102f   :  { %7883 = vmatpush1.bf16.msra.mxu0 %v11034_v19  ;;  %v11123_v19 = vld [vmem:[#allocation22 + $0x9dc] ss:$48 sps:$4 sm:$0xff]  }
0x1030   :  { %7965 = vmatpush1.bf16.msra.mxu1 %v11037_v20  ;;  %7884 = vmatprep.subr.bf16.mxu0 %v11042_v21  ;;  %v11118_v20 = vld [vmem:[#allocation22 + $0x9d0] ss:$48 sps:$4 sm:$0xff]   ;;  %v11121_v21 = vld [vmem:[#allocation22 + $0x9d8] ss:$48 sps:$4 sm:$0xff]  }
0x1031   :  { %7966 = vmatprep.subr.bf16.mxu1 %v11045_v22  ;;  %v11126_v22 = vld [vmem:[#allocation22 + $0xa34] ss:$48 sps:$4 sm:$0xff]  }
0x1033   :  { %7885 = vmatpush1.bf16.msra.mxu0 %v11040_v23  ;;  %v11129_v23 = vld [vmem:[#allocation22 + $0xa3c] ss:$48 sps:$4 sm:$0xff]  }
0x1034   :  { %7967 = vmatpush1.bf16.msra.mxu1 %v11043_v58  ;;  %7886 = vmatprep.subr.bf16.mxu0 %v11048_v24  ;;  %v11124_v58 = vld [vmem:[#allocation22 + $0xa30] ss:$48 sps:$4 sm:$0xff]   ;;  %v11127_v24 = vld [vmem:[#allocation22 + $0xa38] ss:$48 sps:$4 sm:$0xff]  }
0x1035   :  { %7968 = vmatprep.subr.bf16.mxu1 %v11051_v25  ;;  %v11132_v25 = vld [vmem:[#allocation22 + $0xa94] ss:$48 sps:$4 sm:$0xff]  }
0x1037   :  { %7887 = vmatpush1.bf16.msra.mxu0 %v11046_v62  ;;  %v11135_v62 = vld [vmem:[#allocation22 + $0xa9c] ss:$48 sps:$4 sm:$0xff]  }
0x1038   :  { %7969 = vmatpush1.bf16.msra.mxu1 %v11049_v27  ;;  %7888 = vmatprep.subr.bf16.mxu0 %v11054_v28  ;;  %v11130_v27 = vld [vmem:[#allocation22 + $0xa90] ss:$48 sps:$4 sm:$0xff]   ;;  %v11133_v28 = vld [vmem:[#allocation22 + $0xa98] ss:$48 sps:$4 sm:$0xff]  }
0x1039   :  { %7970 = vmatprep.subr.bf16.mxu1 %v11057_v29  ;;  %v11138_v29 = vld [vmem:[#allocation22 + $0xaf4] ss:$48 sps:$4 sm:$0xff]  }
0x103b   :  { %7889 = vmatpush1.bf16.msra.mxu0 %v11052_v31  ;;  %v11141_v31 = vld [vmem:[#allocation22 + $0xafc] ss:$48 sps:$4 sm:$0xff]  }
0x103c   :  { %7971 = vmatpush1.bf16.msra.mxu1 %v11055_v32  ;;  %7899 = vmatprep.subr.bf16.mxu0 %v11060_v33  ;;  %v11136_v32 = vld [vmem:[#allocation22 + $0xaf0] ss:$48 sps:$4 sm:$0xff]   ;;  %v11139_v33 = vld [vmem:[#allocation22 + $0xaf8] ss:$48 sps:$4 sm:$0xff]  }
0x103d   :  { %7981 = vmatprep.subr.bf16.mxu1 %v11063_v34  ;;  %v11144_v34 = vld [vmem:[#allocation22 + $0xb54] ss:$48 sps:$4 sm:$0xff]  }
0x103e   :  { %7891 = vmatmul.mubr.bf16.vlgmr.msra.gmra.mrb[68].mxu0 %v12928_v14 }
0x103f   :  { %7973 = vmatmul.mubr.bf16.vlgmr.msra.gmra.mrb[80].mxu1 %v12928_v14  ;;  %7900 = vmatpush1.bf16.msra.mxu0 %v11058_v37  ;;  %v11147_v37 = vld [vmem:[#allocation22 + $0xb5c] ss:$48 sps:$4 sm:$0xff]  }
0x1040   :  { %7931 = vmatprep.mubr.bf16.mxu0 %v12932_v50  ;;  %7982 = vmatpush1.bf16.msra.mxu1 %v11061_v39  ;;  %v11142_v39 = vld [vmem:[#allocation22 + $0xb50] ss:$48 sps:$4 sm:$0xff]  }
0x1041   :  { %8013 = vmatprep.mubr.bf16.mxu1 %v12932_v50  ;;  %7901 = vmatprep.subr.bf16.mxu0 %v11066_v40  ;;  %v11145_v40 = vld [vmem:[#allocation22 + $0xb58] ss:$48 sps:$4 sm:$0xff]  }
0x1042   :  { %7983 = vmatprep.subr.bf16.mxu1 %v11069_v41  ;;  %v11150_v41 = vld [vmem:[#allocation22 + $0xbb4] ss:$48 sps:$4 sm:$0xff]  }
0x1043   :  { %7902 = vmatpush1.bf16.msra.mxu0 %v11064_v42  ;;  %v11153_v42 = vld [vmem:[#allocation22 + $0xbbc] ss:$48 sps:$4 sm:$0xff]  }
0x1044   :  { %7984 = vmatpush1.bf16.msra.mxu1 %v11067_v43  ;;  %7903 = vmatprep.subr.bf16.mxu0 %v11072_v44  ;;  %v11148_v43 = vld [vmem:[#allocation22 + $0xbb0] ss:$48 sps:$4 sm:$0xff]   ;;  %v11151_v44 = vld [vmem:[#allocation22 + $0xbb8] ss:$48 sps:$4 sm:$0xff]  }
0x1045   :  { %7985 = vmatprep.subr.bf16.mxu1 %v11075_v45  ;;  %v11156_v45 = vld [vmem:[#allocation22 + $0x24] ss:$48 sps:$4 sm:$0xff]  }
0x1047   :  { %7904 = vmatpush1.bf16.msra.mxu0 %v11070_v46  ;;  %v11159_v46 = vld [vmem:[#allocation22 + $0x2c] ss:$48 sps:$4 sm:$0xff]  }
0x1048   :  { %7986 = vmatpush1.bf16.msra.mxu1 %v11073_v47  ;;  %7905 = vmatprep.subr.bf16.mxu0 %v11078_v48  ;;  %v11154_v47 = vld [vmem:[#allocation22 + $0x20] ss:$48 sps:$4 sm:$0xff]   ;;  %v11157_v48 = vld [vmem:[#allocation22 + $0x28] ss:$48 sps:$4 sm:$0xff]  }
0x1049   :  { %7987 = vmatprep.subr.bf16.mxu1 %v11081_v51  ;;  %v11162_v51 = vld [vmem:[#allocation22 + $0x84] ss:$48 sps:$4 sm:$0xff]  }
0x104b   :  { %7906 = vmatpush1.bf16.msra.mxu0 %v11076_v52  ;;  %v11165_v52 = vld [vmem:[#allocation22 + $0x8c] ss:$48 sps:$4 sm:$0xff]  }
0x104c   :  { %7988 = vmatpush1.bf16.msra.mxu1 %v11079_v53  ;;  %7907 = vmatprep.subr.bf16.mxu0 %v11084_v54  ;;  %v11160_v53 = vld [vmem:[#allocation22 + $0x80] ss:$48 sps:$4 sm:$0xff]   ;;  %v11163_v54 = vld [vmem:[#allocation22 + $0x88] ss:$48 sps:$4 sm:$0xff]  }
0x104d   :  { %7989 = vmatprep.subr.bf16.mxu1 %v11087_v55  ;;  %v11168_v55 = vld [vmem:[#allocation22 + $0xe4] ss:$48 sps:$4 sm:$0xff]  }
0x104f   :  { %7908 = vmatpush1.bf16.msra.mxu0 %v11082_v56  ;;  %v11171_v56 = vld [vmem:[#allocation22 + $0xec] ss:$48 sps:$4 sm:$0xff]  }
0x1050   :  { %7990 = vmatpush1.bf16.msra.mxu1 %v11085_v57  ;;  %7909 = vmatprep.subr.bf16.mxu0 %v11090_v60  ;;  %v11166_v57 = vld [vmem:[#allocation22 + $0xe0] ss:$48 sps:$4 sm:$0xff]   ;;  %v11169_v60 = vld [vmem:[#allocation22 + $0xe8] ss:$48 sps:$4 sm:$0xff]  }
0x1051   :  { %7991 = vmatprep.subr.bf16.mxu1 %v11093_v61  ;;  %v11174_v61 = vld [vmem:[#allocation22 + $0x144] ss:$48 sps:$4 sm:$0xff]  }
0x1053   :  { %7910 = vmatpush1.bf16.msra.mxu0 %v11088_v49  ;;  %v11177_v49 = vld [vmem:[#allocation22 + $0x14c] ss:$48 sps:$4 sm:$0xff]  }
0x1054   :  { %7992 = vmatpush1.bf16.msra.mxu1 %v11091_v30  ;;  %7911 = vmatprep.subr.bf16.mxu0 %v11096_v63  ;;  %v11172_v30 = vld [vmem:[#allocation22 + $0x140] ss:$48 sps:$4 sm:$0xff]   ;;  %v11175_v63 = vld [vmem:[#allocation22 + $0x148] ss:$48 sps:$4 sm:$0xff]  }
0x1055   :  { %7993 = vmatprep.subr.bf16.mxu1 %v11099_v0  ;;  %v11180_v0 = vld [vmem:[#allocation22 + $0x1a4] ss:$48 sps:$4 sm:$0xff]  }
0x1057   :  { %7912 = vmatpush1.bf16.msra.mxu0 %v11094_v1  ;;  %v11183_v1 = vld [vmem:[#allocation22 + $0x1ac] ss:$48 sps:$4 sm:$0xff]  }
0x1058   :  { %7994 = vmatpush1.bf16.msra.mxu1 %v11097_v2  ;;  %7913 = vmatprep.subr.bf16.mxu0 %v11102_v3  ;;  %v11181_v2 = vld [vmem:[#allocation22 + $0x1a8] ss:$48 sps:$4 sm:$0xff]   ;;  %v11186_v3 = vld [vmem:[#allocation22 + $0x204] ss:$48 sps:$4 sm:$0xff]  }
0x1059   :  { %7995 = vmatprep.subr.bf16.mxu1 %v11105_v4  ;;  %v11189_v4 = vld [vmem:[#allocation22 + $0x20c] ss:$48 sps:$4 sm:$0xff]  }
0x105b   :  { %7914 = vmatpush1.bf16.msra.mxu0 %v11100_v5  ;;  %v11184_v5 = vld [vmem:[#allocation22 + $0x200] ss:$48 sps:$4 sm:$0xff]  }
0x105c   :  { %7996 = vmatpush1.bf16.msra.mxu1 %v11103_v7  ;;  %7915 = vmatprep.subr.bf16.mxu0 %v11108_v8  ;;  %v11187_v7 = vld [vmem:[#allocation22 + $0x208] ss:$48 sps:$4 sm:$0xff]   ;;  %v11192_v8 = vld [vmem:[#allocation22 + $0x264] ss:$48 sps:$4 sm:$0xff]  }
0x105d   :  { %7997 = vmatprep.subr.bf16.mxu1 %v11111_v9  ;;  %v11195_v9 = vld [vmem:[#allocation22 + $0x26c] ss:$48 sps:$4 sm:$0xff]  }
0x105f   :  { %7916 = vmatpush1.bf16.msra.mxu0 %v11106_v10  ;;  %v11190_v10 = vld [vmem:[#allocation22 + $0x260] ss:$48 sps:$4 sm:$0xff]  }
0x1060   :  { %7998 = vmatpush1.bf16.msra.mxu1 %v11109_v12  ;;  %7917 = vmatprep.subr.bf16.mxu0 %v11114_v13  ;;  %v11193_v12 = vld [vmem:[#allocation22 + $0x268] ss:$48 sps:$4 sm:$0xff]   ;;  %v11198_v13 = vld [vmem:[#allocation22 + $0x2c4] ss:$48 sps:$4 sm:$0xff]  }
0x1061   :  { %7999 = vmatprep.subr.bf16.mxu1 %v11117_v15  ;;  %v11201_v15 = vld [vmem:[#allocation22 + $0x2cc] ss:$48 sps:$4 sm:$0xff]  }
0x1063   :  { %7918 = vmatpush1.bf16.msra.mxu0 %v11112_v16  ;;  %v11196_v16 = vld [vmem:[#allocation22 + $0x2c0] ss:$48 sps:$4 sm:$0xff]  }
0x1064   :  { %8000 = vmatpush1.bf16.msra.mxu1 %v11115_v17  ;;  %7919 = vmatprep.subr.bf16.mxu0 %v11120_v18  ;;  %v11199_v17 = vld [vmem:[#allocation22 + $0x2c8] ss:$48 sps:$4 sm:$0xff]   ;;  %v11204_v18 = vld [vmem:[#allocation22 + $0x324] ss:$48 sps:$4 sm:$0xff]  }
0x1065   :  { %8001 = vmatprep.subr.bf16.mxu1 %v11123_v19  ;;  %v11207_v19 = vld [vmem:[#allocation22 + $0x32c] ss:$48 sps:$4 sm:$0xff]  }
0x1067   :  { %7920 = vmatpush1.bf16.msra.mxu0 %v11118_v20  ;;  %v11202_v20 = vld [vmem:[#allocation22 + $0x320] ss:$48 sps:$4 sm:$0xff]  }
0x1068   :  { %8002 = vmatpush1.bf16.msra.mxu1 %v11121_v21  ;;  %7921 = vmatprep.subr.bf16.mxu0 %v11126_v22  ;;  %v11205_v21 = vld [vmem:[#allocation22 + $0x328] ss:$48 sps:$4 sm:$0xff]   ;;  %v11210_v22 = vld [vmem:[#allocation22 + $0x384] ss:$48 sps:$4 sm:$0xff]  }
0x1069   :  { %8003 = vmatprep.subr.bf16.mxu1 %v11129_v23  ;;  %v11213_v23 = vld [vmem:[#allocation22 + $0x38c] ss:$48 sps:$4 sm:$0xff]  }
0x106b   :  { %7922 = vmatpush1.bf16.msra.mxu0 %v11124_v58  ;;  %v11208_v58 = vld [vmem:[#allocation22 + $0x380] ss:$48 sps:$4 sm:$0xff]  }
0x106c   :  { %8004 = vmatpush1.bf16.msra.mxu1 %v11127_v24  ;;  %7923 = vmatprep.subr.bf16.mxu0 %v11132_v25  ;;  %v11211_v24 = vld [vmem:[#allocation22 + $0x388] ss:$48 sps:$4 sm:$0xff]   ;;  %v11216_v25 = vld [vmem:[#allocation22 + $0x3e4] ss:$48 sps:$4 sm:$0xff]  }
0x106d   :  { %8005 = vmatprep.subr.bf16.mxu1 %v11135_v62  ;;  %v11219_v62 = vld [vmem:[#allocation22 + $0x3ec] ss:$48 sps:$4 sm:$0xff]  }
0x106f   :  { %7924 = vmatpush1.bf16.msra.mxu0 %v11130_v27  ;;  %v11214_v27 = vld [vmem:[#allocation22 + $0x3e0] ss:$48 sps:$4 sm:$0xff]  }
0x1070   :  { %8006 = vmatpush1.bf16.msra.mxu1 %v11133_v28  ;;  %7925 = vmatprep.subr.bf16.mxu0 %v11138_v29  ;;  %v11217_v28 = vld [vmem:[#allocation22 + $0x3e8] ss:$48 sps:$4 sm:$0xff]   ;;  %v11222_v29 = vld [vmem:[#allocation22 + $0x444] ss:$48 sps:$4 sm:$0xff]  }
0x1071   :  { %8007 = vmatprep.subr.bf16.mxu1 %v11141_v31  ;;  %v11225_v31 = vld [vmem:[#allocation22 + $0x44c] ss:$48 sps:$4 sm:$0xff]  }
0x1073   :  { %7926 = vmatpush1.bf16.msra.mxu0 %v11136_v32  ;;  %v11220_v32 = vld [vmem:[#allocation22 + $0x440] ss:$48 sps:$4 sm:$0xff]  }
0x1074   :  { %8008 = vmatpush1.bf16.msra.mxu1 %v11139_v33  ;;  %7927 = vmatprep.subr.bf16.mxu0 %v11144_v34  ;;  %v11223_v33 = vld [vmem:[#allocation22 + $0x448] ss:$48 sps:$4 sm:$0xff]   ;;  %v11228_v34 = vld [vmem:[#allocation22 + $0x4a4] ss:$48 sps:$4 sm:$0xff]  }
0x1075   :  { %8009 = vmatprep.subr.bf16.mxu1 %v11147_v37  ;;  %v11231_v37 = vld [vmem:[#allocation22 + $0x4ac] ss:$48 sps:$4 sm:$0xff]  }
0x1077   :  { %7928 = vmatpush1.bf16.msra.mxu0 %v11142_v39  ;;  %v11226_v39 = vld [vmem:[#allocation22 + $0x4a0] ss:$48 sps:$4 sm:$0xff]  }
0x1078   :  { %8010 = vmatpush1.bf16.msra.mxu1 %v11145_v40  ;;  %7929 = vmatprep.subr.bf16.mxu0 %v11150_v41  ;;  %v11229_v40 = vld [vmem:[#allocation22 + $0x4a8] ss:$48 sps:$4 sm:$0xff]   ;;  %v11234_v41 = vld [vmem:[#allocation22 + $0x504] ss:$48 sps:$4 sm:$0xff]  }
0x1079   :  { %8011 = vmatprep.subr.bf16.mxu1 %v11153_v42  ;;  %v11237_v42 = vld [vmem:[#allocation22 + $0x50c] ss:$48 sps:$4 sm:$0xff]  }
0x107b   :  { %7930 = vmatpush1.bf16.msra.mxu0 %v11148_v43  ;;  %v11232_v43 = vld [vmem:[#allocation22 + $0x500] ss:$48 sps:$4 sm:$0xff]  }
0x107c   :  { %8012 = vmatpush1.bf16.msra.mxu1 %v11151_v44  ;;  %8022 = vmatprep.subr.bf16.mxu0 %v11156_v45  ;;  %v11235_v44 = vld [vmem:[#allocation22 + $0x508] ss:$48 sps:$4 sm:$0xff]   ;;  %v11240_v45 = vld [vmem:[#allocation22 + $0x564] ss:$48 sps:$4 sm:$0xff]  }
0x107d   :  { %8104 = vmatprep.subr.bf16.mxu1 %v11159_v46  ;;  %v11243_v46 = vld [vmem:[#allocation22 + $0x56c] ss:$48 sps:$4 sm:$0xff]  }
0x107e   :  { %7932 = vmatmul.mubr.bf16.vlgmr.msra.gmra.mrb[68].mxu0 %v12944_v26 }
0x107f   :  { %8014 = vmatmul.mubr.bf16.vlgmr.msra.gmra.mrb[80].mxu1 %v12944_v26  ;;  %8023 = vmatpush1.bf16.msra.mxu0 %v11154_v47  ;;  %v11238_v47 = vld [vmem:[#allocation22 + $0x560] ss:$48 sps:$4 sm:$0xff]  }
0x1080   :  { %8054 = vmatprep.mubr.bf16.mxu0 %v12926_v11  ;;  %8105 = vmatpush1.bf16.msra.mxu1 %v11157_v48  ;;  %v11241_v48 = vld [vmem:[#allocation22 + $0x568] ss:$48 sps:$4 sm:$0xff]  }
0x1081   :  { %8136 = vmatprep.mubr.bf16.mxu1 %v12926_v11  ;;  %8024 = vmatprep.subr.bf16.mxu0 %v11162_v51  ;;  %v11178_v11 = vld [vmem:[#allocation22 + $0x1a0] ss:$48 sps:$4 sm:$0xff]   ;;  %v11246_v51 = vld [vmem:[#allocation22 + $0x5c4] ss:$48 sps:$4 sm:$0xff]  }
0x1082   :  { %8106 = vmatprep.subr.bf16.mxu1 %v11165_v52  ;;  %v11249_v52 = vld [vmem:[#allocation22 + $0x5cc] ss:$48 sps:$4 sm:$0xff]  }
0x1083   :  { %8025 = vmatpush1.bf16.msra.mxu0 %v11160_v53  ;;  %v11244_v53 = vld [vmem:[#allocation22 + $0x5c0] ss:$48 sps:$4 sm:$0xff]  }
0x1084   :  { %8107 = vmatpush1.bf16.msra.mxu1 %v11163_v54  ;;  %8026 = vmatprep.subr.bf16.mxu0 %v11168_v55  ;;  %v11247_v54 = vld [vmem:[#allocation22 + $0x5c8] ss:$48 sps:$4 sm:$0xff]   ;;  %v11252_v55 = vld [vmem:[#allocation22 + $0x624] ss:$48 sps:$4 sm:$0xff]  }
0x1085   :  { %8108 = vmatprep.subr.bf16.mxu1 %v11171_v56  ;;  %v11255_v56 = vld [vmem:[#allocation22 + $0x62c] ss:$48 sps:$4 sm:$0xff]  }
0x1087   :  { %8027 = vmatpush1.bf16.msra.mxu0 %v11166_v57  ;;  %v11250_v57 = vld [vmem:[#allocation22 + $0x620] ss:$48 sps:$4 sm:$0xff]  }
0x1088   :  { %8109 = vmatpush1.bf16.msra.mxu1 %v11169_v60  ;;  %8028 = vmatprep.subr.bf16.mxu0 %v11174_v61  ;;  %v11253_v60 = vld [vmem:[#allocation22 + $0x628] ss:$48 sps:$4 sm:$0xff]   ;;  %v11258_v61 = vld [vmem:[#allocation22 + $0x684] ss:$48 sps:$4 sm:$0xff]  }
0x1089   :  { %8110 = vmatprep.subr.bf16.mxu1 %v11177_v49  ;;  %v11261_v49 = vld [vmem:[#allocation22 + $0x68c] ss:$48 sps:$4 sm:$0xff]  }
0x108b   :  { %8029 = vmatpush1.bf16.msra.mxu0 %v11172_v30  ;;  %v11256_v30 = vld [vmem:[#allocation22 + $0x680] ss:$48 sps:$4 sm:$0xff]  }
0x108c   :  { %8111 = vmatpush1.bf16.msra.mxu1 %v11175_v63  ;;  %8030 = vmatprep.subr.bf16.mxu0 %v11180_v0  ;;  %v11259_v63 = vld [vmem:[#allocation22 + $0x688] ss:$48 sps:$4 sm:$0xff]   ;;  %v11264_v0 = vld [vmem:[#allocation22 + $0x6e4] ss:$48 sps:$4 sm:$0xff]  }
0x108d   :  { %8112 = vmatprep.subr.bf16.mxu1 %v11183_v1  ;;  %v11267_v1 = vld [vmem:[#allocation22 + $0x6ec] ss:$48 sps:$4 sm:$0xff]  }
0x108f   :  { %8031 = vmatpush1.bf16.msra.mxu0 %v11178_v11  ;;  %v11262_v11 = vld [vmem:[#allocation22 + $0x6e0] ss:$48 sps:$4 sm:$0xff]  }
0x1090   :  { %8113 = vmatpush1.bf16.msra.mxu1 %v11181_v2  ;;  %8032 = vmatprep.subr.bf16.mxu0 %v11186_v3  ;;  %v11265_v2 = vld [vmem:[#allocation22 + $0x6e8] ss:$48 sps:$4 sm:$0xff]   ;;  %v11270_v3 = vld [vmem:[#allocation22 + $0x744] ss:$48 sps:$4 sm:$0xff]  }
0x1091   :  { %8114 = vmatprep.subr.bf16.mxu1 %v11189_v4  ;;  %v11268_v4 = vld [vmem:[#allocation22 + $0x740] ss:$48 sps:$4 sm:$0xff]  }
0x1093   :  { %8033 = vmatpush1.bf16.msra.mxu0 %v11184_v5  ;;  %v11271_v5 = vld [vmem:[#allocation22 + $0x748] ss:$48 sps:$4 sm:$0xff]  }
0x1094   :  { %8115 = vmatpush1.bf16.msra.mxu1 %v11187_v7  ;;  %8034 = vmatprep.subr.bf16.mxu0 %v11192_v8  ;;  %v11276_v7 = vld [vmem:[#allocation22 + $0x7a4] ss:$48 sps:$4 sm:$0xff]   ;;  %v11279_v8 = vld [vmem:[#allocation22 + $0x7ac] ss:$48 sps:$4 sm:$0xff]  }
0x1095   :  { %8116 = vmatprep.subr.bf16.mxu1 %v11195_v9  ;;  %v11277_v9 = vld [vmem:[#allocation22 + $0x7a8] ss:$48 sps:$4 sm:$0xff]  }
0x1097   :  { %8035 = vmatpush1.bf16.msra.mxu0 %v11190_v10  ;;  %v11282_v10 = vld [vmem:[#allocation22 + $0x804] ss:$48 sps:$4 sm:$0xff]  }
0x1098   :  { %8117 = vmatpush1.bf16.msra.mxu1 %v11193_v12  ;;  %8036 = vmatprep.subr.bf16.mxu0 %v11198_v13  ;;  %v11285_v12 = vld [vmem:[#allocation22 + $0x80c] ss:$48 sps:$4 sm:$0xff]   ;;  %v11280_v13 = vld [vmem:[#allocation22 + $0x800] ss:$48 sps:$4 sm:$0xff]  }
0x1099   :  { %8118 = vmatprep.subr.bf16.mxu1 %v11201_v15  ;;  %v11283_v15 = vld [vmem:[#allocation22 + $0x808] ss:$48 sps:$4 sm:$0xff]  }
0x109b   :  { %8037 = vmatpush1.bf16.msra.mxu0 %v11196_v16  ;;  %v11288_v16 = vld [vmem:[#allocation22 + $0x864] ss:$48 sps:$4 sm:$0xff]  }
0x109c   :  { %8119 = vmatpush1.bf16.msra.mxu1 %v11199_v17  ;;  %8038 = vmatprep.subr.bf16.mxu0 %v11204_v18 }
0x109d   :  { %8120 = vmatprep.subr.bf16.mxu1 %v11207_v19  ;;  %v11291_v19 = vld [vmem:[#allocation22 + $0x86c] ss:$48 sps:$4 sm:$0xff]  }
0x109f   :  { %8039 = vmatpush1.bf16.msra.mxu0 %v11202_v20 }
0x10a0   :  { %8121 = vmatpush1.bf16.msra.mxu1 %v11205_v21  ;;  %8040 = vmatprep.subr.bf16.mxu0 %v11210_v22 }
0x10a1   :  { %8122 = vmatprep.subr.bf16.mxu1 %v11213_v23 }
0x10a3   :  { %8041 = vmatpush1.bf16.msra.mxu0 %v11208_v58  ;;  %v11286_v58 = vld [vmem:[#allocation22 + $0x860] ss:$48 sps:$4 sm:$0xff]  }
0x10a4   :  { %8123 = vmatpush1.bf16.msra.mxu1 %v11211_v24  ;;  %8042 = vmatprep.subr.bf16.mxu0 %v11216_v25 }
0x10a5   :  { %8124 = vmatprep.subr.bf16.mxu1 %v11219_v62  ;;  %v11289_v62 = vld [vmem:[#allocation22 + $0x868] ss:$48 sps:$4 sm:$0xff]  }
0x10a7   :  { %8043 = vmatpush1.bf16.msra.mxu0 %v11214_v27  ;;  %v11294_v27 = vld [vmem:[#allocation22 + $0x8c4] ss:$48 sps:$4 sm:$0xff]  }
0x10a8   :  { %8125 = vmatpush1.bf16.msra.mxu1 %v11217_v28  ;;  %8044 = vmatprep.subr.bf16.mxu0 %v11222_v29  ;;  %v11297_v28 = vld [vmem:[#allocation22 + $0x8cc] ss:$48 sps:$4 sm:$0xff]   ;;  %v11292_v29 = vld [vmem:[#allocation22 + $0x8c0] ss:$48 sps:$4 sm:$0xff]  }
0x10a9   :  { %8126 = vmatprep.subr.bf16.mxu1 %v11225_v31  ;;  %v11295_v31 = vld [vmem:[#allocation22 + $0x8c8] ss:$48 sps:$4 sm:$0xff]  }
0x10ab   :  { %8045 = vmatpush1.bf16.msra.mxu0 %v11220_v32  ;;  %v11300_v32 = vld [vmem:[#allocation22 + $0x924] ss:$48 sps:$4 sm:$0xff]  }
0x10ac   :  { %8127 = vmatpush1.bf16.msra.mxu1 %v11223_v33  ;;  %8046 = vmatprep.subr.bf16.mxu0 %v11228_v34  ;;  %v11303_v33 = vld [vmem:[#allocation22 + $0x92c] ss:$48 sps:$4 sm:$0xff]   ;;  %v11298_v34 = vld [vmem:[#allocation22 + $0x920] ss:$48 sps:$4 sm:$0xff]  }
0x10ad   :  { %8128 = vmatprep.subr.bf16.mxu1 %v11231_v37  ;;  %v11301_v37 = vld [vmem:[#allocation22 + $0x928] ss:$48 sps:$4 sm:$0xff]  }
0x10af   :  { %8047 = vmatpush1.bf16.msra.mxu0 %v11226_v39  ;;  %v11306_v39 = vld [vmem:[#allocation22 + $0x984] ss:$48 sps:$4 sm:$0xff]  }
0x10b0   :  { %8129 = vmatpush1.bf16.msra.mxu1 %v11229_v40  ;;  %8048 = vmatprep.subr.bf16.mxu0 %v11234_v41  ;;  %v11309_v40 = vld [vmem:[#allocation22 + $0x98c] ss:$48 sps:$4 sm:$0xff]   ;;  %v11304_v41 = vld [vmem:[#allocation22 + $0x980] ss:$48 sps:$4 sm:$0xff]  }
0x10b1   :  { %8130 = vmatprep.subr.bf16.mxu1 %v11237_v42  ;;  %v11307_v42 = vld [vmem:[#allocation22 + $0x988] ss:$48 sps:$4 sm:$0xff]  }
0x10b3   :  { %8049 = vmatpush1.bf16.msra.mxu0 %v11232_v43  ;;  %v11312_v43 = vld [vmem:[#allocation22 + $0x9e4] ss:$48 sps:$4 sm:$0xff]  }
0x10b4   :  { %8131 = vmatpush1.bf16.msra.mxu1 %v11235_v44  ;;  %8050 = vmatprep.subr.bf16.mxu0 %v11240_v45  ;;  %v11315_v44 = vld [vmem:[#allocation22 + $0x9ec] ss:$48 sps:$4 sm:$0xff]   ;;  %v11310_v45 = vld [vmem:[#allocation22 + $0x9e0] ss:$48 sps:$4 sm:$0xff]  }
0x10b5   :  { %8132 = vmatprep.subr.bf16.mxu1 %v11243_v46  ;;  %v11313_v46 = vld [vmem:[#allocation22 + $0x9e8] ss:$48 sps:$4 sm:$0xff]  }
0x10b7   :  { %8051 = vmatpush1.bf16.msra.mxu0 %v11238_v47  ;;  %v11318_v47 = vld [vmem:[#allocation22 + $0xa44] ss:$48 sps:$4 sm:$0xff]  }
0x10b8   :  { %8133 = vmatpush1.bf16.msra.mxu1 %v11241_v48  ;;  %8052 = vmatprep.subr.bf16.mxu0 %v11246_v51  ;;  %v11321_v48 = vld [vmem:[#allocation22 + $0xa4c] ss:$48 sps:$4 sm:$0xff]   ;;  %v11316_v51 = vld [vmem:[#allocation22 + $0xa40] ss:$48 sps:$4 sm:$0xff]  }
0x10b9   :  { %8134 = vmatprep.subr.bf16.mxu1 %v11249_v52  ;;  %v11319_v52 = vld [vmem:[#allocation22 + $0xa48] ss:$48 sps:$4 sm:$0xff]  }
0x10bb   :  { %8053 = vmatpush1.bf16.msra.mxu0 %v11244_v53  ;;  %v11324_v53 = vld [vmem:[#allocation22 + $0xaa4] ss:$48 sps:$4 sm:$0xff]  }
0x10bc   :  { %8135 = vmatpush1.bf16.msra.mxu1 %v11247_v54  ;;  %8063 = vmatprep.subr.bf16.mxu0 %v11252_v55  ;;  %v11327_v54 = vld [vmem:[#allocation22 + $0xaac] ss:$48 sps:$4 sm:$0xff]   ;;  %v11322_v55 = vld [vmem:[#allocation22 + $0xaa0] ss:$48 sps:$4 sm:$0xff]  }
0x10bd   :  { %8145 = vmatprep.subr.bf16.mxu1 %v11255_v56  ;;  %v11325_v56 = vld [vmem:[#allocation22 + $0xaa8] ss:$48 sps:$4 sm:$0xff]  }
0x10be   :  { %8055 = vmatmul.mubr.bf16.vlgmr.msra.gmra.mrb[72].mxu0 %v12928_v14 }
0x10bf   :  { %8137 = vmatmul.mubr.bf16.vlgmr.msra.gmra.mrb[84].mxu1 %v12928_v14  ;;  %8064 = vmatpush1.bf16.msra.mxu0 %v11250_v57  ;;  %v11273_v14 = vld [vmem:[#allocation22 + $0x74c] ss:$48 sps:$4 sm:$0xff]   ;;  %v11330_v57 = vld [vmem:[#allocation22 + $0xb04] ss:$48 sps:$4 sm:$0xff]  }
0x10c0   :  { %8095 = vmatprep.mubr.bf16.mxu0 %v12932_v50  ;;  %8146 = vmatpush1.bf16.msra.mxu1 %v11253_v60  ;;  %v11333_v60 = vld [vmem:[#allocation22 + $0xb0c] ss:$48 sps:$4 sm:$0xff]  }
0x10c1   :  { %8177 = vmatprep.mubr.bf16.mxu1 %v12932_v50  ;;  %8065 = vmatprep.subr.bf16.mxu0 %v11258_v61  ;;  %v11274_v50 = vld [vmem:[#allocation22 + $0x7a0] ss:$48 sps:$4 sm:$0xff]  }
0x10c2   :  { %8147 = vmatprep.subr.bf16.mxu1 %v11261_v49  ;;  %v11328_v61 = vld [vmem:[#allocation22 + $0xb00] ss:$48 sps:$4 sm:$0xff]   ;;  %v11331_v49 = vld [vmem:[#allocation22 + $0xb08] ss:$48 sps:$4 sm:$0xff]  }
0x10c3   :  { %8066 = vmatpush1.bf16.msra.mxu0 %v11256_v30  ;;  %v11336_v30 = vld [vmem:[#allocation22 + $0xb64] ss:$48 sps:$4 sm:$0xff]  }
0x10c4   :  { %8148 = vmatpush1.bf16.msra.mxu1 %v11259_v63  ;;  %8067 = vmatprep.subr.bf16.mxu0 %v11264_v0  ;;  %v11339_v63 = vld [vmem:[#allocation22 + $0xb6c] ss:$48 sps:$4 sm:$0xff]   ;;  %v11334_v0 = vld [vmem:[#allocation22 + $0xb60] ss:$48 sps:$4 sm:$0xff]  }
0x10c5   :  { %8149 = vmatprep.subr.bf16.mxu1 %v11267_v1  ;;  %v11337_v1 = vld [vmem:[#allocation22 + $0xb68] ss:$48 sps:$4 sm:$0xff]  }
0x10c7   :  { %8068 = vmatpush1.bf16.msra.mxu0 %v11262_v11  ;;  %v11342_v11 = vld [vmem:[#allocation22 + $0xbc4] ss:$48 sps:$4 sm:$0xff]  }
0x10c8   :  { %8150 = vmatpush1.bf16.msra.mxu1 %v11265_v2  ;;  %8069 = vmatprep.subr.bf16.mxu0 %v11270_v3  ;;  %v11345_v2 = vld [vmem:[#allocation22 + $0xbcc] ss:$48 sps:$4 sm:$0xff]   ;;  %v11340_v3 = vld [vmem:[#allocation22 + $0xbc0] ss:$48 sps:$4 sm:$0xff]  }
0x10c9   :  { %8151 = vmatprep.subr.bf16.mxu1 %v11273_v14  ;;  %v11343_v14 = vld [vmem:[#allocation22 + $0xbc8] ss:$48 sps:$4 sm:$0xff]  }
0x10cb   :  { %8070 = vmatpush1.bf16.msra.mxu0 %v11268_v4  ;;  %v5710_v4 = vld [vmem:[#allocation24] sm:$0xff] }
0x10cc   :  { %8152 = vmatpush1.bf16.msra.mxu1 %v11271_v5  ;;  %8071 = vmatprep.subr.bf16.mxu0 %v11276_v7  ;;  %v5717_v5 = vrot.slane %v5710_v4, %v12906_v36  ;;  %v5725_v7 = vrot.slane %v5710_v4, %v12939_v6 }
0x10cd   :  { %8153 = vmatprep.subr.bf16.mxu1 %v11279_v8  ;;  %v5721_v8 = vrot.slane %v5710_v4, %v12909_v38 }
0x10cf   :  { %8072 = vmatpush1.bf16.msra.mxu0 %v11274_v50  ;;  %v5729_v50 = vrot.slane %v5710_v4, %v12916_v59 }
0x10d0   :  { %8154 = vmatpush1.bf16.msra.mxu1 %v11277_v9  ;;  %8073 = vmatprep.subr.bf16.mxu0 %v11282_v10 }
0x10d1   :  { %v12962_v17 = vpop.f32.mrb[64].mxu0  ;;  %v12964_v18 = vpop.f32.mrb[76].mxu1  ;;  %8155 = vmatprep.subr.bf16.mxu1 %v11285_v12 }
0x10d2   :  { %v12966_v20 = vpop.f32.mrb[65].mxu0  ;;  %v12968_v21 = vpop.f32.mrb[77].mxu1  ;;  %v10564_v9 = vadd.f32 %v12962_v17, %v5717_v5  ;;  %v10566_v10 = vadd.f32 %v12964_v18, %v5725_v7  ;;  %v5740_v17 = vsub.s32 6, %v12903_v35  ;;  %v5736_v18 = vsub.s32 5, %v12903_v35  ;;  %v11358_v7 = vld [vmem:[#allocation25 + $0x58] sm:$0xff]  }
0x10d3   :  { %v7773_v22 = vpop.f32.mrb[66].mxu0  ;;  %v7855_v23 = vpop.f32.mrb[78].mxu1  ;;  %8074 = vmatpush1.bf16.msra.mxu0 %v11280_v13  ;;  %v10565_v12 = vadd.f32 %v12966_v20, %v5721_v8  ;;  %v10567_v13 = vadd.f32 %v12968_v21, %v5729_v50  ;;  %v5744_v21 = vsub.s32 7, %v12903_v35  ;;  %v11359_v8 = vld [vmem:[#allocation25 + $0xd8] sm:$0xff]  }
0x10d4   :  { %8156 = vmatpush1.bf16.msra.mxu1 %v11283_v15  ;;  %v7774_v24 = vpop.f32.mrb[67].mxu0  ;;  %v7856_v25 = vpop.f32.mrb[79].mxu1  ;;  %8075 = vmatprep.subr.bf16.mxu0 %v11288_v16  ;;  %v9229_v15 = vmul.f32 -1.442695, %v10564_v9  ;;  %v9231_v16 = vmul.f32 -1.442695, %v10566_v10 }
0x10d5   :  { %8157 = vmatprep.subr.bf16.mxu1 %v11291_v19  ;;  %v9232_v19 = vmul.f32 -1.442695, %v10567_v13  ;;  %v11360_v10 = vld [vmem:[#allocation25 + $0x18] sm:$0xff]  }
0x10d6   :  { %11378 = vpow2.f32 %v9229_v15  ;;  %v11362_v15 = vld [vmem:[#allocation25 + $0x60] sm:$0xff]  }
0x10d7   :  { %8076 = vmatpush1.bf16.msra.mxu0 %v11286_v58  ;;  %11380 = vpow2.f32 %v9231_v16  ;;  %v5732_v58 = vsub.s32 4, %v12903_v35  ;;  %v11363_v16 = vld [vmem:[#allocation25 + $0xe0] sm:$0xff]  }
0x10d8   :  { %8158 = vmatpush1.bf16.msra.mxu1 %v11289_v62  ;;  %8077 = vmatprep.subr.bf16.mxu0 %v11294_v27 }
0x10d9   :  { %8159 = vmatprep.subr.bf16.mxu1 %v11297_v28  ;;  %v5733_v28 = vrot.slane %v5710_v4, %v5732_v58  ;;  %v11368_v58 = vld [vmem:[#allocation25 + $0x28] sm:$0xff]  }
0x10db   :  { %8078 = vmatpush1.bf16.msra.mxu0 %v11292_v29 }
0x10dc   :  { %8160 = vmatpush1.bf16.msra.mxu1 %v11295_v31  ;;  %8079 = vmatprep.subr.bf16.mxu0 %v11300_v32  ;;  %v5741_v31 = vrot.slane %v5710_v4, %v5740_v17  ;;  %v5737_v32 = vrot.slane %v5710_v4, %v5736_v18  ;;  %v11370_v17 = vld [vmem:[#allocation25 + $0x70] sm:$0xff]  }
0x10dd   :  { %8161 = vmatprep.subr.bf16.mxu1 %v11303_v33  ;;  %v5745_v33 = vrot.slane %v5710_v4, %v5744_v21  ;;  %v11371_v18 = vld [vmem:[#allocation25 + $0xf0] sm:$0xff]   ;;  %v11374_v21 = vld [vmem:[#allocation25 + $0x78] sm:$0xff]  }
0x10df   :  { %8080 = vmatpush1.bf16.msra.mxu0 %v11298_v34 }
0x10e0   :  { %8162 = vmatpush1.bf16.msra.mxu1 %v11301_v37  ;;  %8081 = vmatprep.subr.bf16.mxu0 %v11306_v39  ;;  %v11379_v22 = vpop.eup %11378 }
0x10e1   :  { %8163 = vmatprep.subr.bf16.mxu1 %v11309_v40  ;;  %v11381_v23 = vpop.eup %11380  ;;  %v8198_v25 = vadd.f32 1.0, %v11379_v22  ;;  %v11366_v22 = vld [vmem:[#allocation25 + $0x68] sm:$0xff]  }
0x10e2   :  { %v8200_v62 = vadd.f32 1.0, %v11381_v23  ;;  %v11367_v23 = vld [vmem:[#allocation25 + $0xe8] sm:$0xff]  }
0x10e3   :  { %8082 = vmatpush1.bf16.msra.mxu0 %v11304_v41 }
0x10e4   :  { %8164 = vmatpush1.bf16.msra.mxu1 %v11307_v42  ;;  %8083 = vmatprep.subr.bf16.mxu0 %v11312_v43 }
0x10e5   :  { %8165 = vmatprep.subr.bf16.mxu1 %v11315_v44 }
0x10e7   :  { %8084 = vmatpush1.bf16.msra.mxu0 %v11310_v45 }
0x10e8   :  { %8166 = vmatpush1.bf16.msra.mxu1 %v11313_v46  ;;  %8085 = vmatprep.subr.bf16.mxu0 %v11318_v47  ;;  %v11346_v47 = vld [vmem:[#allocation25 + $0x40] sm:$0xff]  }
0x10e9   :  { %8167 = vmatprep.subr.bf16.mxu1 %v11321_v48  ;;  %v11347_v48 = vld [vmem:[#allocation25 + $0xc0] sm:$0xff]  }
0x10eb   :  { %8086 = vmatpush1.bf16.msra.mxu0 %v11316_v51 }
0x10ec   :  { %8168 = vmatpush1.bf16.msra.mxu1 %v11319_v52  ;;  %8087 = vmatprep.subr.bf16.mxu0 %v11324_v53  ;;  %v11348_v52 = vld [vmem:[#allocation25] sm:$0xff]  }
0x10ed   :  { %8169 = vmatprep.subr.bf16.mxu1 %v11327_v54  ;;  %v11349_v53 = vld [vmem:[#allocation25 + $0x80] sm:$0xff]   ;;  %v11350_v54 = vld [vmem:[#allocation25 + $0x48] sm:$0xff]  }
0x10ef   :  { %8088 = vmatpush1.bf16.msra.mxu0 %v11322_v55  ;;  %v11351_v55 = vld [vmem:[#allocation25 + $0xc8] sm:$0xff]  }
0x10f0   :  { %8170 = vmatpush1.bf16.msra.mxu1 %v11325_v56  ;;  %8089 = vmatprep.subr.bf16.mxu0 %v11330_v57  ;;  %v11352_v56 = vld [vmem:[#allocation25 + $0x8] sm:$0xff]  }
0x10f1   :  { %8171 = vmatprep.subr.bf16.mxu1 %v11333_v60  ;;  %v11353_v57 = vld [vmem:[#allocation25 + $0x88] sm:$0xff]  }
0x10f3   :  { %8090 = vmatpush1.bf16.msra.mxu0 %v11328_v61 }
0x10f4   :  { %8172 = vmatpush1.bf16.msra.mxu1 %v11331_v49  ;;  %8091 = vmatprep.subr.bf16.mxu0 %v11336_v30  ;;  %v11354_v30 = vld [vmem:[#allocation25 + $0x50] sm:$0xff]  }
0x10f5   :  { %8173 = vmatprep.subr.bf16.mxu1 %v11339_v63  ;;  %v11355_v63 = vld [vmem:[#allocation25 + $0xd0] sm:$0xff]  }
0x10f7   :  { %8092 = vmatpush1.bf16.msra.mxu0 %v11334_v0 }
0x10f8   :  { %8174 = vmatpush1.bf16.msra.mxu1 %v11337_v1  ;;  %8093 = vmatprep.subr.bf16.mxu0 %v11342_v11  ;;  %v11356_v1 = vld [vmem:[#allocation25 + $0x10] sm:$0xff]  }
0x10f9   :  { %8175 = vmatprep.subr.bf16.mxu1 %v11345_v2  ;;  %v11357_v11 = vld [vmem:[#allocation25 + $0x90] sm:$0xff]  }
0x10fb   :  { %8094 = vmatpush1.bf16.msra.mxu0 %v11340_v3 }
0x10fc   :  { %8176 = vmatpush1.bf16.msra.mxu1 %v11343_v14  ;;  %9588 = vmatprep.subr.bf16.mxu0 %v11346_v47 }
0x10fd   :  { %9610 = vmatprep.subr.bf16.mxu1 %v11347_v48 }
0x10fe   :  { %8096 = vmatmul.mubr.bf16.vlgmr.msra.gmra.mrb[72].mxu0 %v12944_v26 }
0x10ff   :  { %8178 = vmatmul.mubr.bf16.vlgmr.msra.gmra.mrb[84].mxu1 %v12944_v26  ;;  %v9230_v26 = vmul.f32 -1.442695, %v10565_v12  ;;  %9589 = vmatpush3.bf16.msra.mxu0 %v11348_v52  ;;  %v11361_v12 = vld [vmem:[#allocation25 + $0x98] sm:$0xff]  }
0x1100   :  { %9611 = vmatpush3.bf16.msra.mxu1 %v11349_v53  ;;  %9590 = vmatprep.subr.bf16.mxu0 %v11350_v54 }
0x1101   :  { %11382 = vpow2.f32 %v9230_v26  ;;  %9612 = vmatprep.subr.bf16.mxu1 %v11351_v55  ;;  %v11364_v26 = vld [vmem:[#allocation25 + $0x20] sm:$0xff]  }
0x1102   :  { %11384 = vpow2.f32 %v9232_v19  ;;  %v11365_v19 = vld [vmem:[#allocation25 + $0xa0] sm:$0xff]  }
0x1103   :  { %11386 = vrcp.f32 %v8198_v25  ;;  %9591 = vmatpush3.bf16.msra.mxu0 %v11352_v56  ;;  %v11373_v25 = vld [vmem:[#allocation25 + $0xb0] sm:$0xff]  }
0x1104   :  { %11388 = vrcp.f32 %v8200_v62  ;;  %9613 = vmatpush3.bf16.msra.mxu1 %v11353_v57  ;;  %9592 = vmatprep.subr.bf16.mxu0 %v11354_v30  ;;  %v11375_v62 = vld [vmem:[#allocation25 + $0xf8] sm:$0xff]  }
0x1105   :  { %9614 = vmatprep.subr.bf16.mxu1 %v11355_v63 }
0x1107   :  { %9593 = vmatpush3.bf16.msra.mxu0 %v11356_v1 }
0x1108   :  { %9615 = vmatpush3.bf16.msra.mxu1 %v11357_v11  ;;  %9594 = vmatprep.subr.bf16.mxu0 %v11358_v7 }
0x1109   :  { %9616 = vmatprep.subr.bf16.mxu1 %v11359_v8 }
0x110b   :  { %v11383_v24 = vpop.eup %11382  ;;  %9595 = vmatpush3.bf16.msra.mxu0 %v11360_v10 }
0x110c   :  { %v11385_v20 = vpop.eup %11384  ;;  %v8199_v27 = vadd.f32 1.0, %v11383_v24  ;;  %9617 = vmatpush3.bf16.msra.mxu1 %v11361_v12  ;;  %9596 = vmatprep.subr.bf16.mxu0 %v11362_v15  ;;  %v11369_v24 = vld [vmem:[#allocation25 + $0xa8] sm:$0xff]  }
0x110d   :  { %v8201_v29 = vadd.f32 1.0, %v11385_v20  ;;  %v11387_v60 = vpop.eup %11386  ;;  %9618 = vmatprep.subr.bf16.mxu1 %v11363_v16  ;;  %v11372_v20 = vld [vmem:[#allocation25 + $0x30] sm:$0xff]  }
0x110e   :  { %11390 = vrcp.f32 %v8199_v27  ;;  %v11389_v61 = vpop.eup %11388  ;;  %v11376_v27 = vld [vmem:[#allocation25 + $0x38] sm:$0xff]  }
0x110f   :  { %11392 = vrcp.f32 %v8201_v29  ;;  %9597 = vmatpush3.bf16.msra.mxu0 %v11364_v26  ;;  %v5711_v29 = vld [vmem:[#allocation24 + $0x8] sm:$0xf] }
0x1110   :  { %9619 = vmatpush3.bf16.msra.mxu1 %v11365_v19  ;;  %9598 = vmatprep.subr.bf16.mxu0 %v11366_v22 }
0x1111   :  { %9620 = vmatprep.subr.bf16.mxu1 %v11367_v23 }
0x1113   :  { %9599 = vmatpush3.bf16.msra.mxu0 %v11368_v58 }
0x1114   :  { %9621 = vmatpush3.bf16.msra.mxu1 %v11369_v24  ;;  %9600 = vmatprep.subr.bf16.mxu0 %v11370_v17 }
0x1115   :  { %9622 = vmatprep.subr.bf16.mxu1 %v11371_v18 }
0x1117   :  { %9601 = vmatpush3.bf16.msra.mxu0 %v11372_v20 }
0x1118   :  { %v11391_v49 = vpop.eup %11390  ;;  %9623 = vmatpush3.bf16.msra.mxu1 %v11373_v25  ;;  %9602 = vmatprep.subr.bf16.mxu0 %v11374_v21 }
0x1119   :  { %v11393_v0 = vpop.eup %11392  ;;  %9624 = vmatprep.subr.bf16.mxu1 %v11375_v62 }
0x111b   :  { %9603 = vmatpush3.bf16.msra.mxu0 %v11376_v27 }
0x1151   :  { %v7933_v34 = vpop.f32.mrb[68].mxu0 }
0x1152   :  { %v10568_v37 = vadd.f32 %v7933_v34, %v5733_v28  ;;  %v8015_v39 = vpop.f32.mrb[80].mxu1  ;;  %v7935_v40 = vpop.f32.mrb[69].mxu0  ;;  %v11377_v28 = vld [vmem:[#allocation25 + $0xb8] sm:$0xff]   ;;  %v5761_v34 = vrot.slane %v5711_v29, %v12916_v59 }
0x1153   :  { %v10570_v41 = vadd.f32 %v8015_v39, %v5741_v31  ;;  %v10569_v42 = vadd.f32 %v7935_v40, %v5737_v32  ;;  %v8017_v43 = vpop.f32.mrb[81].mxu1  ;;  %v7937_v44 = vpop.f32.mrb[70].mxu0  ;;  %9625 = vmatpush3.bf16.msra.mxu1 %v11377_v28  ;;  %v5749_v31 = vrot.slane %v5711_v29, %v12906_v36  ;;  %v5757_v32 = vrot.slane %v5711_v29, %v12939_v6 }
0x1154   :  { %11394 = vtanh.f32 %v10568_v37  ;;  %v10571_v35 = vadd.f32 %v8017_v43, %v5745_v33  ;;  %v8019_v45 = vpop.f32.mrb[82].mxu1  ;;  %v7938_v46 = vpop.f32.mrb[71].mxu0  ;;  %v5753_v33 = vrot.slane %v5711_v29, %v12909_v38 }
0x1155   :  { %11396 = vtanh.f32 %v10570_v41  ;;  %v8020_v51 = vpop.f32.mrb[83].mxu1 }
0x1156   :  { %11398 = vtanh.f32 %v10569_v42 }
0x1157   :  { %11400 = vtanh.f32 %v10571_v35 }
0x115e   :  { %v11395_v2 = vpop.eup %11394 }
0x115f   :  { %v11397_v3 = vpop.eup %11396  ;;  %v12984_v14 = vmul.f32 %v11395_v2, %v11387_v60 }
0x1160   :  { %v11399_v4 = vpop.eup %11398  ;;  %v12986_v5 = vmul.f32 %v11397_v3, %v11389_v61 }
0x1161   :  { %v11401_v50 = vpop.eup %11400  ;;  %v12988_v9 = vmul.f32 %v11399_v4, %v11391_v49 }
0x1162   :  { %v12990_v13 = vmul.f32 %v11401_v50, %v11393_v0 }
0x11d1   :  { %v8097_v37 = vpop.f32.mrb[72].mxu0 }
0x11d2   :  { %v10572_v39 = vadd.f32 %v8097_v37, %v5749_v31  ;;  %v8179_v40 = vpop.f32.mrb[84].mxu1  ;;  %v8099_v41 = vpop.f32.mrb[73].mxu0 }
0x11d3   :  { %v10574_v42 = vadd.f32 %v8179_v40, %v5757_v32  ;;  %v10573_v43 = vadd.f32 %v8099_v41, %v5753_v33  ;;  %v8181_v44 = vpop.f32.mrb[85].mxu1  ;;  %v8101_v35 = vpop.f32.mrb[74].mxu0 }
0x11d4   :  { %v9233_v45 = vmul.f32 -1.442695, %v10572_v39  ;;  %v10575_v46 = vadd.f32 %v8181_v44, %v5761_v34  ;;  %v8183_v47 = vpop.f32.mrb[86].mxu1  ;;  %v8102_v48 = vpop.f32.mrb[75].mxu0 }
0x11d5   :  { %v9235_v51 = vmul.f32 -1.442695, %v10574_v42  ;;  %v9234_v36 = vmul.f32 -1.442695, %v10573_v43  ;;  %v8184_v52 = vpop.f32.mrb[87].mxu1 }
0x11d6   :  { %11402 = vpow2.f32 %v9233_v45  ;;  %v9236_v6 = vmul.f32 -1.442695, %v10575_v46 }
0x11d7   :  { %11404 = vpow2.f32 %v9235_v51 }
0x11d8   :  { %11406 = vpow2.f32 %v9234_v36 }
0x11d9   :  { %11408 = vpow2.f32 %v9236_v6 }
0x11da   :  { %11410 = vtanh.f32 %v12984_v14 }
0x11db   :  { %11412 = vtanh.f32 %v12986_v5 }
0x11dc   :  { %11414 = vtanh.f32 %v12988_v9 }
0x11dd   :  { %11416 = vtanh.f32 %v12990_v13  ;;  %v9237_v13 = vld [vmem:[#allocation27] ss:$0 sm:$0xff] }
0x11e0   :  { %v11403_v38 = vpop.eup %11402 }
0x11e1   :  { %v11405_v59 = vpop.eup %11404  ;;  %v8226_v53 = vadd.f32 1.0, %v11403_v38 }
0x11e2   :  { %v11407_v54 = vpop.eup %11406  ;;  %v8228_v55 = vadd.f32 1.0, %v11405_v59 }
0x11e3   :  { %v11409_v56 = vpop.eup %11408  ;;  %11418 = vrcp.f32 %v8226_v53  ;;  %v8227_v57 = vadd.f32 1.0, %v11407_v54 }
0x11e4   :  { %11420 = vrcp.f32 %v8228_v55  ;;  %v8229_v60 = vadd.f32 1.0, %v11409_v56  ;;  %v11411_v61 = vpop.eup %11410 }
0x11e5   :  { %11422 = vrcp.f32 %v8227_v57  ;;  %v11413_v49 = vpop.eup %11412 }
0x11e6   :  { %11424 = vrcp.f32 %v8229_v60  ;;  %v11415_v30 = vpop.eup %11414 }
0x11e7   :  { %v11417_v63 = vpop.eup %11416 }
0x11ed   :  { %v11419_v0 = vpop.eup %11418 }
0x11ee   :  { %v11421_v1 = vpop.eup %11420  ;;  %v8246_v11 = vmul.f32 %v11419_v0, %v11411_v61 }
0x11ef   :  { %v11423_v2 = vpop.eup %11422  ;;  %v8248_v3 = vmul.f32 %v11421_v1, %v11413_v49 }
0x11f0   :  { %v11425_v14 = vpop.eup %11424  ;;  %v8247_v4 = vmul.f32 %v11423_v2, %v11415_v30  ;;  %v8250_v50 = vpack.c.bf16 %v8246_v11, %v8246_v11 }
0x11f1   :  { %v8249_v5 = vmul.f32 %v11425_v14, %v11417_v63  ;;  %v8252_v9 = vpack.c.bf16 %v8248_v3, %v8248_v3 }
0x11f2   :  { %v8251_v7 = vpack.c.bf16 %v8247_v4, %v8247_v4 }
0x11f3   :  { %v8253_v8 = vpack.c.bf16 %v8249_v5, %v8249_v5 }
0x11f4   :  { %8549 = vmatprep.mubr.bf16.mxu0 %v8251_v7 }
0x11f5   :  { %8589 = vmatprep.mubr.bf16.mxu1 %v8253_v8  ;;  %8550 = vmatmul.mubr.bf16.vlgmr.msra.gmra.mrb[76].mxu0 %v8250_v50 }
0x11f6   :  { %8590 = vmatmul.mubr.bf16.vlgmr.msra.gmra.mrb[88].mxu1 %v8252_v9 }
0x12c8   :  { %v9604_v10 = vpop.f32.mrb[76].mxu0 }
0x12c9   :  { %v9626_v12 = vpop.f32.mrb[88].mxu1  ;;  %v9605_v15 = vpop.f32.mrb[77].mxu0 }
0x12ca   :  { %v9606_v16 = vadd.f32 %v9605_v15, %v9604_v10  ;;  %v9627_v26 = vpop.f32.mrb[89].mxu1  ;;  %v9607_v19 = vpop.f32.mrb[78].mxu0 }
0x12cb   :  { %v9628_v22 = vadd.f32 %v9627_v26, %v9626_v12  ;;  %v9629_v23 = vpop.f32.mrb[90].mxu1  ;;  %v9608_v58 = vpop.f32.mrb[79].mxu0 }
0x12cc   :  { %v8552_v24 = vadd.f32 %v9606_v16, %v9237_v13  ;;  %v9630_v17 = vpop.f32.mrb[91].mxu1 }
0x12ce   :  { %v8592_v18 = vadd.f32 %v9628_v22, %v8552_v24 }
0x12d0   :  { %8597 = vst [vmem:[%s13048_s21] sm:$0x3] %v8592_v18 }
0x12d1   :  { %8602 = vsyncpa [#allocation3], 1 }
0x12d2   :  { %8603 = vsyncpa [#allocation5], 1 }
0x12d3   :  { %8604 = vsyncpa [#allocation8], 1 }
0x12d4   :  { %8605 = vsyncpa [#allocation11], 1 }
0x12d5   :  { %8606 = vsyncpa [#allocation14], 1 }
0x12d6   :  { %8607 = vsyncpa [#allocation17], 1 }
0x12d7   :  { %8608 = vsyncpa [#allocation20], 1 }
0x12d8   :  { %8609 = vsyncpa [#allocation23], 1 }
0x12d9   :  { %8610 = vsyncpa [#allocation26], 1 }

</bundles_post_ra>
